<compile_context>
chip_gen: v6e
topology: v6e:2x2x1
jax: 0.10.0
libtpu: 0.0.40
codegen_flags: <defaults>
</compile_context>

<pallas_src>
import jax
import jax.numpy as jnp
from jax.experimental import pallas as pl
from jax.experimental.pallas import tpu as pltpu

# ------------------------- model hyper-parameters -------------------------
V = 50            # vocab_size
D = 300           # embed_size (CNN output 3*100 feeds proj_input(300,300))
H = 32            # hidden_size
CO = 100          # conv out channels per kernel size
KS = (3, 4, 5)    # conv kernel heights
NUM_CLASSES = 5

B = 2             # batch
S = 3             # max_sent_seq
W = 8             # max_word_seq

# ------------------------- derived kernel constants -------------------------
G = 128                       # lane-padded width of one conv kernel-size group
N_CONV = len(KS) * G          # 384 fused (lane-dense) conv output channels
K_MIN = min(KS)
K_MAX = max(KS)               # 5 conv taps
T = W - K_MIN + 1             # 6 pooled time positions (for the widest valid range)
W_PAD = W + (K_MAX - K_MIN)   # 10 zero-padded word positions
H2 = 2 * H                    # 64 fused fwd|bwd hidden width


# ------------------------- Pallas kernel: fused CNN + biRNN + classifier -------------------------
def toulmin_fused_kernel(emb_ref, w_taps_ref, b_conv_ref, mask_ref,
                         w_init_ref, b_init_ref, w_in_ref, b_in_ref,
                         w_hh_ref, w_cls_ref, b_cls_ref,
                         pred_ref, h_ref):
    """One grid step = one sentence: conv+pool -> (init hidden) -> biRNN cell -> classifier.

    emb_ref  : (1, B, W_PAD, D)  zero-padded embedded tokens of the current sentence
    w_taps   : (K_MAX, D, N_CONV) per-tap conv weights, 3 kernel sizes fused along N
    mask_ref : (T, N_CONV)        1.0 where the time position is valid for that group
    w_init   : (N_CONV, 2H)       init_hidden weight duplicated for both directions
    w_in     : (N_CONV, 2H)       proj_input folded into [W_ih_fwd | W_ih_bwd]
    w_hh     : (2H, 2H)           block-diagonal [W_hh_fwd, 0; 0, W_hh_bwd]
    w_cls    : (2H, G)            classifier, output lanes padded to 128
    pred_ref : (1, B, G)          lane-padded predictions (cols >= NUM_CLASSES are 0)
    h_ref    : (B, 2H)            VMEM scratch carrying [h_fwd | h_bwd] across sentences
    """
    x = emb_ref[0]                                            # (B, W_PAD, D)
    bsz = x.shape[0]

    # --- CNN_Text: per-tap conv as accumulated matmuls, all 3 kernel sizes at once ---
    acc = jnp.zeros((bsz * T, N_CONV), jnp.float32)
    for k in range(K_MAX):                                    # static 5-tap loop
        xs = x[:, k:k + T, :].reshape(bsz * T, D)             # shifted window rows
        acc = acc + jnp.dot(xs, w_taps_ref[k],
                            preferred_element_type=jnp.float32)
    y = jnp.maximum(acc + b_conv_ref[...], 0.0)               # + bias, ReLU  (B*T, N_CONV)

    # masked max-over-time per batch row (mask keeps relu>=0 exact per kernel size)
    rows = []
    for bi in range(bsz):                                     # static, B is tiny
        y_b = y[bi * T:(bi + 1) * T] * mask_ref[...]          # (T, N_CONV)
        rows.append(jnp.max(y_b, axis=0, keepdims=True))
    feat = jnp.concatenate(rows, axis=0)                      # (B, N_CONV) padded CNN feature
    # TODO(synk): nn.Dropout(0.5) on CNN features is identity (eval mode).

    # --- init_hidden from the CNN feature of sentence 0 (duplicated fwd|bwd) ---
    @pl.when(pl.program_id(0) == 0)
    def _init():
        h_ref[...] = (jnp.dot(feat, w_init_ref[...],
                              preferred_element_type=jnp.float32)
                      + b_init_ref[...])

    # --- bidirectional RNN cell (seq_len == 1), proj_input folded into w_in ---
    h_new = jnp.tanh(
        jnp.dot(feat, w_in_ref[...], preferred_element_type=jnp.float32)
        + b_in_ref[...]
        + jnp.dot(h_ref[...], w_hh_ref[...], preferred_element_type=jnp.float32))
    h_ref[...] = h_new

    # --- classifier on [h_fwd | h_bwd] (already fused), lane-dense padded output ---
    pred_ref[0] = (jnp.dot(h_new, w_cls_ref[...],
                           preferred_element_type=jnp.float32)
                   + b_cls_ref[...])


def toulmin_rnn_pallas(emb_pad, kp):
    """emb_pad: (S, B, W_PAD, D) f32 -> lane-padded predictions (S, B, G)."""
    n_sent, bsz = emb_pad.shape[0], emb_pad.shape[1]

    def full(shape):
        nd = len(shape)
        return pl.BlockSpec(shape, lambda s, _nd=nd: (0,) * _nd)

    return pl.pallas_call(
        toulmin_fused_kernel,
        out_shape=jax.ShapeDtypeStruct((n_sent, bsz, G), jnp.float32),
        grid=(n_sent,),
        in_specs=[
            pl.BlockSpec((1, bsz, W_PAD, D), lambda s: (s, 0, 0, 0)),   # sentence tokens
            full((K_MAX, D, N_CONV)),                                   # fused conv taps
            full((1, N_CONV)),                                          # conv bias
            full((T, N_CONV)),                                          # valid-time mask
            full((N_CONV, H2)), full((1, H2)),                          # init_hidden (dup)
            full((N_CONV, H2)), full((1, H2)),                          # proj+ih fused
            full((H2, H2)),                                             # block-diag hh
            full((H2, G)), full((1, G)),                                # classifier (padded)
        ],
        out_specs=pl.BlockSpec((1, bsz, G), lambda s: (s, 0, 0)),
        scratch_shapes=[pltpu.VMEM((bsz, H2), jnp.float32)],
        compiler_params=pltpu.CompilerParams(
            dimension_semantics=("arbitrary",)),   # hidden carried across sentences
    )(emb_pad, kp["w_taps"], kp["b_conv"], kp["mask"],
      kp["w_init2_t"], kp["b_init2"], kp["w_in_t"], kp["b_in"],
      kp["w_hh_blk"], kp["w_cls_t"], kp["b_cls"])


# ------------------------- parameter construction (deterministic) -------------------------
def make_params(key):
    ks = jax.random.split(key, 16)
    uni = lambda k, shape, a: jax.random.uniform(k, shape, jnp.float32, -a, a)
    orth = jax.nn.initializers.orthogonal()

    p = {}
    p["embed"] = jax.random.normal(ks[0], (V, D), jnp.float32) * 0.1      # "pretrained"
    p["conv_w"] = [uni(ks[1 + i], (CO, K, D), 0.05) for i, K in enumerate(KS)]
    p["conv_b"] = [uni(ks[4 + i], (CO,), 0.05) for i in range(len(KS))]
    p["w_proj"] = uni(ks[7], (D, D), 0.1)
    p["b_proj"] = jnp.zeros((D,), jnp.float32)
    p["w_init"] = uni(ks[8], (H, D), 0.1)
    p["b_init"] = jnp.zeros((H,), jnp.float32)
    p["w_cls"] = uni(ks[9], (NUM_CLASSES, 2 * H), 0.1)
    p["b_cls"] = jnp.zeros((NUM_CLASSES,), jnp.float32)
    # biRNN weights: orthogonal init, biases zero (matching init_weights)
    p["w_ih_f"] = orth(ks[10], (H, D), jnp.float32)
    p["w_hh_f"] = orth(ks[11], (H, H), jnp.float32)
    p["w_ih_b"] = orth(ks[12], (H, D), jnp.float32)
    p["w_hh_b"] = orth(ks[13], (H, H), jnp.float32)
    return p


def _pad_feature_rows(w):
    """(300, N) weight acting on [y3|y4|y5] -> (N_CONV, N) weight acting on the
    lane-padded feature [y3|0|y4|0|y5|0]; pad rows are zero."""
    out = jnp.zeros((N_CONV, w.shape[1]), jnp.float32)
    for g in range(len(KS)):
        out = out.at[g * G:g * G + CO].set(w[g * CO:(g + 1) * CO])
    return out


def prepare_kernel_params(p):
    """Host-side: pad/fold/fuse logical params into the kernel layouts."""
    kp = {"embed": p["embed"]}

    # fused per-tap conv weights: (K_MAX, D, N_CONV); group g occupies lanes [g*G, g*G+CO)
    w_taps = jnp.zeros((K_MAX, D, N_CONV), jnp.float32)
    b_conv = jnp.zeros((1, N_CONV), jnp.float32)
    for g, K in enumerate(KS):
        wt = jnp.transpose(p["conv_w"][g], (1, 2, 0))          # (K, D, CO)
        w_taps = w_taps.at[:K, :, g * G:g * G + CO].set(wt)
        b_conv = b_conv.at[0, g * G:g * G + CO].set(p["conv_b"][g])
    kp["w_taps"] = w_taps
    kp["b_conv"] = b_conv

    # valid-time mask per kernel-size group (t < W - K + 1)
    col_group = jnp.arange(N_CONV) // G
    t_valid = (W - jnp.asarray(KS, jnp.int32) + 1)[col_group]   # (N_CONV,)
    kp["mask"] = (jnp.arange(T)[:, None] < t_valid[None, :]).astype(jnp.float32)

    # init_hidden duplicated for both directions, on the padded feature layout
    w_init_t = _pad_feature_rows(jnp.transpose(p["w_init"]))    # (N_CONV, H)
    kp["w_init2_t"] = jnp.concatenate([w_init_t, w_init_t], axis=1)       # (N_CONV, 2H)
    kp["b_init2"] = jnp.tile(p["b_init"][None, :], (1, 2))                # (1, 2H)

    # fold proj_input into the RNN input weights; fuse fwd/bwd along lanes
    w_proj_t = jnp.transpose(p["w_proj"])                                 # (300, 300)
    w_ih_cat_t = jnp.concatenate([jnp.transpose(p["w_ih_f"]),
                                  jnp.transpose(p["w_ih_b"])], axis=1)    # (300, 2H)
    kp["w_in_t"] = _pad_feature_rows(w_proj_t @ w_ih_cat_t)               # (N_CONV, 2H)
    kp["b_in"] = p["b_proj"][None, :] @ w_ih_cat_t                        # (1, 2H) (zeros)

    # block-diagonal hidden->hidden weight: one matmul updates both directions
    w_hh = jnp.zeros((H2, H2), jnp.float32)
    w_hh = w_hh.at[:H, :H].set(jnp.transpose(p["w_hh_f"]))
    w_hh = w_hh.at[H:, H:].set(jnp.transpose(p["w_hh_b"]))
    kp["w_hh_blk"] = w_hh

    # classifier, output lanes padded to 128
    kp["w_cls_t"] = jnp.zeros((H2, G), jnp.float32).at[:, :NUM_CLASSES].set(
        jnp.transpose(p["w_cls"]))
    kp["b_cls"] = jnp.zeros((1, G), jnp.float32).at[0, :NUM_CLASSES].set(p["b_cls"])
    return kp


# ------------------------- forward pass -------------------------
def toulmin_rnn_forward(paragraphs, kp):
    """paragraphs: (B, S, W) int32 -> (B, S, NUM_CLASSES) float32."""
    ids = jnp.transpose(paragraphs, (1, 0, 2))                      # (S, B, W)
    emb = kp["embed"][ids]                                          # (S, B, W, D) gather (glue)
    emb = jnp.pad(emb, ((0, 0), (0, 0), (0, W_PAD - W), (0, 0)))    # zero-pad time axis
    preds_pad = toulmin_rnn_pallas(emb, kp)                         # (S, B, G)  Pallas
    return jnp.transpose(preds_pad, (1, 0, 2))[:, :, :NUM_CLASSES]  # (B, S, 5)


# ------------------------- main -------------------------
if __name__ == "__main__":
    key = jax.random.PRNGKey(0)
    k_par, k_params = jax.random.split(key)

    paragraphs = jax.random.randint(k_par, (B, S, W), 0, V, dtype=jnp.int32)
    params = make_params(k_params)
    kparams = prepare_kernel_params(params)

    out = jax.jit(toulmin_rnn_forward)(paragraphs, kparams)
    out = jax.block_until_ready(out)

    assert out.shape == (B, S, NUM_CLASSES), out.shape
    assert out.dtype == jnp.float32
    print("KERNEL_OK")
</pallas_src>

<mosaic_0001>
module attributes {stable_mosaic.version = 11 : i64} {
  func.func @toulmin_fused_kernel(%arg0: i32, %arg1: memref<1x2x10x300xf32, #tpu.memory_space<vmem>>, %arg2: memref<5x300x384xf32, #tpu.memory_space<vmem>>, %arg3: memref<1x384xf32, #tpu.memory_space<vmem>>, %arg4: memref<6x384xf32, #tpu.memory_space<vmem>>, %arg5: memref<384x64xf32, #tpu.memory_space<vmem>>, %arg6: memref<1x64xf32, #tpu.memory_space<vmem>>, %arg7: memref<384x64xf32, #tpu.memory_space<vmem>>, %arg8: memref<1x64xf32, #tpu.memory_space<vmem>>, %arg9: memref<64x64xf32, #tpu.memory_space<vmem>>, %arg10: memref<64x128xf32, #tpu.memory_space<vmem>>, %arg11: memref<1x128xf32, #tpu.memory_space<vmem>>, %arg12: memref<1x2x128xf32, #tpu.memory_space<vmem>>, %arg13: memref<2x64xf32, #tpu.memory_space<vmem>>) attributes {dimension_semantics = [#tpu.dimension_semantics<arbitrary>], iteration_bounds = array<i64: 3>, scalar_prefetch = 0 : i64, scratch_operands = 1 : i64, tpu.core_type = #tpu.core_type<tc>, window_params = [{transform_indices = @transform_0, window_bounds = array<i64: 1, 2, 10, 300>}, {pipeline_mode = #tpu.pipeline_mode<synchronous>, transform_indices = @transform_1, window_bounds = array<i64: 5, 300, 384>}, {pipeline_mode = #tpu.pipeline_mode<synchronous>, transform_indices = @transform_2, window_bounds = array<i64: 1, 384>}, {pipeline_mode = #tpu.pipeline_mode<synchronous>, transform_indices = @transform_3, window_bounds = array<i64: 6, 384>}, {pipeline_mode = #tpu.pipeline_mode<synchronous>, transform_indices = @transform_4, window_bounds = array<i64: 384, 64>}, {pipeline_mode = #tpu.pipeline_mode<synchronous>, transform_indices = @transform_5, window_bounds = array<i64: 1, 64>}, {pipeline_mode = #tpu.pipeline_mode<synchronous>, transform_indices = @transform_6, window_bounds = array<i64: 384, 64>}, {pipeline_mode = #tpu.pipeline_mode<synchronous>, transform_indices = @transform_7, window_bounds = array<i64: 1, 64>}, {pipeline_mode = #tpu.pipeline_mode<synchronous>, transform_indices = @transform_8, window_bounds = array<i64: 64, 64>}, {pipeline_mode = #tpu.pipeline_mode<synchronous>, transform_indices = @transform_9, window_bounds = array<i64: 64, 128>}, {pipeline_mode = #tpu.pipeline_mode<synchronous>, transform_indices = @transform_10, window_bounds = array<i64: 1, 128>}, {transform_indices = @transform_11, window_bounds = array<i64: 1, 2, 128>}]} {
    %c0 = arith.constant 0 : index
    %c0_0 = arith.constant 0 : index
    %c0_1 = arith.constant 0 : index
    %c0_2 = arith.constant 0 : index
    %0 = vector.load %arg1[%c0, %c0_0, %c0_1, %c0_2] : memref<1x2x10x300xf32, #tpu.memory_space<vmem>>, vector<1x2x10x300xf32>
    %1 = vector.shape_cast %0 : vector<1x2x10x300xf32> to vector<2x10x300xf32>
    %cst = arith.constant 0.000000e+00 : f32
    %2 = vector.broadcast %cst : f32 to vector<12x384xf32>
    %3 = vector.extract_strided_slice %1 {offsets = [0, 0, 0], sizes = [2, 6, 300], strides = [1, 1, 1]} : vector<2x10x300xf32> to vector<2x6x300xf32>
    %4 = vector.shape_cast %3 : vector<2x6x300xf32> to vector<12x300xf32>
    %c0_3 = arith.constant 0 : index
    %c0_4 = arith.constant 0 : index
    %c0_5 = arith.constant 0 : index
    %5 = vector.load %arg2[%c0_3, %c0_4, %c0_5] : memref<5x300x384xf32, #tpu.memory_space<vmem>>, vector<1x300x384xf32>
    %6 = vector.shape_cast %5 : vector<1x300x384xf32> to vector<300x384xf32>
    %cst_6 = arith.constant dense<0.000000e+00> : vector<12x384xf32>
    %7 = tpu.matmul %4, %6, %cst_6 {dimension_numbers = #tpu.dot_dimension_numbers<[1], [0], [0], [1], [0, 0, 1, 1], [], []>} : vector<12x300xf32>, vector<300x384xf32>, vector<12x384xf32> -> vector<12x384xf32>
    %8 = arith.addf %2, %7 : vector<12x384xf32>
    %9 = vector.extract_strided_slice %1 {offsets = [0, 1, 0], sizes = [2, 6, 300], strides = [1, 1, 1]} : vector<2x10x300xf32> to vector<2x6x300xf32>
    %10 = vector.shape_cast %9 : vector<2x6x300xf32> to vector<12x300xf32>
    %c1 = arith.constant 1 : index
    %c0_7 = arith.constant 0 : index
    %c0_8 = arith.constant 0 : index
    %11 = vector.load %arg2[%c1, %c0_7, %c0_8] : memref<5x300x384xf32, #tpu.memory_space<vmem>>, vector<1x300x384xf32>
    %12 = vector.shape_cast %11 : vector<1x300x384xf32> to vector<300x384xf32>
    %cst_9 = arith.constant dense<0.000000e+00> : vector<12x384xf32>
    %13 = tpu.matmul %10, %12, %cst_9 {dimension_numbers = #tpu.dot_dimension_numbers<[1], [0], [0], [1], [0, 0, 1, 1], [], []>} : vector<12x300xf32>, vector<300x384xf32>, vector<12x384xf32> -> vector<12x384xf32>
    %14 = arith.addf %8, %13 : vector<12x384xf32>
    %15 = vector.extract_strided_slice %1 {offsets = [0, 2, 0], sizes = [2, 6, 300], strides = [1, 1, 1]} : vector<2x10x300xf32> to vector<2x6x300xf32>
    %16 = vector.shape_cast %15 : vector<2x6x300xf32> to vector<12x300xf32>
    %c2 = arith.constant 2 : index
    %c0_10 = arith.constant 0 : index
    %c0_11 = arith.constant 0 : index
    %17 = vector.load %arg2[%c2, %c0_10, %c0_11] : memref<5x300x384xf32, #tpu.memory_space<vmem>>, vector<1x300x384xf32>
    %18 = vector.shape_cast %17 : vector<1x300x384xf32> to vector<300x384xf32>
    %cst_12 = arith.constant dense<0.000000e+00> : vector<12x384xf32>
    %19 = tpu.matmul %16, %18, %cst_12 {dimension_numbers = #tpu.dot_dimension_numbers<[1], [0], [0], [1], [0, 0, 1, 1], [], []>} : vector<12x300xf32>, vector<300x384xf32>, vector<12x384xf32> -> vector<12x384xf32>
    %20 = arith.addf %14, %19 : vector<12x384xf32>
    %21 = vector.extract_strided_slice %1 {offsets = [0, 3, 0], sizes = [2, 6, 300], strides = [1, 1, 1]} : vector<2x10x300xf32> to vector<2x6x300xf32>
    %22 = vector.shape_cast %21 : vector<2x6x300xf32> to vector<12x300xf32>
    %c3 = arith.constant 3 : index
    %c0_13 = arith.constant 0 : index
    %c0_14 = arith.constant 0 : index
    %23 = vector.load %arg2[%c3, %c0_13, %c0_14] : memref<5x300x384xf32, #tpu.memory_space<vmem>>, vector<1x300x384xf32>
    %24 = vector.shape_cast %23 : vector<1x300x384xf32> to vector<300x384xf32>
    %cst_15 = arith.constant dense<0.000000e+00> : vector<12x384xf32>
    %25 = tpu.matmul %22, %24, %cst_15 {dimension_numbers = #tpu.dot_dimension_numbers<[1], [0], [0], [1], [0, 0, 1, 1], [], []>} : vector<12x300xf32>, vector<300x384xf32>, vector<12x384xf32> -> vector<12x384xf32>
    %26 = arith.addf %20, %25 : vector<12x384xf32>
    %27 = vector.extract_strided_slice %1 {offsets = [0, 4, 0], sizes = [2, 6, 300], strides = [1, 1, 1]} : vector<2x10x300xf32> to vector<2x6x300xf32>
    %28 = vector.shape_cast %27 : vector<2x6x300xf32> to vector<12x300xf32>
    %c4 = arith.constant 4 : index
    %c0_16 = arith.constant 0 : index
    %c0_17 = arith.constant 0 : index
    %29 = vector.load %arg2[%c4, %c0_16, %c0_17] : memref<5x300x384xf32, #tpu.memory_space<vmem>>, vector<1x300x384xf32>
    %30 = vector.shape_cast %29 : vector<1x300x384xf32> to vector<300x384xf32>
    %cst_18 = arith.constant dense<0.000000e+00> : vector<12x384xf32>
    %31 = tpu.matmul %28, %30, %cst_18 {dimension_numbers = #tpu.dot_dimension_numbers<[1], [0], [0], [1], [0, 0, 1, 1], [], []>} : vector<12x300xf32>, vector<300x384xf32>, vector<12x384xf32> -> vector<12x384xf32>
    %32 = arith.addf %26, %31 : vector<12x384xf32>
    %c0_19 = arith.constant 0 : index
    %c0_20 = arith.constant 0 : index
    %33 = vector.load %arg3[%c0_19, %c0_20] : memref<1x384xf32, #tpu.memory_space<vmem>>, vector<1x384xf32>
    %34 = vector.broadcast %33 : vector<1x384xf32> to vector<12x384xf32>
    %35 = arith.addf %32, %34 : vector<12x384xf32>
    %cst_21 = arith.constant 0.000000e+00 : f32
    %36 = vector.broadcast %cst_21 : f32 to vector<12x384xf32>
    %37 = arith.maximumf %35, %36 : vector<12x384xf32>
    %38 = vector.extract_strided_slice %37 {offsets = [0, 0], sizes = [6, 384], strides = [1, 1]} : vector<12x384xf32> to vector<6x384xf32>
    %c0_22 = arith.constant 0 : index
    %c0_23 = arith.constant 0 : index
    %39 = vector.load %arg4[%c0_22, %c0_23] : memref<6x384xf32, #tpu.memory_space<vmem>>, vector<6x384xf32>
    %40 = arith.mulf %38, %39 : vector<6x384xf32>
    %cst_24 = arith.constant dense<0xFF800000> : vector<384xf32>
    %41 = vector.multi_reduction <maximumf>, %40, %cst_24 [0] : vector<6x384xf32> to vector<384xf32>
    %42 = vector.shape_cast %41 : vector<384xf32> to vector<1x384xf32>
    %43 = vector.extract_strided_slice %37 {offsets = [6, 0], sizes = [6, 384], strides = [1, 1]} : vector<12x384xf32> to vector<6x384xf32>
    %c0_25 = arith.constant 0 : index
    %c0_26 = arith.constant 0 : index
    %44 = vector.load %arg4[%c0_25, %c0_26] : memref<6x384xf32, #tpu.memory_space<vmem>>, vector<6x384xf32>
    %45 = arith.mulf %43, %44 : vector<6x384xf32>
    %cst_27 = arith.constant dense<0xFF800000> : vector<384xf32>
    %46 = vector.multi_reduction <maximumf>, %45, %cst_27 [0] : vector<6x384xf32> to vector<384xf32>
    %47 = vector.shape_cast %46 : vector<384xf32> to vector<1x384xf32>
    %48 = tpu.concatenate %42, %47 in 0 : vector<1x384xf32>, vector<1x384xf32> -> vector<2x384xf32>
    %c0_i32 = arith.constant 0 : i32
    %49 = arith.cmpi eq, %arg0, %c0_i32 : i32
    %50 = arith.extui %49 : i1 to i32
    %c0_i32_28 = arith.constant 0 : i32
    %51 = arith.cmpi ne, %50, %c0_i32_28 : i32
    scf.if %51 {
      %c0_49 = arith.constant 0 : index
      %c0_50 = arith.constant 0 : index
      %71 = vector.load %arg5[%c0_49, %c0_50] : memref<384x64xf32, #tpu.memory_space<vmem>>, vector<384x64xf32>
      %cst_51 = arith.constant dense<0.000000e+00> : vector<2x64xf32>
      %72 = tpu.matmul %48, %71, %cst_51 {dimension_numbers = #tpu.dot_dimension_numbers<[1], [0], [0], [1], [0, 0, 1, 1], [], []>} : vector<2x384xf32>, vector<384x64xf32>, vector<2x64xf32> -> vector<2x64xf32>
      %c0_52 = arith.constant 0 : index
      %c0_53 = arith.constant 0 : index
      %73 = vector.load %arg6[%c0_52, %c0_53] : memref<1x64xf32, #tpu.memory_space<vmem>>, vector<1x64xf32>
      %74 = vector.broadcast %73 : vector<1x64xf32> to vector<2x64xf32>
      %75 = arith.addf %72, %74 : vector<2x64xf32>
      %c0_54 = arith.constant 0 : index
      %c0_55 = arith.constant 0 : index
      %76 = vector.load %arg13[%c0_54, %c0_55] : memref<2x64xf32, #tpu.memory_space<vmem>>, vector<2x64xf32>
      tpu.vector_store %arg13[%c0_54, %c0_55], %75 {strides = array<i32>} : memref<2x64xf32, #tpu.memory_space<vmem>>, vector<2x64xf32>,
    } else {
    }
    %c0_29 = arith.constant 0 : index
    %c0_30 = arith.constant 0 : index
    %52 = vector.load %arg7[%c0_29, %c0_30] : memref<384x64xf32, #tpu.memory_space<vmem>>, vector<384x64xf32>
    %cst_31 = arith.constant dense<0.000000e+00> : vector<2x64xf32>
    %53 = tpu.matmul %48, %52, %cst_31 {dimension_numbers = #tpu.dot_dimension_numbers<[1], [0], [0], [1], [0, 0, 1, 1], [], []>} : vector<2x384xf32>, vector<384x64xf32>, vector<2x64xf32> -> vector<2x64xf32>
    %c0_32 = arith.constant 0 : index
    %c0_33 = arith.constant 0 : index
    %54 = vector.load %arg8[%c0_32, %c0_33] : memref<1x64xf32, #tpu.memory_space<vmem>>, vector<1x64xf32>
    %55 = vector.broadcast %54 : vector<1x64xf32> to vector<2x64xf32>
    %56 = arith.addf %53, %55 : vector<2x64xf32>
    %c0_34 = arith.constant 0 : index
    %c0_35 = arith.constant 0 : index
    %57 = vector.load %arg13[%c0_34, %c0_35] : memref<2x64xf32, #tpu.memory_space<vmem>>, vector<2x64xf32>
    %c0_36 = arith.constant 0 : index
    %c0_37 = arith.constant 0 : index
    %58 = vector.load %arg9[%c0_36, %c0_37] : memref<64x64xf32, #tpu.memory_space<vmem>>, vector<64x64xf32>
    %cst_38 = arith.constant dense<0.000000e+00> : vector<2x64xf32>
    %59 = tpu.matmul %57, %58, %cst_38 {dimension_numbers = #tpu.dot_dimension_numbers<[1], [0], [0], [1], [0, 0, 1, 1], [], []>} : vector<2x64xf32>, vector<64x64xf32>, vector<2x64xf32> -> vector<2x64xf32>
    %60 = arith.addf %56, %59 : vector<2x64xf32>
    %61 = math.tanh %60 : vector<2x64xf32>
    %c0_39 = arith.constant 0 : index
    %c0_40 = arith.constant 0 : index
    %62 = vector.load %arg13[%c0_39, %c0_40] : memref<2x64xf32, #tpu.memory_space<vmem>>, vector<2x64xf32>
    tpu.vector_store %arg13[%c0_39, %c0_40], %61 {strides = array<i32>} : memref<2x64xf32, #tpu.memory_space<vmem>>, vector<2x64xf32>,
    %c0_41 = arith.constant 0 : index
    %c0_42 = arith.constant 0 : index
    %63 = vector.load %arg10[%c0_41, %c0_42] : memref<64x128xf32, #tpu.memory_space<vmem>>, vector<64x128xf32>
    %cst_43 = arith.constant dense<0.000000e+00> : vector<2x128xf32>
    %64 = tpu.matmul %61, %63, %cst_43 {dimension_numbers = #tpu.dot_dimension_numbers<[1], [0], [0], [1], [0, 0, 1, 1], [], []>} : vector<2x64xf32>, vector<64x128xf32>, vector<2x128xf32> -> vector<2x128xf32>
    %c0_44 = arith.constant 0 : index
    %c0_45 = arith.constant 0 : index
    %65 = vector.load %arg11[%c0_44, %c0_45] : memref<1x128xf32, #tpu.memory_space<vmem>>, vector<1x128xf32>
    %66 = vector.broadcast %65 : vector<1x128xf32> to vector<2x128xf32>
    %67 = arith.addf %64, %66 : vector<2x128xf32>
    %c0_46 = arith.constant 0 : index
    %c0_47 = arith.constant 0 : index
    %c0_48 = arith.constant 0 : index
    %68 = vector.load %arg12[%c0_46, %c0_47, %c0_48] : memref<1x2x128xf32, #tpu.memory_space<vmem>>, vector<1x2x128xf32>
    %69 = vector.shape_cast %68 : vector<1x2x128xf32> to vector<2x128xf32>
    %70 = vector.shape_cast %67 : vector<2x128xf32> to vector<1x2x128xf32>
    tpu.vector_store %arg12[%c0_46, %c0_47, %c0_48], %70 {strides = array<i32>} : memref<1x2x128xf32, #tpu.memory_space<vmem>>, vector<1x2x128xf32>,
    return
  }
  func.func @transform_0(%arg0: i32) -> (i32, i32, i32, i32) {
    %c0_i32 = arith.constant 0 : i32
    %c0_i32_0 = arith.constant 0 : i32
    %c0_i32_1 = arith.constant 0 : i32
    %c0_i32_2 = arith.constant 0 : i32
    return %arg0, %c0_i32, %c0_i32_0, %c0_i32_1 : i32, i32, i32, i32
  }
  func.func @transform_1(%arg0: i32) -> (i32, i32, i32) {
    %c0_i32 = arith.constant 0 : i32
    %c0_i32_0 = arith.constant 0 : i32
    %c0_i32_1 = arith.constant 0 : i32
    %c0_i32_2 = arith.constant 0 : i32
    return %c0_i32, %c0_i32_0, %c0_i32_1 : i32, i32, i32
  }
  func.func @transform_2(%arg0: i32) -> (i32, i32) {
    %c0_i32 = arith.constant 0 : i32
    %c0_i32_0 = arith.constant 0 : i32
    %c0_i32_1 = arith.constant 0 : i32
    return %c0_i32, %c0_i32_0 : i32, i32
  }
  func.func @transform_3(%arg0: i32) -> (i32, i32) {
    %c0_i32 = arith.constant 0 : i32
    %c0_i32_0 = arith.constant 0 : i32
    %c0_i32_1 = arith.constant 0 : i32
    return %c0_i32, %c0_i32_0 : i32, i32
  }
  func.func @transform_4(%arg0: i32) -> (i32, i32) {
    %c0_i32 = arith.constant 0 : i32
    %c0_i32_0 = arith.constant 0 : i32
    %c0_i32_1 = arith.constant 0 : i32
    return %c0_i32, %c0_i32_0 : i32, i32
  }
  func.func @transform_5(%arg0: i32) -> (i32, i32) {
    %c0_i32 = arith.constant 0 : i32
    %c0_i32_0 = arith.constant 0 : i32
    %c0_i32_1 = arith.constant 0 : i32
    return %c0_i32, %c0_i32_0 : i32, i32
  }
  func.func @transform_6(%arg0: i32) -> (i32, i32) {
    %c0_i32 = arith.constant 0 : i32
    %c0_i32_0 = arith.constant 0 : i32
    %c0_i32_1 = arith.constant 0 : i32
    return %c0_i32, %c0_i32_0 : i32, i32
  }
  func.func @transform_7(%arg0: i32) -> (i32, i32) {
    %c0_i32 = arith.constant 0 : i32
    %c0_i32_0 = arith.constant 0 : i32
    %c0_i32_1 = arith.constant 0 : i32
    return %c0_i32, %c0_i32_0 : i32, i32
  }
  func.func @transform_8(%arg0: i32) -> (i32, i32) {
    %c0_i32 = arith.constant 0 : i32
    %c0_i32_0 = arith.constant 0 : i32
    %c0_i32_1 = arith.constant 0 : i32
    return %c0_i32, %c0_i32_0 : i32, i32
  }
  func.func @transform_9(%arg0: i32) -> (i32, i32) {
    %c0_i32 = arith.constant 0 : i32
    %c0_i32_0 = arith.constant 0 : i32
    %c0_i32_1 = arith.constant 0 : i32
    return %c0_i32, %c0_i32_0 : i32, i32
  }
  func.func @transform_10(%arg0: i32) -> (i32, i32) {
    %c0_i32 = arith.constant 0 : i32
    %c0_i32_0 = arith.constant 0 : i32
    %c0_i32_1 = arith.constant 0 : i32
    return %c0_i32, %c0_i32_0 : i32, i32
  }
  func.func @transform_11(%arg0: i32) -> (i32, i32, i32) {
    %c0_i32 = arith.constant 0 : i32
    %c0_i32_0 = arith.constant 0 : i32
    %c0_i32_1 = arith.constant 0 : i32
    return %arg0, %c0_i32, %c0_i32_0 : i32, i32, i32
  }
}

</mosaic_0001>

<bundles_post_ra>
// kernel: toulmin_rnn_forward.1
= control target key start
LH: loop header
LB: loop body
LE: loop exit
PB: predicated region body
PF: predicated region fallthrough
CT: control target
= control target key end

     0   :  { %s6125_s0 = inlined_call_operand.vmem [shape: f32[3,2,10,300], index: 0, kind: input, shape index: {}]   ;;  %s6126_s1 = inlined_call_operand.hbm [shape: f32[5,300,384], index: 1, kind: input, shape index: {}]   ;;  %s6127_s2 = inlined_call_operand.hbm [shape: f32[1,384], index: 2, kind: input, shape index: {}]   ;;  %s6128_s3 = inlined_call_operand.hbm [shape: f32[6,384], index: 3, kind: input, shape index: {}]   ;;  %s6129_s4 = inlined_call_operand.vmem [shape: f32[384,64], index: 4, kind: input, shape index: {}]   ;;  %s6130_s5 = inlined_call_operand.hbm [shape: f32[1,64], index: 5, kind: input, shape index: {}]   ;;  %s6131_s6 = inlined_call_operand.vmem [shape: f32[384,64], index: 6, kind: input, shape index: {}]   ;;  %s6132_s7 = inlined_call_operand.hbm [shape: f32[1,64], index: 7, kind: input, shape index: {}]   ;;  %s6133_s8 = inlined_call_operand.hbm [shape: f32[64,64], index: 8, kind: input, shape index: {}]   ;;  %s6134_s9 = inlined_call_operand.hbm [shape: f32[64,128], index: 9, kind: input, shape index: {}]   ;;  %s6135_s10 = inlined_call_operand.hbm [shape: f32[1,128], index: 10, kind: input, shape index: {}]   ;;  %s6136_s11 = inlined_call_operand.hbm [shape: f32[3,2,128], index: 11, kind: output, shape index: {}]  }
   0x1   :  { %6145 = sst [smem:[#allocation38_spill]] %s6127_s2 }
   0x2   :  { %6146 = sst [smem:[#allocation39_spill]] %s6130_s5 }
   0x3   :  { %16 = vsyncpa [#allocation4], 0 }
   0x4   :  { %17 = vsyncpa [#allocation7], 0 }
   0x5   :  { %18 = vsyncpa [#allocation10], 0 }
   0x6   :  { %19 = vsyncpa [#allocation13], 0 }
   0x7   :  { %20 = vsyncpa [#allocation16], 0 }
   0x8   :  { %21 = vsyncpa [#allocation5], 0 }
   0x9   :  { %23 = vsyncpa [#allocation5 + $0x1], 0  ;;  %s5065_s17 = smov 0   ;;  %s5067_s18 = smov 0  }
   0xa   :  { %s5069_s19 = smov 0   ;;  %s5071_s20 = smov 0  }
   0xb LB: > { %6147 = sst [smem:[#allocation24_spill]] %s4981_s19  ;;  %s5086_s21 = sadd.s32 4294967295, %s4985_s20   ;;  %s4985_s20 = sphi %s5071_s20, %s6208_s20   ;;  %s4981_s19 = sphi %s5069_s19, %s6207_s19   ;;  %s4977_s18 = sphi %s5067_s18, %s6206_s18   ;;  %s4973_s17 = sphi %s5065_s17, %s6205_s17  }
   0xc   : > { %s3937_s22 = sadd.s32 4294967294, %s4985_s20   ;;  %s5090_s23 = sadd.s32 1, %s4985_s20  }
   0xd   : > { %s272_s24 = sadd.s32 1, %s4981_s19  ;;  %s269_s25 = ssub.s32 %s4985_s20, %s5090_s23 }
   0xe   : > { %p282_p0 = scmp.ne.s32.totalorder %s4981_s19, %s4977_s18  ;;  %p270_p1 = scmp.eq.s32.totalorder %s269_s25, 0 }
   0xf   : > { %p283_p2 = scmp.eq.s32.totalorder %s5086_s21, 2  ;;  %p288_p3 = scmp.ne.s32.totalorder %s4977_s18, %s4973_s17 }
  0x10   : > { %p289_p4 = scmp.eq.s32.totalorder %s3937_s22, 2  ;;  %p3938_p7 = scmp.ge.s32.totalorder %s4985_s20, 1 }
  0x11   : > { %s5101_s26 = scalar_select %p270_p1, %s4981_s19, %s272_s24  }
  0x12   : > { %p5103_p5 = por %p283_p2, %p282_p0  ;;  %p5107_p6 = por %p289_p4, %p288_p3 }
  0x13   : > { %6148 = sst [smem:[#allocation25_spill]] %s5101_s26  ;;  %p296_p8 = scmp.lt.s32.totalorder %s4985_s20, 4 }
  0x14   : > { %s6149_s27 = scalar_select %p5103_p5, 1, 0 }
  0x15   : > { %s6150_s28 = scalar_select %p5107_p6, 1, 0 }
  0x16   : > { %p6137_p10 = scmp.eq.s32.totalorder %s5086_s21, 0  ;;  %p5115_p11 = pnand %p3938_p7, %p296_p8 }
  0x17   : > { %s4987_s30 = smov [#allocation6]   ;;  %s4988_s13 = smov [#allocation9]  }
  0x18   : > { %s6151_s29 = scalar_select %p5115_p11, 1, 0 }
  0x19   : > { %s322_s12 = sshll.u32 %s4987_s30, 4  ;;  %p4590_p12 = pneg %p5115_p11  ;;  %s323_s12 = int_to_ptr.vmem [resolvable:$true] %s322_s12 }
  0x1a   : > { %s347_s14 = sshll.u32 %s4988_s13, 4  ;;  %s4989_s16 = smov [#allocation12]   ;;  %s348_s14 = int_to_ptr.vmem [resolvable:$true] %s347_s14 }
  0x1b   : > { %p5123_p13 = pnand %p6137_p10, %p4590_p12  ;;  %s371_s22 = sshll.u32 %s4989_s16, 4  ;;  %s5127_s22 = int_to_ptr.vmem [resolvable:$true] %s371_s22 }
  0x1c   : > { %s4708_s25 = scalar_lea.vmem %s323_s12, 48  ;;  %s4715_s30 = scalar_lea.vmem %s323_s12, 64 }
  0x1d   : > { %p5131_p0 = pneg %p5123_p13  ;;  %p4709_p1 = scmp.ne.s32.totalorder %s323_s12, %s4708_s25 }
  0x1e   : > { %p4716_p4 = scmp.lt.s32.totalorder %s323_s12, %s323_s12  ;;  %p4717_p7 = scmp.lt.s32.totalorder %s4715_s30, %s4708_s25 }
  0x1f   : > { %p4711_p2 = pnand %p4709_p1, %p5131_p0 }
  0x20   : > { %p4718_p8 = por %p4717_p7, %p4716_p4 }
  0x21   : > { %p4712_p3 = pneg %p4711_p2 }
  0x23   : > { %p4719_p12 = pnand %p4718_p8, %p4712_p3 }
  0x25   : > { %4722 = shalt.err (!%p4719_p12)
}
  0x26   : > { %s6154_s2 = sld [smem:[#allocation38_spill]]  ;;  %s4734_s26 = scalar_lea.vmem %s348_s14, 16 }
  0x27   : > { %p4735_p9 = scmp.ne.s32.totalorder %s348_s14, %s4734_s26  ;;  %s4741_s19 = scalar_lea.vmem %s348_s14, 32 }
  0x28   : > { %p4742_p1 = scmp.lt.s32.totalorder %s348_s14, %s348_s14  ;;  %p4743_p2 = scmp.lt.s32.totalorder %s4741_s19, %s4734_s26 }
  0x29   : > { %p4737_p10 = pnand %p4735_p9, %p5131_p0 }
  0x2a   : > { %p4744_p5 = por %p4743_p2, %p4742_p1 }
  0x2b   : > { %p4738_p6 = pneg %p4737_p10 }
  0x2c   : > { %4596 = dma.hbm_to_vmem [thread:$0]  (!%p5123_p13), %s6154_s2, 48, %s323_s12, [#allocation7]  }
  0x2d   : > { %p4745_p11 = pnand %p4744_p5, %p4738_p6 }
  0x2f   : > { %4748 = shalt.err (!%p4745_p11)
}
  0x30   : > { %s6155_s5 = sld [smem:[#allocation39_spill]]  ;;  %s4760_s12 = scalar_lea.vmem %s5127_s22, 1024 }
  0x31   : > { %p4761_p3 = scmp.ne.s32.totalorder %s5127_s22, %s4760_s12  ;;  %p4768_p4 = scmp.lt.s32.totalorder %s5127_s22, %s5127_s22 }
  0x32   : > { %p4769_p7 = scmp.lt.s32.totalorder %s4760_s12, %s4760_s12 }
  0x33   : > { %p4763_p9 = pnand %p4761_p3, %p5131_p0 }
  0x34   : > { %p4770_p5 = por %p4769_p7, %p4768_p4 }
  0x35   : > { %p4764_p10 = pneg %p4763_p9 }
  0x36   : > { %4602 = dma.hbm_to_vmem [thread:$0]  (!%p5123_p13), %s6155_s5, 16, %s348_s14, [#allocation10]  }
  0x37   : > { %p4771_p6 = pnand %p4770_p5, %p4764_p10 }
  0x39   : > { %4774 = shalt.err (!%p4771_p6)
}
  0x3a   : > { %s6141_s19 = smov 128   ;;  %s6142_s26 = smov 8  }
  0x3b   : > { %4608 = dma.hbm_to_vmem [thread:$0]  (!%p5123_p13), %s6133_s8, 1024, %s5127_s22, [#allocation13], %s6141_s19, %s6141_s19, %s6142_s26  }
  0x3c   : > { %s4992_s16 = smov [#allocation3]  }
  0x3d   : > { %s308_s25 = sshll.u32 %s4992_s16, 4  ;;  %s309_s25 = int_to_ptr.vmem [resolvable:$true] %s308_s25 }
  0x3e   : > { %s4786_s30 = scalar_lea.vmem %s309_s25, 72960  ;;  %p4794_p1 = scmp.lt.s32.totalorder %s309_s25, %s309_s25 }
  0x3f   : > { %p4787_p11 = scmp.ne.s32.totalorder %s309_s25, %s4786_s30  ;;  %p4795_p2 = scmp.lt.s32.totalorder %s4786_s30, %s4786_s30 }
  0x41   : > { %p4789_p8 = pnand %p4787_p11, %p5131_p0  ;;  %p4796_p3 = por %p4795_p2, %p4794_p1 }
  0x43   : > { %p4790_p12 = pneg %p4789_p8 }
  0x45   : > { %p4797_p9 = pnand %p4796_p3, %p4790_p12 }
  0x47   : > { %4800 = shalt.err (!%p4797_p9)
}
  0x48   : > { %s4993_s12 = smov 384   ;;  %s4994_s2 = smov 24  }
  0x49   : > { %4593 = dma.hbm_to_vmem [thread:$0]  (!%p5123_p13), %s6126_s1, 72960, %s309_s25, [#allocation4], %s4993_s12, %s4993_s12, %s4994_s2  }
  0x4a   : > { %s4995_s13 = smov [#allocation8]   ;;  %s4996_s19 = smov [#allocation11]  }
  0x4b   : > { %s333_s16 = sshll.u32 %s4995_s13, 4  ;;  %s361_s26 = sshll.u32 %s4996_s19, 4  ;;  %s334_s16 = int_to_ptr.vmem [resolvable:$true] %s333_s16  ;;  %s362_s26 = int_to_ptr.vmem [resolvable:$true] %s361_s26 }
  0x4c   : > { %s4812_s5 = scalar_lea.vmem %s334_s16, 384  ;;  %p4820_p5 = scmp.lt.s32.totalorder %s334_s16, %s334_s16 }
  0x4d   : > { %p4813_p10 = scmp.ne.s32.totalorder %s334_s16, %s4812_s5  ;;  %p4821_p6 = scmp.lt.s32.totalorder %s4812_s5, %s4812_s5 }
  0x4f   : > { %p4815_p4 = pnand %p4813_p10, %p5131_p0  ;;  %p4822_p11 = por %p4821_p6, %p4820_p5 }
  0x51   : > { %p4816_p7 = pneg %p4815_p4 }
  0x53   : > { %p4823_p8 = pnand %p4822_p11, %p4816_p7 }
  0x55   : > { %4826 = shalt.err (!%p4823_p8)
}
  0x56   : > { %4599 = dma.hbm_to_vmem [thread:$0]  (!%p5123_p13), %s6128_s3, 384, %s334_s16, [#allocation7]  }
  0x57   : > { %s4838_s19 = scalar_lea.vmem %s362_s26, 16  ;;  %s4845_s25 = scalar_lea.vmem %s362_s26, 32 }
  0x58   : > { %p4839_p12 = scmp.ne.s32.totalorder %s362_s26, %s4838_s19  ;;  %p4846_p3 = scmp.lt.s32.totalorder %s362_s26, %s362_s26 }
  0x59   : > { %p4847_p9 = scmp.lt.s32.totalorder %s4845_s25, %s4838_s19 }
  0x5a   : > { %p4841_p1 = pnand %p4839_p12, %p5131_p0 }
  0x5b   : > { %p4848_p10 = por %p4847_p9, %p4846_p3 }
  0x5c   : > { %p4842_p2 = pneg %p4841_p1 }
  0x5e   : > { %p4849_p4 = pnand %p4848_p10, %p4842_p2 }
  0x60   : > { %4852 = shalt.err (!%p4849_p4)
}
  0x61   : > { %4605 = dma.hbm_to_vmem [thread:$0]  (!%p5123_p13), %s6132_s7, 16, %s362_s26, [#allocation10]  }
  0x62   : > { %s4997_s14 = smov [#allocation14]   ;;  %s4998_s13 = smov [#allocation15]  }
  0x63   : > { %s384_s22 = sshll.u32 %s4997_s14, 4  ;;  %s398_s16 = sshll.u32 %s4998_s13, 4  ;;  %s385_s22 = int_to_ptr.vmem [resolvable:$true] %s384_s22  ;;  %s399_s16 = int_to_ptr.vmem [resolvable:$true] %s398_s16 }
  0x64   : > { %s4864_s30 = scalar_lea.vmem %s385_s22, 1024  ;;  %p4872_p11 = scmp.lt.s32.totalorder %s385_s22, %s385_s22 }
  0x65   : > { %p4865_p7 = scmp.ne.s32.totalorder %s385_s22, %s4864_s30  ;;  %p4873_p8 = scmp.lt.s32.totalorder %s4864_s30, %s4864_s30 }
  0x67   : > { %p4867_p5 = pnand %p4865_p7, %p5131_p0  ;;  %p4874_p12 = por %p4873_p8, %p4872_p11 }
  0x69   : > { %p4868_p6 = pneg %p4867_p5 }
  0x6b   : > { %p4875_p1 = pnand %p4874_p12, %p4868_p6 }
  0x6d   : > { %4878 = shalt.err (!%p4875_p1)
}
  0x6e   : > { %s6156_s2 = smov 8   ;;  %s6157_s26 = smov 128  }
  0x6f   : > { %4611 = dma.hbm_to_vmem [thread:$0]  (!%p5123_p13), %s6134_s9, 1024, %s385_s22, [#allocation13], %s6157_s26, %s6157_s26, %s6156_s2  }
  0x70   : > { %s4890_s5 = scalar_lea.vmem %s399_s16, 16  ;;  %s4897_s12 = scalar_lea.vmem %s399_s16, 32 }
  0x71   : > { %p4891_p2 = scmp.ne.s32.totalorder %s399_s16, %s4890_s5  ;;  %p4898_p10 = scmp.lt.s32.totalorder %s399_s16, %s399_s16 }
  0x72   : > { %p4899_p4 = scmp.lt.s32.totalorder %s4897_s12, %s4890_s5 }
  0x73   : > { %p4893_p3 = pnand %p4891_p2, %p5131_p0 }
  0x74   : > { %p4900_p7 = por %p4899_p4, %p4898_p10 }
  0x75   : > { %p4894_p9 = pneg %p4893_p3 }
  0x77   : > { %p4901_p5 = pnand %p4900_p7, %p4894_p9 }
  0x79   : > { %4904 = shalt.err (!%p4901_p5)
}
  0x7a   : > { %4614 = dma.hbm_to_vmem [thread:$0]  (!%p5123_p13), %s6135_s10, 16, %s399_s16, [#allocation16]  }
  0x7b   : > { %p6158_p6 = scmp.ne.s32.totalorder %s6151_s29, 0 }
  0x7d   : > { %419 = sbr.rel (%p6158_p6) target bundleno = 1416 (0x588), region = 64 }
  0x82   : > { %p6159_p11 = scmp.eq.s32.totalorder %s5086_s21, 0 }
  0x84   : > { %4948 = dma.done.wait (%p6159_p11), [#allocation4], 72960   ;;  %p6160_p0 = pmov %p6159_p11 }
  0x86   : > { %4950 = vsyncadd (%p6160_p0), [#allocation4], 4294894336  ;;  %p6161_p8 = pmov %p6160_p0 }
  0x87   : > { %p6162_p12 = pmov %p6160_p0 }
  0x88   : > { %4952 = dma.done.wait (%p6161_p8), [#allocation7], 432  }
  0x89   : > { %4954 = vsyncadd (%p6162_p12), [#allocation7], 4294966864  ;;  %p6163_p1 = pmov %p6160_p0 }
  0x8a   : > { %p6164_p13 = pmov %p6160_p0 }
  0x8b   : > { %4956 = dma.done.wait (%p6163_p1), [#allocation10], 32  }
  0x8c   : > { %4958 = vsyncadd (%p6164_p13), [#allocation10], 4294967264  ;;  %p6165_p2 = pmov %p6160_p0 }
  0x8d   : > { %p6166_p3 = pmov %p6160_p0 }
  0x8e   : > { %4960 = dma.done.wait (%p6165_p2), [#allocation13], 2048  }
  0x8f   : > { %4962 = vsyncadd (%p6166_p3), [#allocation13], 4294965248  ;;  %p6167_p9 = pmov %p6160_p0 }
  0x90   : > { %p6168_p10 = pmov %p6160_p0 }
  0x91   : > { %4964 = dma.done.wait (%p6167_p9), [#allocation16], 16  }
  0x92   : > { %4966 = vsyncadd (%p6168_p10), [#allocation16], 4294967280  ;;  %s484_s29 = sand.u32 1, %s4977_s18   ;;  %v6143_v0 = vmov 0.0   ;;  %p487_p4 = scmp.lt.s32.totalorder %s5086_s21, 2  ;;  %vm897_vm0 = vcmask 1043456   ;;  %v516_v6 = vlaneseq }
  0x93   : > { %s5227_s15 = sshll.u32 %s484_s29, 1  ;;  %1048 = vmatprep.mubr.f32.mxu1 %v6143_v0  ;;  %v768_v1 = vld [vmem:[#allocation3 + $0x500] sm:$0xff]  ;;  %v767_v2 = vld [vmem:[#allocation3 + $0x4f8] sm:$0xff]  ;;  %v765_v3 = vld [vmem:[#allocation3 + $0x4e8] sm:$0xff]  ;;  %v5000_v4 = vmov 1983009808  }
  0x94   : > { %s5232_s24 = scalar_select %p487_p4, %s5086_s21, 2  ;;  %v514_v5 = vunpack.c.l.s4 %v5000_v4  ;;  %907 = vmatprep.subr.mxu0 %v768_v1  ;;  %v764_v7 = vld [vmem:[#allocation3 + $0x4e0] sm:$0xff]  ;;  %v834_v8 = vld [vmem:[#allocation3 + $0x710] sm:$0xf]  ;;  %v833_v10 = vld [vmem:[#allocation3 + $0x708] sm:$0xf] }
  0x95   : > { %908 = vmatpush1.msra.mxu0 %v767_v2  ;;  %v762_v9 = vld [vmem:[#allocation3 + $0x4d0] sm:$0xff]  ;;  %3961 = vmatprep.subr.msk.mxu1 %vm897_vm0, %v834_v8  ;;  %v761_v11 = vld [vmem:[#allocation3 + $0x4c8] sm:$0xff]  ;;  %v831_v12 = vld [vmem:[#allocation3 + $0x6f8] sm:$0xff]  ;;  %vm694_vm1 = vcmask 1040384   ;;  %vm695_vm2 = vcmask 1042434   ;;  %v5237_v17 = vshrl.u32 %v516_v6, 7 }
  0x96   : > { %909 = vmatprep.subr.mxu0 %v765_v3  ;;  %3962 = vmatpush1.msk.msra.mxu1 %vm897_vm0, %v833_v10  ;;  %v830_v13 = vld [vmem:[#allocation3 + $0x6f0] sm:$0xff]  ;;  %v759_v14 = vld [vmem:[#allocation3 + $0x4b8] sm:$0xff]  ;;  %v828_v15 = vld [vmem:[#allocation3 + $0x6e0] sm:$0xff]  ;;  %s4555_s22 = smul.u32 96, %s5232_s24  ;;  %v515_v16 = vunpack.c.0.s8 %v514_v5  ;;  %vm697_vm4 = vcmask 1044484   ;;  %vm699_vm6 = vcmask 1046534  }
  0x97   : > { %910 = vmatpush1.msra.mxu0 %v764_v7  ;;  %1006 = vmatprep.subr.mxu1 %v831_v12  ;;  %v758_v18 = vld [vmem:[#allocation3 + $0x4b0] sm:$0xff]  ;;  %v827_v19 = vld [vmem:[#allocation3 + $0x6d8] sm:$0xff]  ;;  %v825_v20 = vld [vmem:[#allocation3 + $0x6c8] sm:$0xff]  ;;  %vm892_vm8 = vcmask 359424   ;;  %vm3145_vm9 = vcmask 1045504   ;;  %vm3182_vm10 = vcmask 1047558  }
  0x98   : > { %911 = vmatprep.subr.mxu0 %v762_v9  ;;  %1007 = vmatpush1.msra.mxu1 %v830_v13  ;;  %v756_v21 = vld [vmem:[#allocation3 + $0x4a0] sm:$0xff]  ;;  %vm5241_vm3 = vmor %vm694_vm1, %vm695_vm2  ;;  %v755_v24 = vld [vmem:[#allocation3 + $0x498] sm:$0xff]  ;;  %s5248_s2 = scalar_lea.vmem %s6125_s0, %s4555_s22  ;;  %v5251_v30 = vsub.s32 %v515_v16, %v5237_v17  ;;  %s486_s26 = scalar_lea.vmem [#allocation17], %s5227_s15 }
  0x99   : > { %912 = vmatpush1.msra.mxu0 %v761_v11  ;;  %1008 = vmatprep.subr.mxu1 %v828_v15  ;;  %v824_v22 = vld [vmem:[#allocation3 + $0x6c0] sm:$0xff]  ;;  %v753_v25 = vld [vmem:[#allocation3 + $0x488] sm:$0xff]  ;;  %v822_v26 = vld [vmem:[#allocation3 + $0x6b0] sm:$0xff]  ;;  %p6199_p7 = scmp.ne.s32.totalorder %s5086_s21, 0 }
  0x9a   : > { %913 = vmatprep.subr.mxu0 %v759_v14  ;;  %1009 = vmatpush1.msra.mxu1 %v827_v19  ;;  %v752_v27 = vld [vmem:[#allocation3 + $0x480] sm:$0xff]  ;;  %v750_v28 = vld [vmem:[#allocation3 + $0x470] sm:$0xff]  ;;  %v821_v29 = vld [vmem:[#allocation3 + $0x6a8] sm:$0xff] }
  0x9b   : > { %914 = vmatpush1.msra.mxu0 %v758_v18  ;;  %1010 = vmatprep.subr.mxu1 %v825_v20  ;;  %v749_v31 = vld [vmem:[#allocation3 + $0x468] sm:$0xff]  ;;  %v819_v32 = vld [vmem:[#allocation3 + $0x698] sm:$0xff]  ;;  %v818_v33 = vld [vmem:[#allocation3 + $0x690] sm:$0xff] }
  0x9c   : > { %915 = vmatprep.subr.mxu0 %v756_v21  ;;  %1011 = vmatpush1.msra.mxu1 %v824_v22  ;;  %v747_v34 = vld [vmem:[#allocation3 + $0x458] sm:$0xff]  ;;  %v817_v35 = vld [vmem:[#allocation3 + $0x688] sm:$0xff]  ;;  %v746_v42 = vld [vmem:[#allocation3 + $0x450] sm:$0xff] }
  0x9d   : > { %916 = vmatpush1.msra.mxu0 %v755_v24  ;;  %1012 = vmatprep.subr.mxu1 %v822_v26  ;;  %v494_v36 = vld [vmem:[%s5248_s2 + $0x10] sm:$0xff]  ;;  %v500_v37 = vld [vmem:[%s5248_s2 + $0x40] sm:$0xff]  ;;  %vm5277_vm5 = vmor %vm5241_vm3, %vm697_vm4 }
  0x9e   : > { %917 = vmatprep.subr.mxu0 %v753_v25  ;;  %1013 = vmatpush1.msra.mxu1 %v821_v29  ;;  %v4685_v38 = vld [vmem:[%s5248_s2] ss:$8 sps:$4 sm:$0xff]   ;;  %v4687_v39 = vld [vmem:[%s5248_s2 + $0x4] ss:$8 sps:$4 sm:$0xff]   ;;  %v512_v40 = vcombine.high %v494_v36, %v494_v36  ;;  %v5258_v41 = vrot.slane %v494_v36, %v5251_v30  ;;  %v4689_v43 = vld [vmem:[%s5248_s2 + $0x30] ss:$8 sps:$4 sm:$0xff]   ;;  %v546_v45 = vcombine.high %v500_v37, %v500_v37 }
  0x9f   : > { %918 = vmatpush1.msra.mxu0 %v752_v27  ;;  %1014 = vmatprep.subr.mxu1 %v819_v32  ;;  %v4691_v44 = vld [vmem:[%s5248_s2 + $0x34] ss:$8 sps:$4 sm:$0xff]   ;;  %v5263_v46 = vrot.slane %v500_v37, %v5251_v30  ;;  %v744_v47 = vld [vmem:[#allocation3 + $0x440] sm:$0xff]  ;;  %v5266_v48 = vrot.slane %v4685_v38, %v5251_v30  ;;  %v5269_v49 = vrot.slane %v4687_v39, %v5251_v30  ;;  %v741_v60 = vld [vmem:[#allocation3 + $0x428] sm:$0xff] }
  0xa0   : > { %919 = vmatprep.subr.mxu0 %v750_v28  ;;  %1015 = vmatpush1.msra.mxu1 %v818_v33  ;;  %v5272_v50 = vrot.slane %v512_v40, %v5251_v30  ;;  %v743_v52 = vld [vmem:[#allocation3 + $0x438] sm:$0xff]  ;;  %v5282_v53 = vrot.slane %v4689_v43, %v5251_v30  ;;  %v5285_v54 = vrot.slane %v4691_v44, %v5251_v30  ;;  %vm5311_vm7 = vmor %vm5277_vm5, %vm699_vm6  ;;  %v740_v1 = vld [vmem:[#allocation3 + $0x420] sm:$0xff] }
  0xa1   : > { %920 = vmatpush1.msra.mxu0 %v749_v31  ;;  %4020 = vmatprep.subr.mxu1 %v817_v35  ;;  %v5288_v55 = vrot.slane %v546_v45, %v5251_v30  ;;  %v541_v56 = vcombine.low %v5266_v48, %v5258_v41  ;;  %v5294_v57 = vcombine.high %v5266_v48, %v5258_v41  ;;  %v738_v6 = vld [vmem:[#allocation3 + $0x410] sm:$0xff]  ;;  %v737_v9 = vld [vmem:[#allocation3 + $0x408] sm:$0xff]  ;;  %v735_v15 = vld [vmem:[#allocation3 + $0x3f8] sm:$0xff] }
  0xa2   : > { %921 = vmatprep.subr.mxu0 %v747_v34  ;;  %v5298_v58 = vcombine.low %v5269_v49, %v5272_v50  ;;  %v692_v59 = vcombine.high %v5269_v49, %v5272_v50  ;;  %v575_v61 = vcombine.low %v5282_v53, %v5263_v46  ;;  %v5306_v62 = vcombine.high %v5282_v53, %v5263_v46  ;;  %v734_v19 = vld [vmem:[#allocation3 + $0x3f0] sm:$0xff]  ;;  %v732_v22 = vld [vmem:[#allocation3 + $0x3e0] sm:$0xff]  ;;  %v731_v27 = vld [vmem:[#allocation3 + $0x3d8] sm:$0xff] }
  0xa3   : > { %922 = vmatpush1.msra.mxu0 %v746_v42  ;;  %v3959_v2 = vrot.slane %v541_v56, 9  ;;  %v703_v3 = vrot.slane %v5294_v57, 7  ;;  %v3969_v10 = vcombine.low %v5272_v50, %v5263_v46  ;;  %v1228_v11 = vrot.slane %v5258_v41, %v5251_v30  ;;  %v729_v28 = vld [vmem:[#allocation3 + $0x3c8] sm:$0xff]  ;;  %v728_v33 = vld [vmem:[#allocation3 + $0x3c0] sm:$0xff]  ;;  %v726_v34 = vld [vmem:[#allocation3 + $0x3b0] sm:$0xff] }
  0xa4   : > { %923 = vmatprep.subr.mxu0 %v744_v47  ;;  %v706_v4 = vrot.slane %v5298_v58, 7  ;;  %v5317_v5 = vrot.slane %v692_v59, 7  ;;  %v3960_v7 = vrot.slane %v575_v61, 9  ;;  %v713_v8 = vrot.slane %v5306_v62, 7  ;;  %v769_v37 = vld [vmem:[#allocation3 + $0x508] sm:$0xff]  ;;  %v814_v40 = vld [vmem:[#allocation3 + $0x670] sm:$0xff] }
  0xa5   : > { %924 = vmatpush1.msra.mxu0 %v743_v52  ;;  %v5326_v12 = vsel %vm5311_vm7, %v3959_v2, %v703_v3  ;;  %v705_v13 = vrot.slane %v703_v3, 2  ;;  %v5330_v16 = vcombine.low %v5285_v54, %v5288_v55  ;;  %v1242_v23 = vrot.slane %v3969_v10, %v5251_v30  ;;  %v725_v38 = vld [vmem:[#allocation3 + $0x3a8] sm:$0xff]  ;;  %v723_v42 = vld [vmem:[#allocation3 + $0x398] sm:$0xff]  ;;  %v766_v44 = vld [vmem:[#allocation3 + $0x4f0] sm:$0xff] }
  0xa6   : > { %925 = vmatprep.subr.mxu0 %v741_v60  ;;  %v708_v14 = vrot.slane %v706_v4, 2  ;;  %v5336_v18 = vsel %vm5311_vm7, %v3960_v7, %v713_v8  ;;  %v3968_v35 = vcombine.low %v5269_v49, %v5282_v53  ;;  %v1221_v39 = vrot.slane %v5266_v48, %v5251_v30  ;;  %v722_v45 = vld [vmem:[#allocation3 + $0x390] sm:$0xff]  ;;  %v811_v52 = vld [vmem:[#allocation3 + $0x658] sm:$0xff]  ;;  %v816_v48 = vld [vmem:[#allocation3 + $0x680] sm:$0xff] }
  0xa7   : > { %926 = vmatpush1.msra.mxu0 %v740_v1  ;;  %v5340_v20 = vsel %vm5311_vm7, %v705_v13, %v706_v4  ;;  %v3971_v24 = vcombine.high %v5263_v46, %v5330_v16  ;;  %v5354_v29 = vcombine.low %v1228_v11, %v1242_v23  ;;  %v3980_v47 = vcombine.high %v5258_v41, %v5298_v58  ;;  %v763_v1 = vld [vmem:[#allocation3 + $0x4d8] sm:$0xff]  ;;  %v808_v3 = vld [vmem:[#allocation3 + $0x640] sm:$0xff]  ;;  %v813_v4 = vld [vmem:[#allocation3 + $0x668] sm:$0xff] }
  0xa8   : > { %927 = vmatprep.subr.mxu0 %v738_v6  ;;  %v5345_v21 = vsel %vm5311_vm7, %v708_v14, %v5317_v5  ;;  %v837_v25 = vcombine.high %v5326_v12, %v5340_v20  ;;  %v1235_v43 = vrot.slane %v3968_v35, %v5251_v30  ;;  %v3982_v51 = vcombine.high %v5272_v50, %v5263_v46  ;;  %v815_v41 = vld [vmem:[#allocation3 + $0x678] sm:$0xff]  ;;  %v760_v6 = vld [vmem:[#allocation3 + $0x4c0] sm:$0xff]  ;;  %v805_v10 = vld [vmem:[#allocation3 + $0x628] sm:$0xff] }
  0xa9   : > { %928 = vmatpush1.msra.mxu0 %v737_v9  ;;  %v839_v26 = vcombine.high %v5345_v21, %v5336_v18  ;;  %v5373_v56 = vcombine.high %v5285_v54, %v5288_v55  ;;  %v716_v59 = vrot.slane %v5330_v16, 7  ;;  %v1716_v58 = vrot.slane %v3980_v47, %v5251_v30  ;;  %v812_v7 = vld [vmem:[#allocation3 + $0x660] sm:$0xff]  ;;  %v810_v11 = vld [vmem:[#allocation3 + $0x650] sm:$0xff]  ;;  %v745_v47 = vld [vmem:[#allocation3 + $0x448] sm:$0xff] }
  0xaa   : > { %929 = vmatprep.subr.mxu0 %v735_v15  ;;  %v853_v31 = vrot.slane %v837_v25, %v5251_v30  ;;  %v5376_v60 = vcombine.low %v1221_v39, %v1235_v43  ;;  %v5378_v61 = vcombine.high %v1221_v39, %v1235_v43  ;;  %v1730_v2 = vrot.slane %v3982_v51, %v5251_v30  ;;  %v802_v23 = vld [vmem:[#allocation3 + $0x610] sm:$0xff]  ;;  %v807_v25 = vld [vmem:[#allocation3 + $0x638] sm:$0xff]  ;;  %v796_v35 = vld [vmem:[#allocation3 + $0x5e0] sm:$0xff] }
  0xab   : > { %930 = vmatpush1.msra.mxu0 %v734_v19  ;;  %v867_v32 = vrot.slane %v839_v26, %v5251_v30  ;;  %v715_v13 = vrot.slane %v713_v8, 2  ;;  %v718_v14 = vrot.slane %v716_v59, 2  ;;  %v719_v15 = vrot.slane %v5373_v56, 7  ;;  %v757_v19 = vld [vmem:[#allocation3 + $0x4a8] sm:$0xff]  ;;  %v754_v26 = vld [vmem:[#allocation3 + $0x490] sm:$0xff]  ;;  %v650_v16 = vld [vmem:[#allocation3 + $0x240] sm:$0xff] }
  0xac   : > { %931 = vmatprep.subr.mxu0 %v732_v22  ;;  %v5382_v9 = vcombine.low %v1716_v58, %v1730_v2  ;;  %v809_v22 = vld [vmem:[#allocation3 + $0x648] sm:$0xff]  ;;  %v838_v39 = vcombine.low %v5345_v21, %v5336_v18  ;;  %v790_v51 = vld [vmem:[#allocation3 + $0x5b0] sm:$0xff]  ;;  %v739_v58 = vld [vmem:[#allocation3 + $0x418] sm:$0xff]  ;;  %v2237_v63 = vcombine.low %v5340_v20, %v5345_v21 }
  0xad   : > { %932 = vmatpush1.msra.mxu0 %v731_v27  ;;  %v5360_v36 = vcombine.low %v853_v31, %v867_v32  ;;  %v806_v27 = vld [vmem:[#allocation3 + $0x630] sm:$0xff]  ;;  %v804_v31 = vld [vmem:[#allocation3 + $0x620] sm:$0xff]  ;;  %v5389_v8 = vsel %vm5311_vm7, %v715_v13, %v716_v59  ;;  %v5395_v32 = vsel %vm5311_vm7, %v718_v14, %v719_v15  ;;  %v733_v14 = vld [vmem:[#allocation3 + $0x3e8] sm:$0xff] }
  0xae   : > { %933 = vmatprep.subr.mxu0 %v729_v28  ;;  %v799_v28 = vld [vmem:[#allocation3 + $0x5f8] sm:$0xff]  ;;  %v872_v43 = vcombine.high %v5389_v8, %v5395_v32  ;;  %v794_v2 = vld [vmem:[#allocation3 + $0x5d0] sm:$0xff]  ;;  %v871_v13 = vcombine.low %v5389_v8, %v5395_v32  ;;  %v583_v46 = vld [vmem:[#allocation3 + $0x28] sm:$0xff] }
  0xaf   : > { %934 = vmatpush1.msra.mxu0 %v728_v33  ;;  %3963 = vmatmul.mubr.msk.f32.vlgmr.msra.gmra.mxu1 %vm892_vm8, %v5360_v36  ;;  %v751_v33 = vld [vmem:[#allocation3 + $0x478] sm:$0xff] }
  0xb0   : > { %935 = vmatprep.subr.mxu0 %v726_v34  ;;  %4021 = vmatpush3.msra.mxu1 %v769_v37  ;;  %v803_v34 = vld [vmem:[#allocation3 + $0x618] sm:$0xff]  ;;  %v801_v37 = vld [vmem:[#allocation3 + $0x608] sm:$0xff]  ;;  %v5406_v59 = vrot.slane %v872_v43, %v5251_v30  ;;  %v3981_v43 = vcombine.high %v5269_v49, %v5282_v53 }
  0xb1   : > { %936 = vmatpush1.msra.mxu0 %v725_v38  ;;  %4022 = vmatprep.subr.mxu1 %v814_v40  ;;  %v836_v38 = vcombine.low %v5326_v12, %v5340_v20  ;;  %v748_v40 = vld [vmem:[#allocation3 + $0x460] sm:$0xff]  ;;  %v797_v12 = vld [vmem:[#allocation3 + $0x5e8] sm:$0xff] }
  0xb2   : > { %937 = vmatprep.subr.mxu0 %v723_v42  ;;  %4023 = vmatpush3.msra.mxu1 %v766_v44  ;;  %v800_v42 = vld [vmem:[#allocation3 + $0x600] sm:$0xff]  ;;  %v793_v44 = vld [vmem:[#allocation3 + $0x5c8] sm:$0xff] }
  0xb3   : > { %938 = vmatpush1.msra.mxu0 %v722_v45  ;;  %4024 = vmatprep.subr.mxu1 %v811_v52  ;;  %v798_v45 = vld [vmem:[#allocation3 + $0x5f0] sm:$0xff]  ;;  %v846_v18 = vrot.slane %v836_v38, %v5251_v30  ;;  %v860_v52 = vrot.slane %v838_v39, %v5251_v30  ;;  %v724_v38 = vld [vmem:[#allocation3 + $0x3a0] sm:$0xff]  ;;  %v777_v53 = vld [vmem:[#allocation3 + $0x548] sm:$0xff] }
  0xb4   : > { %939 = vmatprep.subr.mxu0 %v816_v48  ;;  %4025 = vmatpush3.msra.mxu1 %v763_v1  ;;  %v742_v48 = vld [vmem:[#allocation3 + $0x430] sm:$0xff]  ;;  %v795_v1 = vld [vmem:[#allocation3 + $0x5d8] sm:$0xff] }
  0xb5   : > { %940 = vmatpush2.msra.mxu0 %v815_v41  ;;  %4026 = vmatprep.subr.mxu1 %v808_v3  ;;  %v787_v41 = vld [vmem:[#allocation3 + $0x598] sm:$0xff]  ;;  %v784_v3 = vld [vmem:[#allocation3 + $0x580] sm:$0xff]  ;;  %v868_v39 = vcombine.low %v846_v18, %v860_v52 }
  0xb6   : > { %941 = vmatprep.subr.mxu0 %v813_v4  ;;  %4027 = vmatpush3.msra.mxu1 %v760_v6  ;;  %v792_v4 = vld [vmem:[#allocation3 + $0x5c0] sm:$0xff]  ;;  %v5409_v6 = vcombine.high %v846_v18, %v860_v52  ;;  %v829_v52 = vld [vmem:[#allocation3 + $0x6e8] sm:$0xff] }
  0xb7   : > { %942 = vmatpush2.msra.mxu0 %v812_v7  ;;  %4028 = vmatprep.subr.mxu1 %v805_v10  ;;  %v736_v7 = vld [vmem:[#allocation3 + $0x400] sm:$0xff]  ;;  %v781_v10 = vld [vmem:[#allocation3 + $0x568] sm:$0xff] }
  0xb8   : > { %943 = vmatprep.subr.mxu0 %v810_v11  ;;  %4029 = vmatpush3.msra.mxu1 %v757_v19  ;;  %v791_v11 = vld [vmem:[#allocation3 + $0x5b8] sm:$0xff]  ;;  %v789_v19 = vld [vmem:[#allocation3 + $0x5a8] sm:$0xff] }
  0xb9   : > { %944 = vmatpush2.msra.mxu0 %v809_v22  ;;  %4030 = vmatprep.subr.mxu1 %v802_v23  ;;  %v778_v22 = vld [vmem:[#allocation3 + $0x550] sm:$0xff]  ;;  %v788_v23 = vld [vmem:[#allocation3 + $0x5a0] sm:$0xff] }
  0xba   : > { %945 = vmatprep.subr.mxu0 %v807_v25  ;;  %4031 = vmatpush3.msra.mxu1 %v754_v26  ;;  %v730_v25 = vld [vmem:[#allocation3 + $0x3d0] sm:$0xff] }
  0xbb   : > { %946 = vmatpush2.msra.mxu0 %v806_v27  ;;  %4032 = vmatprep.subr.mxu1 %v799_v28  ;;  %v786_v26 = vld [vmem:[#allocation3 + $0x590] sm:$0xff]  ;;  %v775_v27 = vld [vmem:[#allocation3 + $0x538] sm:$0xff]  ;;  %v785_v28 = vld [vmem:[#allocation3 + $0x588] sm:$0xff] }
  0xbc   : > { %947 = vmatprep.subr.mxu0 %v804_v31  ;;  %4033 = vmatpush3.msra.mxu1 %v751_v33  ;;  %v5417_v31 = vrot.slane %v871_v13, %v5251_v30  ;;  %v727_v33 = vld [vmem:[#allocation3 + $0x3b8] sm:$0xff]  ;;  %v623_v13 = vld [vmem:[#allocation3 + $0x168] sm:$0xff] }
  0xbd   : > { %948 = vmatpush2.msra.mxu0 %v803_v34  ;;  %4034 = vmatprep.subr.mxu1 %v796_v35  ;;  %v783_v34 = vld [vmem:[#allocation3 + $0x578] sm:$0xff]  ;;  %v772_v35 = vld [vmem:[#allocation3 + $0x520] sm:$0xff] }
  0xbe   : > { %949 = vmatprep.subr.mxu0 %v801_v37  ;;  %4035 = vmatpush3.msra.mxu1 %v748_v40  ;;  %v782_v37 = vld [vmem:[#allocation3 + $0x570] sm:$0xff]  ;;  %v780_v40 = vld [vmem:[#allocation3 + $0x560] sm:$0xff] }
  0xbf   : > { %950 = vmatpush2.msra.mxu0 %v800_v42  ;;  %4036 = vmatprep.subr.mxu1 %v793_v44  ;;  %v3979_v42 = vcombine.low %v5294_v57, %v5269_v49  ;;  %v835_v44 = vld [vmem:[#allocation3 + $0x718] sm:$0xf] }
  0xc0   : > { %951 = vmatprep.subr.mxu0 %v798_v45  ;;  %4037 = vmatpush3.msra.mxu1 %v745_v47  ;;  %v5425_v45 = vcombine.high %v5417_v31, %v5417_v31  ;;  %v779_v57 = vld [vmem:[#allocation3 + $0x558] sm:$0xff] }
  0xc1   : > { %1054 = vmatprep.mubr.f32.mxu1 %v6143_v0  ;;  %4038 = vmatprep.subr.mxu1 %v790_v51  ;;  %v1709_v47 = vrot.slane %v3979_v42, %v5251_v30  ;;  %v1723_v51 = vrot.slane %v3981_v43, %v5251_v30  ;;  %v606_v42 = vld [vmem:[#allocation3 + $0xe0] sm:$0xff] }
  0xc2   : > { %952 = vmatpush2.msra.mxu0 %v797_v12  ;;  %4039 = vmatpush3.msra.mxu1 %v742_v48  ;;  %v832_v12 = vld [vmem:[#allocation3 + $0x700] sm:$0xff] }
  0xc3   : > { %953 = vmatprep.subr.mxu0 %v795_v1  ;;  %4040 = vmatprep.subr.mxu1 %v787_v41  ;;  %v5430_v18 = vcombine.high %v1709_v47, %v1723_v51  ;;  %v5434_v48 = vcombine.low %v1709_v47, %v1723_v51  ;;  %v776_v1 = vld [vmem:[#allocation3 + $0x540] sm:$0xff]  ;;  %v826_v41 = vld [vmem:[#allocation3 + $0x6d0] sm:$0xff]  ;;  %v603_v47 = vld [vmem:[#allocation3 + $0xc8] sm:$0xff] }
  0xc4   : > { %3964 = vmatmul.mubr.msk.f32.gmra.mxu1 %vm892_vm8, %v5406_v59  ;;  %954 = vmatpush2.msra.mxu0 %v794_v2  ;;  %v823_v2 = vld [vmem:[#allocation3 + $0x6b8] sm:$0xff]  ;;  %v678_v43 = vld [vmem:[#allocation3 + $0x320] sm:$0xff]  ;;  %v675_v51 = vld [vmem:[#allocation3 + $0x308] sm:$0xff] }
  0xc5   : > { %4041 = vmatpush3.msra.mxu1 %v739_v58  ;;  %955 = vmatprep.subr.mxu0 %v792_v4  ;;  %v774_v58 = vld [vmem:[#allocation3 + $0x530] sm:$0xff]  ;;  %v771_v4 = vld [vmem:[#allocation3 + $0x518] sm:$0xff] }
  0xc6   : > { %4042 = vmatprep.subr.mxu1 %v784_v3  ;;  %1125 = vmatprep.mubr.f32.mxu1 %v5409_v6  ;;  %v773_v3 = vld [vmem:[#allocation3 + $0x528] sm:$0xff] }
  0xc7   : > { %4043 = vmatpush3.msra.mxu1 %v736_v7  ;;  %956 = vmatpush2.msra.mxu0 %v791_v11  ;;  %v820_v7 = vld [vmem:[#allocation3 + $0x6a0] sm:$0xff]  ;;  %v624_v11 = vld [vmem:[#allocation3 + $0x170] sm:$0xff] }
  0xc8   : > { %4044 = vmatprep.subr.mxu1 %v781_v10  ;;  %957 = vmatprep.subr.mxu0 %v789_v19  ;;  %v770_v10 = vld [vmem:[#allocation3 + $0x510] sm:$0xff]  ;;  %v690_v19 = vld [vmem:[#allocation3 + $0x380] sm:$0xf] }
  0xc9   : > { %4045 = vmatpush3.msra.mxu1 %v733_v14  ;;  %958 = vmatpush2.msra.mxu0 %v788_v23  ;;  %v621_v14 = vld [vmem:[#allocation3 + $0x158] sm:$0xff]  ;;  %v618_v23 = vld [vmem:[#allocation3 + $0x140] sm:$0xff] }
  0xca   : > { %4046 = vmatprep.subr.mxu1 %v778_v22  ;;  %959 = vmatprep.subr.mxu0 %v786_v26  ;;  %v689_v22 = vld [vmem:[#allocation3 + $0x378] sm:$0xf] }
  0xcb   : > { %4047 = vmatpush3.msra.mxu1 %v730_v25  ;;  %960 = vmatpush2.msra.mxu0 %v785_v28  ;;  %v687_v25 = vld [vmem:[#allocation3 + $0x368] sm:$0xff]  ;;  %v617_v26 = vld [vmem:[#allocation3 + $0x138] sm:$0xff]  ;;  %v614_v28 = vld [vmem:[#allocation3 + $0x120] sm:$0xff] }
  0xcc   : > { %4048 = vmatprep.subr.mxu1 %v775_v27  ;;  %961 = vmatprep.subr.mxu0 %v783_v34  ;;  %v615_v27 = vld [vmem:[#allocation3 + $0x128] sm:$0xff] }
  0xcd   : > { %4049 = vmatpush3.msra.mxu1 %v727_v33  ;;  %962 = vmatpush2.msra.mxu0 %v782_v37  ;;  %v684_v33 = vld [vmem:[#allocation3 + $0x350] sm:$0xff]  ;;  %v611_v34 = vld [vmem:[#allocation3 + $0x108] sm:$0xff]  ;;  %v609_v37 = vld [vmem:[#allocation3 + $0xf8] sm:$0xff] }
  0xce   : > { %4050 = vmatprep.subr.mxu1 %v772_v35  ;;  %963 = vmatprep.subr.mxu0 %v780_v40  ;;  %v683_v35 = vld [vmem:[#allocation3 + $0x348] sm:$0xff]  ;;  %v680_v40 = vld [vmem:[#allocation3 + $0x330] sm:$0xff] }
  0xcf   : > { %4051 = vmatpush3.msra.mxu1 %v724_v38  ;;  %964 = vmatpush2.msra.mxu0 %v779_v57  ;;  %v681_v38 = vld [vmem:[#allocation3 + $0x338] sm:$0xff]  ;;  %v600_v57 = vld [vmem:[#allocation3 + $0xb0] sm:$0xff] }
  0xd0   : > { %4372 = vmatprep.subr.msk.mxu1 %vm897_vm0, %v835_v44  ;;  %1126 = vmatmul.mubr.f32.vlgmr.msra.gmra.mxu1 %v868_v39 }
  0xd1   : > { %4373 = vmatpush3.msk.msra.mxu1 %vm897_vm0, %v835_v44  ;;  %1130 = vmatprep.mubr.f32.mxu1 %v5425_v45  ;;  %v605_v44 = vld [vmem:[#allocation3 + $0xd8] sm:$0xff] }
  0xd2   : > { %4374 = vmatprep.subr.mxu1 %v832_v12  ;;  %965 = vmatprep.subr.mxu0 %v777_v53  ;;  %v673_v53 = vld [vmem:[#allocation3 + $0x2f8] sm:$0xff] }
  0xd3   : > { %4375 = vmatpush3.msra.mxu1 %v832_v12  ;;  %966 = vmatpush2.msra.mxu0 %v776_v1  ;;  %v674_v12 = vld [vmem:[#allocation3 + $0x300] sm:$0xff]  ;;  %v625_v1 = vld [vmem:[#allocation3 + $0x178] sm:$0xff] }
  0xd4   : > { %4376 = vmatprep.subr.mxu1 %v829_v52  ;;  %1131 = vmatmul.mubr.f32.gmra.mxu1 %v5417_v31 }
  0xd5   : > { %4377 = vmatpush3.msra.mxu1 %v829_v52  ;;  %4384 = vmatprep.mubr.msk.f32.mxu1 %vm892_vm8, %v5360_v36  ;;  %v620_v36 = vld [vmem:[#allocation3 + $0x150] sm:$0xff]  ;;  %v599_v52 = vld [vmem:[#allocation3 + $0xa8] sm:$0xff] }
  0xd6   : > { %4378 = vmatprep.subr.mxu1 %v826_v41  ;;  %967 = vmatprep.subr.mxu0 %v774_v58  ;;  %v670_v58 = vld [vmem:[#allocation3 + $0x2e0] sm:$0xff] }
  0xd7   : > { %4379 = vmatpush3.msra.mxu1 %v826_v41  ;;  %968 = vmatpush2.msra.mxu0 %v773_v3  ;;  %v597_v41 = vld [vmem:[#allocation3 + $0x98] sm:$0xff]  ;;  %v622_v3 = vld [vmem:[#allocation3 + $0x160] sm:$0xff] }
  0xd8   : > { %4380 = vmatprep.subr.mxu1 %v823_v2  ;;  %969 = vmatprep.subr.mxu0 %v771_v4  ;;  %v594_v4 = vld [vmem:[#allocation3 + $0x80] sm:$0xff] }
  0xd9   : > { %4381 = vmatpush3.msra.mxu1 %v823_v2  ;;  %970 = vmatpush2.msra.mxu0 %v770_v10  ;;  %v596_v2 = vld [vmem:[#allocation3 + $0x90] sm:$0xff]  ;;  %v593_v10 = vld [vmem:[#allocation3 + $0x78] sm:$0xff] }
  0xda   : > { %4382 = vmatprep.subr.mxu1 %v820_v7  ;;  %971 = vmatprep.mubr.f32.mxu0 %v5409_v6  ;;  %v686_v6 = vld [vmem:[#allocation3 + $0x360] sm:$0xff] }
  0xdb   : > { %4383 = vmatpush3.msra.mxu1 %v820_v7  ;;  %972 = vmatmul.mubr.f32.vlgmr.msra.gmra.mxu0 %v868_v39  ;;  %v608_v39 = vld [vmem:[#allocation3 + $0xf0] sm:$0xff]  ;;  %v667_v7 = vld [vmem:[#allocation3 + $0x2c8] sm:$0xff] }
  0xdc   : > { %4385 = vmatmul.mubr.msk.f32.vlgmr.msra.gmra.mxu1 %vm892_vm8, %v5406_v59  ;;  %1280 = vmatprep.subr.mxu1 %v624_v11  ;;  %v612_v59 = vld [vmem:[#allocation3 + $0x110] sm:$0xff]  ;;  %v619_v11 = vld [vmem:[#allocation3 + $0x148] sm:$0xff] }
  0xdd   : > { %1281 = vmatpush1.msra.mxu1 %v623_v13  ;;  %3972 = vmatprep.subr.msk.mxu0 %vm897_vm0, %v690_v19  ;;  %v591_v13 = vld [vmem:[#allocation3 + $0x68] sm:$0xff]  ;;  %v590_v19 = vld [vmem:[#allocation3 + $0x60] sm:$0xff] }
  0xde   : > { %1282 = vmatprep.subr.mxu1 %v621_v14  ;;  %3973 = vmatpush1.msk.msra.mxu0 %vm897_vm0, %v689_v22  ;;  %v664_v14 = vld [vmem:[#allocation3 + $0x2b0] sm:$0xff] }
  0xdf   : > { %1283 = vmatpush1.msra.mxu1 %v620_v36  ;;  %1379 = vmatprep.subr.mxu0 %v687_v25  ;;  %v616_v36 = vld [vmem:[#allocation3 + $0x130] sm:$0xff]  ;;  %v587_v25 = vld [vmem:[#allocation3 + $0x48] sm:$0xff] }
  0xe0   : > { %1284 = vmatprep.subr.mxu1 %v618_v23  ;;  %977 = vmatprep.mubr.f32.mxu0 %v5425_v45  ;;  %v677_v45 = vld [vmem:[#allocation3 + $0x318] sm:$0xff]  ;;  %v588_v22 = vld [vmem:[#allocation3 + $0x50] sm:$0xff] }
  0xe1   : > { %1285 = vmatpush1.msra.mxu1 %v617_v26  ;;  %1380 = vmatpush1.msra.mxu0 %v686_v6  ;;  %v661_v23 = vld [vmem:[#allocation3 + $0x298] sm:$0xff]  ;;  %v658_v6 = vld [vmem:[#allocation3 + $0x280] sm:$0xff] }
  0xe2   : > { %1286 = vmatprep.subr.mxu1 %v615_v27  ;;  %978 = vmatmul.mubr.f32.gmra.mxu0 %v5417_v31  ;;  %v602_v31 = vld [vmem:[#allocation3 + $0xc0] sm:$0xff]  ;;  %v613_v26 = vld [vmem:[#allocation3 + $0x118] sm:$0xff] }
  0xe3   : > { %1287 = vmatpush1.msra.mxu1 %v614_v28  ;;  %1381 = vmatprep.subr.mxu0 %v684_v33  ;;  %v585_v27 = vld [vmem:[#allocation3 + $0x38] sm:$0xff]  ;;  %v584_v28 = vld [vmem:[#allocation3 + $0x30] sm:$0xff]  ;;  %v582_v33 = vld [vmem:[#allocation3 + $0x20] sm:$0xff] }
  0xe4   : > { %1288 = vmatprep.subr.mxu1 %v612_v59  ;;  %1382 = vmatpush1.msra.mxu0 %v683_v35  ;;  %v610_v59 = vld [vmem:[#allocation3 + $0x100] sm:$0xff]  ;;  %v581_v35 = vld [vmem:[#allocation3 + $0x18] sm:$0xff] }
  0xe5   : > { %1289 = vmatpush1.msra.mxu1 %v611_v34  ;;  %1383 = vmatprep.subr.mxu0 %v681_v38  ;;  %v655_v34 = vld [vmem:[#allocation3 + $0x268] sm:$0xff] }
  0xe6   : > { %1290 = vmatprep.subr.mxu1 %v609_v37  ;;  %1384 = vmatpush1.msra.mxu0 %v680_v40  ;;  %v607_v37 = vld [vmem:[#allocation3 + $0xe8] sm:$0xff]  ;;  %v578_v40 = vld [vmem:[#allocation3] sm:$0xff] }
  0xe7   : > { %1291 = vmatpush1.msra.mxu1 %v608_v39  ;;  %1385 = vmatprep.subr.mxu0 %v678_v43  ;;  %v579_v38 = vld [vmem:[#allocation3 + $0x8] sm:$0xff]  ;;  %v652_v39 = vld [vmem:[#allocation3 + $0x250] sm:$0xff] }
  0xe8   : > { %1292 = vmatprep.subr.mxu1 %v606_v42  ;;  %1386 = vmatpush1.msra.mxu0 %v677_v45  ;;  %v604_v42 = vld [vmem:[#allocation3 + $0xd0] sm:$0xff]  ;;  %v671_v45 = vld [vmem:[#allocation3 + $0x2e8] sm:$0xff] }
  0xe9   : > { %1293 = vmatpush1.msra.mxu1 %v605_v44  ;;  %1387 = vmatprep.subr.mxu0 %v675_v51  ;;  %v672_v43 = vld [vmem:[#allocation3 + $0x2f0] sm:$0xff]  ;;  %v649_v44 = vld [vmem:[#allocation3 + $0x238] sm:$0xff] }
  0xea   : > { %1294 = vmatprep.subr.mxu1 %v603_v47  ;;  %1388 = vmatpush1.msra.mxu0 %v674_v12  ;;  %v601_v47 = vld [vmem:[#allocation3 + $0xb8] sm:$0xff]  ;;  %v668_v12 = vld [vmem:[#allocation3 + $0x2d0] sm:$0xff] }
  0xeb   : > { %1295 = vmatpush1.msra.mxu1 %v602_v31  ;;  %1421 = vmatprep.mubr.f32.mxu0 %v6143_v0  ;;  %v669_v51 = vld [vmem:[#allocation3 + $0x2d8] sm:$0xff]  ;;  %v646_v31 = vld [vmem:[#allocation3 + $0x220] sm:$0xff] }
  0xec   : > { %1296 = vmatprep.subr.mxu1 %v600_v57  ;;  %3974 = vmatmul.mubr.msk.f32.vlgmr.msra.gmra.mxu0 %vm892_vm8, %v5354_v29  ;;  %v598_v57 = vld [vmem:[#allocation3 + $0xa0] sm:$0xff] }
  0xed   : > { %4066 = vmatprep.subr.mxu0 %v673_v53  ;;  %1297 = vmatpush1.msra.mxu1 %v599_v52  ;;  %v666_v53 = vld [vmem:[#allocation3 + $0x2c0] sm:$0xff]  ;;  %v643_v52 = vld [vmem:[#allocation3 + $0x208] sm:$0xff] }
  0xee   : > { %4067 = vmatpush3.msra.mxu0 %v625_v1  ;;  %1298 = vmatprep.subr.mxu1 %v597_v41  ;;  %v665_v1 = vld [vmem:[#allocation3 + $0x2b8] sm:$0xff]  ;;  %v595_v41 = vld [vmem:[#allocation3 + $0x88] sm:$0xff] }
  0xef   : > { %4068 = vmatprep.subr.mxu0 %v670_v58  ;;  %1299 = vmatpush1.msra.mxu1 %v596_v2  ;;  %v663_v58 = vld [vmem:[#allocation3 + $0x2a8] sm:$0xff]  ;;  %v640_v2 = vld [vmem:[#allocation3 + $0x1f0] sm:$0xff] }
  0xf0   : > { %4069 = vmatpush3.msra.mxu0 %v622_v3  ;;  %1300 = vmatprep.subr.mxu1 %v594_v4  ;;  %v662_v3 = vld [vmem:[#allocation3 + $0x2a0] sm:$0xff]  ;;  %v592_v4 = vld [vmem:[#allocation3 + $0x70] sm:$0xff] }
  0xf1   : > { %4070 = vmatprep.subr.mxu0 %v667_v7  ;;  %1301 = vmatpush1.msra.mxu1 %v593_v10  ;;  %v660_v7 = vld [vmem:[#allocation3 + $0x290] sm:$0xff]  ;;  %v637_v10 = vld [vmem:[#allocation3 + $0x1d8] sm:$0xff] }
  0xf2   : > { %4071 = vmatpush3.msra.mxu0 %v619_v11  ;;  %1302 = vmatprep.subr.mxu1 %v591_v13  ;;  %v659_v11 = vld [vmem:[#allocation3 + $0x288] sm:$0xff]  ;;  %v589_v13 = vld [vmem:[#allocation3 + $0x58] sm:$0xff] }
  0xf3   : > { %4072 = vmatprep.subr.mxu0 %v664_v14  ;;  %1303 = vmatpush1.msra.mxu1 %v590_v19  ;;  %v657_v14 = vld [vmem:[#allocation3 + $0x278] sm:$0xff]  ;;  %v634_v19 = vld [vmem:[#allocation3 + $0x1c0] sm:$0xff] }
  0xf4   : > { %4073 = vmatpush3.msra.mxu0 %v616_v36  ;;  %1304 = vmatprep.subr.mxu1 %v588_v22  ;;  %v656_v36 = vld [vmem:[#allocation3 + $0x270] sm:$0xff]  ;;  %v5453_v22 = vrot.slane %v3971_v24, %v5251_v30 }
  0xf5   : > { %4074 = vmatprep.subr.mxu0 %v661_v23  ;;  %1305 = vmatpush1.msra.mxu1 %v587_v25  ;;  %v654_v23 = vld [vmem:[#allocation3 + $0x260] sm:$0xff]  ;;  %v3970_v25 = vcombine.low %v5306_v62, %v5285_v54  ;;  %v628_v24 = vld [vmem:[#allocation3 + $0x190] sm:$0xff] }
  0xf6   : > { %4075 = vmatpush3.msra.mxu0 %v613_v26  ;;  %1306 = vmatprep.subr.mxu1 %v585_v27  ;;  %v586_v26 = vld [vmem:[#allocation3 + $0x40] sm:$0xff]  ;;  %v653_v27 = vld [vmem:[#allocation3 + $0x258] sm:$0xff] }
  0xf7   : > { %4076 = vmatprep.subr.mxu0 %v658_v6  ;;  %1307 = vmatpush1.msra.mxu1 %v584_v28  ;;  %v631_v6 = vld [vmem:[#allocation3 + $0x1a8] sm:$0xff]  ;;  %v5461_v62 = vrot.slane %v3970_v25, %v5251_v30  ;;  %v1693_v25 = vld [vmem:[#allocation3 + $0xa80] sm:$0xff] }
  0xf8   : > { %4077 = vmatpush3.msra.mxu0 %v610_v59  ;;  %1308 = vmatprep.subr.mxu1 %v582_v33  ;;  %v651_v28 = vld [vmem:[#allocation3 + $0x248] sm:$0xff]  ;;  %v580_v59 = vld [vmem:[#allocation3 + $0x10] sm:$0xff] }
  0xf9   : > { %4078 = vmatprep.subr.mxu0 %v655_v34  ;;  %1309 = vmatpush1.msra.mxu1 %v581_v35  ;;  %v648_v33 = vld [vmem:[#allocation3 + $0x230] sm:$0xff]  ;;  %v691_v34 = vld [vmem:[#allocation3 + $0x388] sm:$0xf] }
  0xfa   : > { %4079 = vmatpush3.msra.mxu0 %v607_v37  ;;  %1310 = vmatprep.subr.mxu1 %v579_v38  ;;  %v647_v35 = vld [vmem:[#allocation3 + $0x228] sm:$0xff]  ;;  %v645_v37 = vld [vmem:[#allocation3 + $0x218] sm:$0xff]  ;;  %v688_v38 = vld [vmem:[#allocation3 + $0x370] sm:$0xff] }
  0xfb   : > { %4080 = vmatprep.subr.mxu0 %v652_v39  ;;  %1311 = vmatpush1.msra.mxu1 %v578_v40  ;;  %v5466_v39 = vcombine.high %v5461_v62, %v5461_v62  ;;  %v644_v40 = vld [vmem:[#allocation3 + $0x210] sm:$0xff] }
  0xfc   : > { %4081 = vmatpush3.msra.mxu0 %v604_v42  ;;  %1312 = vmatprep.subr.mxu1 %v672_v43  ;;  %v642_v42 = vld [vmem:[#allocation3 + $0x200] sm:$0xff]  ;;  %v685_v43 = vld [vmem:[#allocation3 + $0x358] sm:$0xff] }
  0xfd   : > { %4082 = vmatprep.subr.mxu0 %v649_v44  ;;  %1313 = vmatpush2.msra.mxu1 %v671_v45  ;;  %v641_v44 = vld [vmem:[#allocation3 + $0x1f8] sm:$0xff]  ;;  %v639_v45 = vld [vmem:[#allocation3 + $0x1e8] sm:$0xff] }
  0xfe   : > { %4083 = vmatpush3.msra.mxu0 %v601_v47  ;;  %1314 = vmatprep.subr.mxu1 %v669_v51  ;;  %v682_v47 = vld [vmem:[#allocation3 + $0x340] sm:$0xff] }
  0xff   : > { %4084 = vmatprep.subr.mxu0 %v646_v31  ;;  %1315 = vmatpush2.msra.mxu1 %v668_v12  ;;  %v638_v51 = vld [vmem:[#allocation3 + $0x1e0] sm:$0xff]  ;;  %v636_v31 = vld [vmem:[#allocation3 + $0x1d0] sm:$0xff]  ;;  %v679_v12 = vld [vmem:[#allocation3 + $0x328] sm:$0xff] }
 0x100   : > { %4085 = vmatpush3.msra.mxu0 %v598_v57  ;;  %1316 = vmatprep.subr.mxu1 %v666_v53  ;;  %v635_v57 = vld [vmem:[#allocation3 + $0x1c8] sm:$0xff]  ;;  %v633_v53 = vld [vmem:[#allocation3 + $0x1b8] sm:$0xff] }
 0x101   : > { %4086 = vmatprep.subr.mxu0 %v643_v52  ;;  %1317 = vmatpush2.msra.mxu1 %v665_v1  ;;  %v676_v52 = vld [vmem:[#allocation3 + $0x310] sm:$0xff] }
 0x102   : > { %4087 = vmatpush3.msra.mxu0 %v595_v41  ;;  %1318 = vmatprep.subr.mxu1 %v663_v58  ;;  %v632_v1 = vld [vmem:[#allocation3 + $0x1b0] sm:$0xff]  ;;  %v630_v41 = vld [vmem:[#allocation3 + $0x1a0] sm:$0xff] }
 0x103   : > { %4088 = vmatprep.subr.mxu0 %v640_v2  ;;  %1319 = vmatpush2.msra.mxu1 %v662_v3  ;;  %v1631_v58 = vld [vmem:[#allocation3 + $0x890] sm:$0xff]  ;;  %v629_v2 = vld [vmem:[#allocation3 + $0x198] sm:$0xff]  ;;  %v1630_v3 = vld [vmem:[#allocation3 + $0x888] sm:$0xff] }
 0x104   : > { %4089 = vmatpush3.msra.mxu0 %v592_v4  ;;  %1320 = vmatprep.subr.mxu1 %v660_v7  ;;  %v627_v4 = vld [vmem:[#allocation3 + $0x188] sm:$0xff]  ;;  %v1628_v7 = vld [vmem:[#allocation3 + $0x878] sm:$0xff] }
 0x105   : > { %4090 = vmatprep.subr.mxu0 %v637_v10  ;;  %1321 = vmatpush2.msra.mxu1 %v659_v11  ;;  %v626_v10 = vld [vmem:[#allocation3 + $0x180] sm:$0xff]  ;;  %v1627_v11 = vld [vmem:[#allocation3 + $0x870] sm:$0xff] }
 0x106   : > { %4091 = vmatpush3.msra.mxu0 %v589_v13  ;;  %1322 = vmatprep.subr.mxu1 %v657_v14  ;;  %v1625_v13 = vld [vmem:[#allocation3 + $0x860] sm:$0xff] }
 0x107   : > { %1427 = vmatprep.mubr.f32.mxu0 %v6143_v0  ;;  %4092 = vmatprep.subr.mxu0 %v634_v19  ;;  %v1697_v14 = vld [vmem:[#allocation3 + $0xaa0] sm:$0xf]  ;;  %v1624_v19 = vld [vmem:[#allocation3 + $0x858] sm:$0xff] }
 0x108   : > { %1323 = vmatpush2.msra.mxu1 %v656_v36  ;;  %3975 = vmatmul.mubr.msk.f32.gmra.mxu0 %vm892_vm8, %v5453_v22  ;;  %v1622_v36 = vld [vmem:[#allocation3 + $0x848] sm:$0xff] }
 0x109   : > { %1324 = vmatprep.subr.mxu1 %v654_v23  ;;  %4093 = vmatpush3.msra.mxu0 %v586_v26  ;;  %v1694_v23 = vld [vmem:[#allocation3 + $0xa88] sm:$0xff]  ;;  %v1619_v26 = vld [vmem:[#allocation3 + $0x830] sm:$0xff] }
 0x10a   : > { %1325 = vmatpush2.msra.mxu1 %v653_v27  ;;  %4094 = vmatprep.subr.mxu0 %v631_v6  ;;  %v1691_v27 = vld [vmem:[#allocation3 + $0xa70] sm:$0xff]  ;;  %v1690_v6 = vld [vmem:[#allocation3 + $0xa68] sm:$0xff] }
 0x10b   : > { %1326 = vmatprep.subr.mxu1 %v651_v28  ;;  %4095 = vmatpush3.msra.mxu0 %v583_v46  ;;  %v1688_v28 = vld [vmem:[#allocation3 + $0xa58] sm:$0xff]  ;;  %v1615_v46 = vld [vmem:[#allocation3 + $0x810] sm:$0xff] }
 0x10c   : > { %1327 = vmatpush2.msra.mxu1 %v650_v16  ;;  %4096 = vmatprep.subr.mxu0 %v628_v24  ;;  %v1687_v16 = vld [vmem:[#allocation3 + $0xa50] sm:$0xff]  ;;  %v1613_v24 = vld [vmem:[#allocation3 + $0x800] sm:$0xff] }
 0x10d   : > { %1498 = vmatprep.mubr.f32.mxu0 %v5378_v61  ;;  %4097 = vmatpush3.msra.mxu0 %v580_v59  ;;  %v1685_v59 = vld [vmem:[#allocation3 + $0xa40] sm:$0xff] }
 0x10e   : > { %1328 = vmatprep.subr.mxu1 %v648_v33  ;;  %1499 = vmatmul.mubr.f32.vlgmr.msra.gmra.mxu0 %v5376_v60  ;;  %v1612_v33 = vld [vmem:[#allocation3 + $0x7f8] sm:$0xff] }
 0x10f   : > { %4387 = vmatprep.subr.msk.mxu0 %vm897_vm0, %v691_v34  ;;  %1329 = vmatpush2.msra.mxu1 %v647_v35  ;;  %v1610_v35 = vld [vmem:[#allocation3 + $0x7e8] sm:$0xff] }
 0x110   : > { %4388 = vmatpush3.msk.msra.mxu0 %vm897_vm0, %v691_v34  ;;  %1330 = vmatprep.subr.mxu1 %v645_v37  ;;  %v1684_v34 = vld [vmem:[#allocation3 + $0xa38] sm:$0xff]  ;;  %v1682_v37 = vld [vmem:[#allocation3 + $0xa28] sm:$0xff] }
 0x111   : > { %4389 = vmatprep.subr.mxu0 %v688_v38  ;;  %1331 = vmatpush2.msra.mxu1 %v644_v40  ;;  %v1680_v40 = vld [vmem:[#allocation3 + $0xa18] sm:$0xff] }
 0x112   : > { %1503 = vmatprep.mubr.f32.mxu0 %v5466_v39  ;;  %4390 = vmatpush3.msra.mxu0 %v688_v38  ;;  %v1609_v38 = vld [vmem:[#allocation3 + $0x7e0] sm:$0xff] }
 0x113   : > { %1332 = vmatprep.subr.mxu1 %v642_v42  ;;  %1504 = vmatmul.mubr.f32.gmra.mxu0 %v5461_v62  ;;  %v1606_v42 = vld [vmem:[#allocation3 + $0x7c8] sm:$0xff] }
 0x114   : > { %4391 = vmatprep.subr.mxu0 %v685_v43  ;;  %1333 = vmatpush2.msra.mxu1 %v641_v44  ;;  %v1632_v44 = vld [vmem:[#allocation3 + $0x898] sm:$0xff] }
 0x115   : > { %4392 = vmatpush3.msra.mxu0 %v685_v43  ;;  %1334 = vmatprep.subr.mxu1 %v639_v45  ;;  %v1604_v43 = vld [vmem:[#allocation3 + $0x7b8] sm:$0xff]  ;;  %v1603_v45 = vld [vmem:[#allocation3 + $0x7b0] sm:$0xff] }
 0x116   : > { %4393 = vmatprep.subr.mxu0 %v682_v47  ;;  %1335 = vmatpush2.msra.mxu1 %v638_v51  ;;  %v1601_v51 = vld [vmem:[#allocation3 + $0x7a0] sm:$0xff] }
 0x117   : > { %4394 = vmatpush3.msra.mxu0 %v682_v47  ;;  %1336 = vmatprep.subr.mxu1 %v636_v31  ;;  %v1677_v47 = vld [vmem:[#allocation3 + $0xa00] sm:$0xff] }
 0x118   : > { %4395 = vmatprep.subr.mxu0 %v679_v12  ;;  %1337 = vmatpush2.msra.mxu1 %v635_v57  ;;  %v1629_v31 = vld [vmem:[#allocation3 + $0x880] sm:$0xff]  ;;  %v1674_v57 = vld [vmem:[#allocation3 + $0x9e8] sm:$0xff] }
 0x119   : > { %4396 = vmatpush3.msra.mxu0 %v679_v12  ;;  %1338 = vmatprep.subr.mxu1 %v633_v53  ;;  %v1600_v12 = vld [vmem:[#allocation3 + $0x798] sm:$0xff]  ;;  %v1598_v53 = vld [vmem:[#allocation3 + $0x788] sm:$0xff] }
 0x11a   : > { %4397 = vmatprep.subr.mxu0 %v676_v52  ;;  %1339 = vmatpush2.msra.mxu1 %v632_v1  ;;  %v1597_v1 = vld [vmem:[#allocation3 + $0x780] sm:$0xff] }
 0x11b   : > { %4398 = vmatpush3.msra.mxu0 %v676_v52  ;;  %4399 = vmatprep.mubr.msk.f32.mxu0 %vm892_vm8, %v5354_v29  ;;  %v1696_v29 = vld [vmem:[#allocation3 + $0xa98] sm:$0xf]  ;;  %v1626_v52 = vld [vmem:[#allocation3 + $0x868] sm:$0xff] }
 0x11c   : > { %1340 = vmatprep.subr.mxu1 %v630_v41  ;;  %4400 = vmatmul.mubr.msk.f32.vlgmr.msra.gmra.mxu0 %vm892_vm8, %v5453_v22  ;;  %v1621_v22 = vld [vmem:[#allocation3 + $0x840] sm:$0xff]  ;;  %v1671_v41 = vld [vmem:[#allocation3 + $0x9d0] sm:$0xff] }
 0x11d   : > { %1768 = vmatprep.subr.mxu0 %v1631_v58  ;;  %1341 = vmatpush2.msra.mxu1 %v629_v2  ;;  %v1595_v58 = vld [vmem:[#allocation3 + $0x770] sm:$0xff] }
 0x11e   : > { %1769 = vmatpush1.msra.mxu0 %v1630_v3  ;;  %1342 = vmatprep.subr.mxu1 %v627_v4  ;;  %v1623_v2 = vld [vmem:[#allocation3 + $0x850] sm:$0xff]  ;;  %v1594_v3 = vld [vmem:[#allocation3 + $0x768] sm:$0xff]  ;;  %v1668_v4 = vld [vmem:[#allocation3 + $0x9b8] sm:$0xff] }
 0x11f   : > { %1770 = vmatprep.subr.mxu0 %v1628_v7  ;;  %1343 = vmatpush2.msra.mxu1 %v626_v10  ;;  %v1592_v7 = vld [vmem:[#allocation3 + $0x758] sm:$0xff] }
 0x120   : > { %1344 = vmatprep.mubr.f32.mxu1 %v5378_v61  ;;  %1771 = vmatpush1.msra.mxu0 %v1627_v11  ;;  %v1618_v61 = vld [vmem:[#allocation3 + $0x828] sm:$0xff]  ;;  %v1620_v10 = vld [vmem:[#allocation3 + $0x838] sm:$0xff]  ;;  %v1591_v11 = vld [vmem:[#allocation3 + $0x750] sm:$0xff] }
 0x121   : > { %1345 = vmatmul.mubr.f32.vlgmr.msra.gmra.mxu1 %v5376_v60  ;;  %1772 = vmatprep.subr.mxu0 %v1625_v13  ;;  %v1616_v60 = vld [vmem:[#allocation3 + $0x818] sm:$0xff]  ;;  %v1665_v13 = vld [vmem:[#allocation3 + $0x9a0] sm:$0xff] }
 0x122   : > { %3983 = vmatprep.subr.msk.mxu1 %vm897_vm0, %v1697_v14  ;;  %1773 = vmatpush1.msra.mxu0 %v1624_v19  ;;  %v1589_v14 = vld [vmem:[#allocation3 + $0x740] sm:$0xff] }
 0x123   : > { %3984 = vmatpush1.msk.msra.mxu1 %vm897_vm0, %v1696_v29  ;;  %1774 = vmatprep.subr.mxu0 %v1622_v36  ;;  %v1617_v19 = vld [vmem:[#allocation3 + $0x820] sm:$0xff]  ;;  %v1588_v29 = vld [vmem:[#allocation3 + $0x738] sm:$0xff]  ;;  %v1662_v36 = vld [vmem:[#allocation3 + $0x988] sm:$0xff] }
 0x124   : > { %1867 = vmatprep.subr.mxu1 %v1694_v23  ;;  %1350 = vmatprep.mubr.f32.mxu1 %v5466_v39  ;;  %v1681_v39 = vld [vmem:[#allocation3 + $0xa20] sm:$0xff]  ;;  %v1586_v23 = vld [vmem:[#allocation3 + $0x728] sm:$0xff] }
 0x125   : > { %1775 = vmatpush1.msra.mxu0 %v1621_v22  ;;  %1868 = vmatpush1.msra.mxu1 %v1693_v25  ;;  %v1614_v22 = vld [vmem:[#allocation3 + $0x808] sm:$0xff]  ;;  %v1585_v25 = vld [vmem:[#allocation3 + $0x720] sm:$0xff] }
 0x126   : > { %1776 = vmatprep.subr.mxu0 %v1619_v26  ;;  %1351 = vmatmul.mubr.f32.gmra.mxu1 %v5461_v62  ;;  %v1607_v62 = vld [vmem:[#allocation3 + $0x7d0] sm:$0xff] }
 0x127   : > { %1869 = vmatprep.subr.mxu1 %v1691_v27  ;;  %1777 = vmatpush1.msra.mxu0 %v1618_v61  ;;  %v1659_v26 = vld [vmem:[#allocation3 + $0x970] sm:$0xff] }
 0x128   : > { %1870 = vmatpush1.msra.mxu1 %v1690_v6  ;;  %1778 = vmatprep.subr.mxu0 %v1616_v60  ;;  %v1679_v27 = vld [vmem:[#allocation3 + $0xa10] sm:$0xff]  ;;  %v1678_v6 = vld [vmem:[#allocation3 + $0xa08] sm:$0xff]  ;;  %v1656_v60 = vld [vmem:[#allocation3 + $0x958] sm:$0xff] }
 0x129   : > { %1871 = vmatprep.subr.mxu1 %v1688_v28  ;;  %1779 = vmatpush1.msra.mxu0 %v1615_v46  ;;  %v1611_v61 = vld [vmem:[#allocation3 + $0x7f0] sm:$0xff]  ;;  %v1676_v28 = vld [vmem:[#allocation3 + $0x9f8] sm:$0xff] }
 0x12a   : > { %1872 = vmatpush1.msra.mxu1 %v1687_v16  ;;  %1780 = vmatprep.subr.mxu0 %v1613_v24  ;;  %v1608_v46 = vld [vmem:[#allocation3 + $0x7d8] sm:$0xff]  ;;  %v1675_v16 = vld [vmem:[#allocation3 + $0x9f0] sm:$0xff]  ;;  %v1653_v24 = vld [vmem:[#allocation3 + $0x940] sm:$0xff] }
 0x12b   : > { %1873 = vmatprep.subr.mxu1 %v1685_v59  ;;  %1781 = vmatpush1.msra.mxu0 %v1612_v33  ;;  %v1673_v59 = vld [vmem:[#allocation3 + $0x9e0] sm:$0xff] }
 0x12c   : > { %1874 = vmatpush1.msra.mxu1 %v1684_v34  ;;  %1782 = vmatprep.subr.mxu0 %v1610_v35  ;;  %v1605_v33 = vld [vmem:[#allocation3 + $0x7c0] sm:$0xff]  ;;  %v1672_v34 = vld [vmem:[#allocation3 + $0x9d8] sm:$0xff]  ;;  %v1650_v35 = vld [vmem:[#allocation3 + $0x928] sm:$0xff] }
 0x12d   : > { %1875 = vmatprep.subr.mxu1 %v1682_v37  ;;  %1783 = vmatpush1.msra.mxu0 %v1609_v38  ;;  %v1670_v37 = vld [vmem:[#allocation3 + $0x9c8] sm:$0xff] }
 0x12e   : > { %1876 = vmatpush1.msra.mxu1 %v1681_v39  ;;  %1784 = vmatprep.subr.mxu0 %v1607_v62  ;;  %v1602_v38 = vld [vmem:[#allocation3 + $0x7a8] sm:$0xff]  ;;  %v1669_v39 = vld [vmem:[#allocation3 + $0x9c0] sm:$0xff]  ;;  %v1647_v62 = vld [vmem:[#allocation3 + $0x910] sm:$0xff] }
 0x12f   : > { %1909 = vmatprep.mubr.f32.mxu1 %v6143_v0  ;;  %4112 = vmatprep.subr.mxu1 %v1680_v40  ;;  %v1667_v40 = vld [vmem:[#allocation3 + $0x9b0] sm:$0xff] }
 0x130   : > { %1785 = vmatpush1.msra.mxu0 %v1606_v42  ;;  %3985 = vmatmul.mubr.msk.f32.vlgmr.msra.gmra.mxu1 %vm892_vm8, %v5382_v9  ;;  %v1599_v42 = vld [vmem:[#allocation3 + $0x790] sm:$0xff] }
 0x131   : > { %1786 = vmatprep.subr.mxu0 %v1604_v43  ;;  %4113 = vmatpush3.msra.mxu1 %v1632_v44  ;;  %v1666_v43 = vld [vmem:[#allocation3 + $0x9a8] sm:$0xff]  ;;  %v1644_v44 = vld [vmem:[#allocation3 + $0x8f8] sm:$0xff] }
 0x132   : > { %1787 = vmatpush1.msra.mxu0 %v1603_v45  ;;  %4114 = vmatprep.subr.mxu1 %v1677_v47  ;;  %v1664_v45 = vld [vmem:[#allocation3 + $0x998] sm:$0xff] }
 0x133   : > { %1788 = vmatprep.subr.mxu0 %v1601_v51  ;;  %4115 = vmatpush3.msra.mxu1 %v1629_v31  ;;  %v1596_v47 = vld [vmem:[#allocation3 + $0x778] sm:$0xff]  ;;  %v1663_v51 = vld [vmem:[#allocation3 + $0x990] sm:$0xff]  ;;  %v1641_v31 = vld [vmem:[#allocation3 + $0x8e0] sm:$0xff] }
 0x134   : > { %1789 = vmatpush1.msra.mxu0 %v1600_v12  ;;  %4116 = vmatprep.subr.mxu1 %v1674_v57  ;;  %v1661_v12 = vld [vmem:[#allocation3 + $0x980] sm:$0xff] }
 0x135   : > { %1790 = vmatprep.subr.mxu0 %v1598_v53  ;;  %4117 = vmatpush3.msra.mxu1 %v1626_v52  ;;  %v1593_v57 = vld [vmem:[#allocation3 + $0x760] sm:$0xff]  ;;  %v1638_v53 = vld [vmem:[#allocation3 + $0x8c8] sm:$0xff]  ;;  %v1660_v52 = vld [vmem:[#allocation3 + $0x978] sm:$0xff] }
 0x136   : > { %1791 = vmatpush1.msra.mxu0 %v1597_v1  ;;  %4118 = vmatprep.subr.mxu1 %v1671_v41  ;;  %v5488_v1 = vrot.slane %v5288_v55, %v5251_v30  ;;  %v1658_v41 = vld [vmem:[#allocation3 + $0x968] sm:$0xff] }
 0x137   : > { %1792 = vmatprep.subr.mxu0 %v1595_v58  ;;  %4119 = vmatpush3.msra.mxu1 %v1623_v2  ;;  %v1590_v58 = vld [vmem:[#allocation3 + $0x748] sm:$0xff]  ;;  %v1657_v2 = vld [vmem:[#allocation3 + $0x960] sm:$0xff] }
 0x138   : > { %1793 = vmatpush1.msra.mxu0 %v1594_v3  ;;  %4120 = vmatprep.subr.mxu1 %v1668_v4  ;;  %v1635_v3 = vld [vmem:[#allocation3 + $0x8b0] sm:$0xff] }
 0x139   : > { %1794 = vmatprep.subr.mxu0 %v1592_v7  ;;  %4121 = vmatpush3.msra.mxu1 %v1620_v10  ;;  %v1655_v4 = vld [vmem:[#allocation3 + $0x950] sm:$0xff]  ;;  %v1698_v10 = vld [vmem:[#allocation3 + $0xaa8] sm:$0xf] }
 0x13a   : > { %1795 = vmatpush1.msra.mxu0 %v1591_v11  ;;  %4122 = vmatprep.subr.mxu1 %v1665_v13  ;;  %v1587_v7 = vld [vmem:[#allocation3 + $0x730] sm:$0xff]  ;;  %v1654_v11 = vld [vmem:[#allocation3 + $0x948] sm:$0xff]  ;;  %v1652_v13 = vld [vmem:[#allocation3 + $0x938] sm:$0xff] }
 0x13b   : > { %1796 = vmatprep.subr.mxu0 %v1589_v14  ;;  %4123 = vmatpush3.msra.mxu1 %v1617_v19  ;;  %v1651_v14 = vld [vmem:[#allocation3 + $0x930] sm:$0xff]  ;;  %v5496_v19 = vrot.slane %v5285_v54, %v5251_v30 }
 0x13c   : > { %1797 = vmatpush1.msra.mxu0 %v1588_v29  ;;  %4124 = vmatprep.subr.mxu1 %v1662_v36  ;;  %v1695_v29 = vld [vmem:[#allocation3 + $0xa90] sm:$0xff]  ;;  %v1649_v36 = vld [vmem:[#allocation3 + $0x920] sm:$0xff] }
 0x13d   : > { %1798 = vmatprep.subr.mxu0 %v1586_v23  ;;  %4125 = vmatpush3.msra.mxu1 %v1614_v22  ;;  %v1648_v23 = vld [vmem:[#allocation3 + $0x918] sm:$0xff] }
 0x13e   : > { %1799 = vmatpush1.msra.mxu0 %v1585_v25  ;;  %4126 = vmatprep.subr.mxu1 %v1659_v26  ;;  %v4693_v22 = vld [vmem:[%s5248_s2 + $0x18] ss:$8 sps:$4 sm:$0x33]   ;;  %v1646_v26 = vld [vmem:[#allocation3 + $0x908] sm:$0xff] }
 0x13f   : > { %1800 = vmatprep.subr.mxu0 %v1679_v27  ;;  %4127 = vmatpush3.msra.mxu1 %v1611_v61  ;;  %v1692_v25 = vld [vmem:[#allocation3 + $0xa78] sm:$0xff]  ;;  %v1645_v27 = vld [vmem:[#allocation3 + $0x900] sm:$0xff]  ;;  %v5504_v61 = vcombine.high %v5496_v19, %v5496_v19 }
 0x140   : > { %1801 = vmatpush2.msra.mxu0 %v1678_v6  ;;  %4128 = vmatprep.subr.mxu1 %v1656_v60  ;;  %v1689_v6 = vld [vmem:[#allocation3 + $0xa60] sm:$0xff]  ;;  %v1643_v60 = vld [vmem:[#allocation3 + $0x8f0] sm:$0xff] }
 0x141   : > { %1802 = vmatprep.subr.mxu0 %v1676_v28  ;;  %4129 = vmatpush3.msra.mxu1 %v1608_v46  ;;  %v5507_v28 = vrot.slane %v4693_v22, %v5251_v30  ;;  %v1686_v46 = vld [vmem:[#allocation3 + $0xa48] sm:$0xff] }
 0x142   : > { %1803 = vmatpush2.msra.mxu0 %v1675_v16  ;;  %4130 = vmatprep.subr.mxu1 %v1653_v24  ;;  %v5510_v16 = vld.sshfl [vmem:[%s5248_s2 + $0x28] sm:$0x3 pattern:$0x76325410]  ;;  %v1642_v24 = vld [vmem:[#allocation3 + $0x8e8] sm:$0xff] }
 0x143   : > { %1804 = vmatprep.subr.mxu0 %v1673_v59  ;;  %4131 = vmatpush3.msra.mxu1 %v1605_v33  ;;  %v1640_v59 = vld [vmem:[#allocation3 + $0x8d8] sm:$0xff]  ;;  %v1683_v33 = vld [vmem:[#allocation3 + $0xa30] sm:$0xff]  ;;  %v2222_v22 = vld [vmem:[#allocation3 + $0xdc8] sm:$0xff] }
 0x144   : > { %1805 = vmatpush2.msra.mxu0 %v1672_v34  ;;  %4132 = vmatprep.subr.mxu1 %v1650_v35  ;;  %v1639_v34 = vld [vmem:[#allocation3 + $0x8d0] sm:$0xff]  ;;  %v2099_v35 = vcombine.low %v5507_v28, %v5510_v16 }
 0x145   : > { %1806 = vmatprep.subr.mxu0 %v1670_v37  ;;  %4133 = vmatpush3.msra.mxu1 %v1602_v38  ;;  %v1637_v37 = vld [vmem:[#allocation3 + $0x8c0] sm:$0xff] }
 0x146   : > { %1807 = vmatpush2.msra.mxu0 %v1669_v39  ;;  %4134 = vmatprep.subr.mxu1 %v1647_v62  ;;  %v2169_v38 = vld [vmem:[#allocation3 + $0xc20] sm:$0xff]  ;;  %v1636_v39 = vld [vmem:[#allocation3 + $0x8b8] sm:$0xff] }
 0x147   : > { %1808 = vmatprep.subr.mxu0 %v1667_v40  ;;  %4135 = vmatpush3.msra.mxu1 %v1599_v42  ;;  %v2168_v62 = vld [vmem:[#allocation3 + $0xc18] sm:$0xff]  ;;  %v1634_v40 = vld [vmem:[#allocation3 + $0x8a8] sm:$0xff] }
 0x148   : > { %1809 = vmatpush2.msra.mxu0 %v1666_v43  ;;  %4136 = vmatprep.subr.mxu1 %v1644_v44  ;;  %v2166_v42 = vld [vmem:[#allocation3 + $0xc08] sm:$0xff]  ;;  %v2116_v43 = vrot.slane %v5317_v5, 2  ;;  %v2117_v44 = vrot.slane %v2099_v35, 7  ;;  %v2167_v35 = vld [vmem:[#allocation3 + $0xc10] sm:$0xff] }
 0x149   : > { %1810 = vmatprep.subr.mxu0 %v1664_v45  ;;  %4137 = vmatpush3.msra.mxu1 %v1596_v47  ;;  %v1633_v45 = vld [vmem:[#allocation3 + $0x8a0] sm:$0xff] }
 0x14a   : > { %1811 = vmatpush2.msra.mxu0 %v1663_v51  ;;  %4138 = vmatprep.subr.mxu1 %v1641_v31  ;;  %v2165_v47 = vld [vmem:[#allocation3 + $0xc00] sm:$0xff]  ;;  %v2163_v51 = vld [vmem:[#allocation3 + $0xbf0] sm:$0xff]  ;;  %v5524_v5 = vsel %vm5311_vm7, %v2116_v43, %v2117_v44 }
 0x14b   : > { %1812 = vmatprep.subr.mxu0 %v1661_v12  ;;  %4139 = vmatpush3.msra.mxu1 %v1593_v57  ;;  %v2235_v31 = vld [vmem:[#allocation3 + $0xe30] sm:$0xf]  ;;  %v2234_v12 = vld [vmem:[#allocation3 + $0xe28] sm:$0xf]  ;;  %v2160_v57 = vld [vmem:[#allocation3 + $0xbd8] sm:$0xff] }
 0x14c   : > { %1915 = vmatprep.mubr.f32.mxu1 %v6143_v0  ;;  %4140 = vmatprep.subr.mxu1 %v1638_v53  ;;  %v2232_v53 = vld [vmem:[#allocation3 + $0xe18] sm:$0xff]  ;;  %v2209_v43 = vld [vmem:[#allocation3 + $0xd60] sm:$0xff]  ;;  %v2135_v44 = vld [vmem:[#allocation3 + $0xb10] sm:$0xff] }
 0x14d   : > { %1813 = vmatpush2.msra.mxu0 %v1660_v52  ;;  %3986 = vmatmul.mubr.msk.f32.gmra.mxu1 %vm892_vm8, %v5488_v1  ;;  %v2159_v52 = vld [vmem:[#allocation3 + $0xbd0] sm:$0xff] }
 0x14e   : > { %1814 = vmatprep.subr.mxu0 %v1658_v41  ;;  %4141 = vmatpush3.msra.mxu1 %v1590_v58  ;;  %v2238_v41 = vcombine.high %v5340_v20, %v5345_v21  ;;  %v2240_v58 = vcombine.high %v5524_v5, %v5389_v8  ;;  %v2247_v21 = vrot.slane %v2237_v63, %v5251_v30  ;;  %v2659_v63 = vld [vmem:[#allocation3 + $0xf90] sm:$0xff] }
 0x14f   : > { %1815 = vmatpush2.msra.mxu0 %v1657_v2  ;;  %4142 = vmatprep.subr.mxu1 %v1635_v3  ;;  %v2156_v2 = vld [vmem:[#allocation3 + $0xbb8] sm:$0xff] }
 0x150   : > { %1816 = vmatprep.subr.mxu0 %v1655_v4  ;;  %4143 = vmatpush3.msra.mxu1 %v1587_v7  ;;  %v2228_v3 = vld [vmem:[#allocation3 + $0xdf8] sm:$0xff]  ;;  %v2154_v4 = vld [vmem:[#allocation3 + $0xba8] sm:$0xff] }
 0x151   : > { %1986 = vmatprep.mubr.f32.mxu1 %v5430_v18  ;;  %4402 = vmatprep.subr.msk.mxu1 %vm897_vm0, %v1698_v10  ;;  %v2226_v7 = vld [vmem:[#allocation3 + $0xde8] sm:$0xff] }
 0x152   : > { %1817 = vmatpush2.msra.mxu0 %v1654_v11  ;;  %1987 = vmatmul.mubr.f32.vlgmr.msra.gmra.mxu1 %v5434_v48  ;;  %v2225_v11 = vld [vmem:[#allocation3 + $0xde0] sm:$0xff] }
 0x153   : > { %1818 = vmatprep.subr.mxu0 %v1652_v13  ;;  %4403 = vmatpush3.msk.msra.mxu1 %vm897_vm0, %v1698_v10  ;;  %v2153_v10 = vld [vmem:[#allocation3 + $0xba0] sm:$0xff]  ;;  %v2151_v13 = vld [vmem:[#allocation3 + $0xb90] sm:$0xff] }
 0x154   : > { %1819 = vmatpush2.msra.mxu0 %v1651_v14  ;;  %4404 = vmatprep.subr.mxu1 %v1695_v29  ;;  %v2223_v14 = vld [vmem:[#allocation3 + $0xdd0] sm:$0xff] }
 0x155   : > { %1820 = vmatprep.subr.mxu0 %v1649_v36  ;;  %4405 = vmatpush3.msra.mxu1 %v1695_v29  ;;  %v2254_v29 = vrot.slane %v2238_v41, %v5251_v30  ;;  %v2268_v36 = vrot.slane %v2240_v58, %v5251_v30  ;;  %v2127_v41 = vld [vmem:[#allocation3 + $0xad0] sm:$0xff]  ;;  %v2200_v58 = vld [vmem:[#allocation3 + $0xd18] sm:$0xff] }
 0x156   : > { %1821 = vmatpush2.msra.mxu0 %v1648_v23  ;;  %4406 = vmatprep.subr.mxu1 %v1692_v25  ;;  %v2150_v23 = vld [vmem:[#allocation3 + $0xb88] sm:$0xff] }
 0x157   : > { %1822 = vmatprep.subr.mxu0 %v1646_v26  ;;  %4407 = vmatpush3.msra.mxu1 %v1692_v25  ;;  %v2148_v25 = vld [vmem:[#allocation3 + $0xb78] sm:$0xff] }
 0x158   : > { %1823 = vmatpush2.msra.mxu0 %v1645_v27  ;;  %4408 = vmatprep.subr.mxu1 %v1689_v6  ;;  %v2220_v26 = vld [vmem:[#allocation3 + $0xdb8] sm:$0xff]  ;;  %v2219_v27 = vld [vmem:[#allocation3 + $0xdb0] sm:$0xff] }
 0x159   : > { %1991 = vmatprep.mubr.f32.mxu1 %v5504_v61  ;;  %4409 = vmatpush3.msra.mxu1 %v1689_v6  ;;  %v5537_v6 = vcombine.low %v2254_v29, %v2268_v36  ;;  %v2119_v29 = vrot.slane %v719_v15, 2 }
 0x15a   : > { %1824 = vmatprep.subr.mxu0 %v1643_v60  ;;  %1992 = vmatmul.mubr.f32.gmra.mxu1 %v5496_v19  ;;  %v2218_v60 = vld [vmem:[#allocation3 + $0xda8] sm:$0xff] }
 0x15b   : > { %4410 = vmatprep.subr.mxu1 %v1686_v46  ;;  %1825 = vmatpush2.msra.mxu0 %v1642_v24  ;;  %v2170_v24 = vld [vmem:[#allocation3 + $0xc28] sm:$0xff] }
 0x15c   : > { %4411 = vmatpush3.msra.mxu1 %v1686_v46  ;;  %1826 = vmatprep.subr.mxu0 %v1640_v59  ;;  %v2144_v46 = vld [vmem:[#allocation3 + $0xb58] sm:$0xff]  ;;  %v2142_v59 = vld [vmem:[#allocation3 + $0xb48] sm:$0xff] }
 0x15d   : > { %4412 = vmatprep.subr.mxu1 %v1683_v33  ;;  %1827 = vmatpush2.msra.mxu0 %v1639_v34  ;;  %v2141_v34 = vld [vmem:[#allocation3 + $0xb40] sm:$0xff] }
 0x15e   : > { %4413 = vmatpush3.msra.mxu1 %v1683_v33  ;;  %4414 = vmatprep.mubr.msk.f32.mxu1 %vm892_vm8, %v5382_v9  ;;  %v2162_v9 = vld [vmem:[#allocation3 + $0xbe8] sm:$0xff]  ;;  %v2215_v33 = vld [vmem:[#allocation3 + $0xd90] sm:$0xff] }
 0x15f   : > { %1828 = vmatprep.subr.mxu0 %v1637_v37  ;;  %4415 = vmatmul.mubr.msk.f32.vlgmr.msra.gmra.mxu1 %vm892_vm8, %v5488_v1  ;;  %v2231_v1 = vld [vmem:[#allocation3 + $0xe10] sm:$0xff] }
 0x160   : > { %2306 = vmatprep.subr.mxu1 %v2169_v38  ;;  %1829 = vmatpush2.msra.mxu0 %v1636_v39  ;;  %v2139_v37 = vld [vmem:[#allocation3 + $0xb30] sm:$0xff]  ;;  %v2212_v38 = vld [vmem:[#allocation3 + $0xd78] sm:$0xff]  ;;  %v4694_v39 = vld [vmem:[%s5248_s2 + $0x48] ss:$8 sps:$4 sm:$0x33]  }
 0x161   : > { %2307 = vmatpush1.msra.mxu1 %v2168_v62  ;;  %1830 = vmatprep.subr.mxu0 %v1634_v40  ;;  %v2138_v62 = vld [vmem:[#allocation3 + $0xb28] sm:$0xff]  ;;  %v2164_v40 = vld [vmem:[#allocation3 + $0xbf8] sm:$0xff] }
 0x162   : > { %2308 = vmatprep.subr.mxu1 %v2166_v42  ;;  %1831 = vmatpush2.msra.mxu0 %v1633_v45  ;;  %v2136_v42 = vld [vmem:[#allocation3 + $0xb18] sm:$0xff]  ;;  %v2161_v45 = vld [vmem:[#allocation3 + $0xbe0] sm:$0xff] }
 0x163   : > { %1832 = vmatprep.mubr.f32.mxu0 %v5430_v18  ;;  %2309 = vmatpush1.msra.mxu1 %v2165_v47  ;;  %v2157_v18 = vld [vmem:[#allocation3 + $0xbc0] sm:$0xff] }
 0x164   : > { %1833 = vmatmul.mubr.f32.vlgmr.msra.gmra.mxu0 %v5434_v48  ;;  %2310 = vmatprep.subr.mxu1 %v2163_v51  ;;  %v2229_v48 = vld [vmem:[#allocation3 + $0xe00] sm:$0xff]  ;;  %v2206_v51 = vld [vmem:[#allocation3 + $0xd48] sm:$0xff] }
 0x165   : > { %3992 = vmatprep.subr.msk.mxu0 %vm897_vm0, %v2235_v31  ;;  %2311 = vmatpush1.msra.mxu1 %v2162_v9  ;;  %v2133_v47 = vld [vmem:[#allocation3 + $0xb00] sm:$0xff]  ;;  %v5544_v31 = vrot.slane %v4694_v39, %v5251_v30  ;;  %v2132_v9 = vld [vmem:[#allocation3 + $0xaf8] sm:$0xff] }
 0x166   : > { %3993 = vmatpush1.msk.msra.mxu0 %vm897_vm0, %v2234_v12  ;;  %2312 = vmatprep.subr.mxu1 %v2160_v57  ;;  %v2158_v12 = vld [vmem:[#allocation3 + $0xbc8] sm:$0xff]  ;;  %v3991_v57 = vld.sshfl [vmem:[%s5248_s2 + $0x58] sm:$0x3 pattern:$0x76325410]  ;;  %v2205_v39 = vld [vmem:[#allocation3 + $0xd40] sm:$0xff] }
 0x167   : > { %2405 = vmatprep.subr.mxu0 %v2232_v53  ;;  %1838 = vmatprep.mubr.f32.mxu0 %v5504_v61  ;;  %v2145_v61 = vld [vmem:[#allocation3 + $0xb60] sm:$0xff]  ;;  %v2130_v53 = vld [vmem:[#allocation3 + $0xae8] sm:$0xff] }
 0x168   : > { %2313 = vmatpush1.msra.mxu1 %v2159_v52  ;;  %2406 = vmatpush1.msra.mxu0 %v2231_v1  ;;  %v2203_v52 = vld [vmem:[#allocation3 + $0xd30] sm:$0xff]  ;;  %v2129_v1 = vld [vmem:[#allocation3 + $0xae0] sm:$0xff] }
 0x169   : > { %2314 = vmatprep.subr.mxu1 %v2157_v18  ;;  %1839 = vmatmul.mubr.f32.gmra.mxu0 %v5496_v19  ;;  %v2147_v19 = vld [vmem:[#allocation3 + $0xb70] sm:$0xff] }
 0x16a   : > { %2407 = vmatprep.subr.mxu0 %v2229_v48  ;;  %2315 = vmatpush1.msra.mxu1 %v2156_v2  ;;  %v2155_v18 = vld [vmem:[#allocation3 + $0xbb0] sm:$0xff]  ;;  %v5548_v48 = vcombine.low %v5544_v31, %v3991_v57  ;;  %v2126_v2 = vld [vmem:[#allocation3 + $0xac8] sm:$0xff]  ;;  %v2128_v57 = vld [vmem:[#allocation3 + $0xad8] sm:$0xff] }
 0x16b   : > { %2408 = vmatpush1.msra.mxu0 %v2228_v3  ;;  %2316 = vmatprep.subr.mxu1 %v2154_v4  ;;  %v2152_v3 = vld [vmem:[#allocation3 + $0xb98] sm:$0xff] }
 0x16c   : > { %2409 = vmatprep.subr.mxu0 %v2226_v7  ;;  %2317 = vmatpush1.msra.mxu1 %v2153_v10  ;;  %v2124_v4 = vld [vmem:[#allocation3 + $0xab8] sm:$0xff]  ;;  %v2197_v7 = vld [vmem:[#allocation3 + $0xd00] sm:$0xff]  ;;  %v2123_v10 = vld [vmem:[#allocation3 + $0xab0] sm:$0xff]  ;;  %v2120_v36 = vrot.slane %v5548_v48, 7 }
 0x16d   : > { %2410 = vmatpush1.msra.mxu0 %v2225_v11  ;;  %2318 = vmatprep.subr.mxu1 %v2151_v13  ;;  %v2149_v11 = vld [vmem:[#allocation3 + $0xb80] sm:$0xff] }
 0x16e   : > { %2411 = vmatprep.subr.mxu0 %v2223_v14  ;;  %2319 = vmatpush1.msra.mxu1 %v2150_v23  ;;  %v2217_v13 = vld [vmem:[#allocation3 + $0xda0] sm:$0xff]  ;;  %v2194_v14 = vld [vmem:[#allocation3 + $0xce8] sm:$0xff]  ;;  %v2216_v23 = vld [vmem:[#allocation3 + $0xd98] sm:$0xff]  ;;  %v5555_v15 = vsel %vm5311_vm7, %v2119_v29, %v2120_v36 }
 0x16f   : > { %2412 = vmatpush1.msra.mxu0 %v2222_v22  ;;  %2320 = vmatprep.subr.mxu1 %v2148_v25  ;;  %v2146_v22 = vld [vmem:[#allocation3 + $0xb68] sm:$0xff] }
 0x170   : > { %2413 = vmatprep.subr.mxu0 %v2220_v26  ;;  %2321 = vmatpush1.msra.mxu1 %v2147_v19  ;;  %v2214_v25 = vld [vmem:[#allocation3 + $0xd88] sm:$0xff]  ;;  %v2191_v26 = vld [vmem:[#allocation3 + $0xcd0] sm:$0xff]  ;;  %v2213_v19 = vld [vmem:[#allocation3 + $0xd80] sm:$0xff] }
 0x171   : > { %2414 = vmatpush1.msra.mxu0 %v2219_v27  ;;  %2447 = vmatprep.mubr.f32.mxu0 %v6143_v0  ;;  %v2143_v27 = vld [vmem:[#allocation3 + $0xb50] sm:$0xff]  ;;  %v2186_v29 = vld [vmem:[#allocation3 + $0xca8] sm:$0xff] }
 0x172   : > { %2322 = vmatprep.subr.mxu1 %v2145_v61  ;;  %3994 = vmatmul.mubr.msk.f32.vlgmr.msra.gmra.mxu0 %vm892_vm8, %v5537_v6  ;;  %v2211_v61 = vld [vmem:[#allocation3 + $0xd70] sm:$0xff] }
 0x173   : > { %4158 = vmatprep.subr.mxu0 %v2218_v60  ;;  %2323 = vmatpush1.msra.mxu1 %v2144_v46  ;;  %v2188_v60 = vld [vmem:[#allocation3 + $0xcb8] sm:$0xff]  ;;  %v2210_v46 = vld [vmem:[#allocation3 + $0xd68] sm:$0xff] }
 0x174   : > { %4159 = vmatpush3.msra.mxu0 %v2170_v24  ;;  %2324 = vmatprep.subr.mxu1 %v2142_v59  ;;  %v2140_v24 = vld [vmem:[#allocation3 + $0xb38] sm:$0xff] }
 0x175   : > { %4160 = vmatprep.subr.mxu0 %v2215_v33  ;;  %2325 = vmatpush1.msra.mxu1 %v2141_v34  ;;  %v2208_v59 = vld [vmem:[#allocation3 + $0xd58] sm:$0xff]  ;;  %v2185_v33 = vld [vmem:[#allocation3 + $0xca0] sm:$0xff]  ;;  %v2207_v34 = vld [vmem:[#allocation3 + $0xd50] sm:$0xff] }
 0x176   : > { %4161 = vmatpush3.msra.mxu0 %v2167_v35  ;;  %2326 = vmatprep.subr.mxu1 %v2139_v37  ;;  %v2137_v35 = vld [vmem:[#allocation3 + $0xb20] sm:$0xff]  ;;  %v2273_v37 = vcombine.high %v5395_v32, %v5555_v15 }
 0x177   : > { %4162 = vmatprep.subr.mxu0 %v2212_v38  ;;  %2327 = vmatpush1.msra.mxu1 %v2138_v62  ;;  %v2239_v38 = vcombine.low %v5524_v5, %v5389_v8  ;;  %v2182_v62 = vld [vmem:[#allocation3 + $0xc88] sm:$0xff]  ;;  %v2199_v5 = vld [vmem:[#allocation3 + $0xd10] sm:$0xff] }
 0x178   : > { %4163 = vmatpush3.msra.mxu0 %v2164_v40  ;;  %2328 = vmatprep.subr.mxu1 %v2136_v42  ;;  %v2204_v40 = vld [vmem:[#allocation3 + $0xd38] sm:$0xff]  ;;  %v2134_v42 = vld [vmem:[#allocation3 + $0xb08] sm:$0xff]  ;;  %v5564_v20 = vrot.slane %v2273_v37, %v5251_v30  ;;  %v2171_v37 = vld [vmem:[#allocation3 + $0xc30] sm:$0xff] }
 0x179   : > { %4164 = vmatprep.subr.mxu0 %v2209_v43  ;;  %2329 = vmatpush1.msra.mxu1 %v2135_v44  ;;  %v2202_v43 = vld [vmem:[#allocation3 + $0xd28] sm:$0xff]  ;;  %v2179_v44 = vld [vmem:[#allocation3 + $0xc70] sm:$0xff]  ;;  %v2261_v8 = vrot.slane %v2239_v38, %v5251_v30  ;;  %v2657_v38 = vld [vmem:[#allocation3 + $0xf80] sm:$0xff] }
 0x17a   : > { %4165 = vmatpush3.msra.mxu0 %v2161_v45  ;;  %2330 = vmatprep.subr.mxu1 %v2133_v47  ;;  %v2201_v45 = vld [vmem:[#allocation3 + $0xd20] sm:$0xff]  ;;  %v2131_v47 = vld [vmem:[#allocation3 + $0xaf0] sm:$0xff] }
 0x17b   : > { %4166 = vmatprep.subr.mxu0 %v2206_v51  ;;  %2331 = vmatpush1.msra.mxu1 %v2132_v9  ;;  %v2198_v51 = vld [vmem:[#allocation3 + $0xd08] sm:$0xff]  ;;  %v2176_v9 = vld [vmem:[#allocation3 + $0xc58] sm:$0xff] }
 0x17c   : > { %4167 = vmatpush3.msra.mxu0 %v2158_v12  ;;  %2332 = vmatprep.subr.mxu1 %v2130_v53  ;;  %v2196_v12 = vld [vmem:[#allocation3 + $0xcf8] sm:$0xff]  ;;  %v2195_v53 = vld [vmem:[#allocation3 + $0xcf0] sm:$0xff] }
 0x17d   : > { %4168 = vmatprep.subr.mxu0 %v2203_v52  ;;  %2333 = vmatpush1.msra.mxu1 %v2129_v1  ;;  %v5571_v52 = vcombine.high %v2247_v21, %v2261_v8  ;;  %v2272_v1 = vcombine.low %v5395_v32, %v5555_v15  ;;  %v2190_v32 = vld [vmem:[#allocation3 + $0xcc8] sm:$0xff]  ;;  %v2221_v15 = vld [vmem:[#allocation3 + $0xdc0] sm:$0xff] }
 0x17e   : > { %4169 = vmatpush3.msra.mxu0 %v2155_v18  ;;  %2334 = vmatprep.subr.mxu1 %v2127_v41  ;;  %v2173_v18 = vld [vmem:[#allocation3 + $0xc40] sm:$0xff] }
 0x17f   : > { %4170 = vmatprep.subr.mxu0 %v2200_v58  ;;  %2335 = vmatpush1.msra.mxu1 %v2126_v2  ;;  %v2125_v41 = vld [vmem:[#allocation3 + $0xac0] sm:$0xff]  ;;  %v5575_v58 = vcombine.low %v2247_v21, %v2261_v8  ;;  %v2650_v21 = vld [vmem:[#allocation3 + $0xf48] sm:$0xff] }
 0x180   : > { %4171 = vmatpush3.msra.mxu0 %v2152_v3  ;;  %2336 = vmatprep.subr.mxu1 %v2124_v4  ;;  %v2193_v2 = vld [vmem:[#allocation3 + $0xce0] sm:$0xff]  ;;  %v2236_v3 = vld [vmem:[#allocation3 + $0xe38] sm:$0xf]  ;;  %v2722_v8 = vld [vmem:[#allocation3 + $0x1188] sm:$0xff] }
 0x181   : > { %4172 = vmatprep.subr.mxu0 %v2197_v7  ;;  %2337 = vmatpush1.msra.mxu1 %v2123_v10  ;;  %v2192_v4 = vld [vmem:[#allocation3 + $0xcd8] sm:$0xff]  ;;  %v5579_v7 = vrot.slane %v2272_v1, %v5251_v30  ;;  %v2233_v10 = vld [vmem:[#allocation3 + $0xe20] sm:$0xff] }
 0x182   : > { %4173 = vmatpush3.msra.mxu0 %v2149_v11  ;;  %2338 = vmatprep.subr.mxu1 %v2217_v13  ;;  %v2189_v11 = vld [vmem:[#allocation3 + $0xcc0] sm:$0xff]  ;;  %v2187_v13 = vld [vmem:[#allocation3 + $0xcb0] sm:$0xff]  ;;  %v2716_v1 = vld [vmem:[#allocation3 + $0x1158] sm:$0xff] }
 0x183   : > { %4174 = vmatprep.subr.mxu0 %v2194_v14  ;;  %2339 = vmatpush2.msra.mxu1 %v2216_v23  ;;  %v2230_v14 = vld [vmem:[#allocation3 + $0xe08] sm:$0xff]  ;;  %v5586_v36 = vcombine.high %v5579_v7, %v5579_v7  ;;  %v2184_v23 = vld [vmem:[#allocation3 + $0xc98] sm:$0xff] }
 0x184   : > { %4175 = vmatpush3.msra.mxu0 %v2146_v22  ;;  %2340 = vmatprep.subr.mxu1 %v2214_v25  ;;  %v2227_v22 = vld [vmem:[#allocation3 + $0xdf0] sm:$0xff] }
 0x185   : > { %4176 = vmatprep.subr.mxu0 %v2191_v26  ;;  %2341 = vmatpush2.msra.mxu1 %v2213_v19  ;;  %v2183_v25 = vld [vmem:[#allocation3 + $0xc90] sm:$0xff]  ;;  %v2181_v26 = vld [vmem:[#allocation3 + $0xc80] sm:$0xff]  ;;  %v2180_v19 = vld [vmem:[#allocation3 + $0xc78] sm:$0xff] }
 0x186   : > { %4177 = vmatpush3.msra.mxu0 %v2143_v27  ;;  %2342 = vmatprep.subr.mxu1 %v2211_v61  ;;  %v2224_v27 = vld [vmem:[#allocation3 + $0xdd8] sm:$0xff]  ;;  %v2178_v61 = vld [vmem:[#allocation3 + $0xc68] sm:$0xff] }
 0x187   : > { %4178 = vmatprep.subr.mxu0 %v2188_v60  ;;  %2343 = vmatpush2.msra.mxu1 %v2210_v46  ;;  %v2177_v60 = vld [vmem:[#allocation3 + $0xc60] sm:$0xff]  ;;  %v2175_v46 = vld [vmem:[#allocation3 + $0xc50] sm:$0xff] }
 0x188   : > { %4179 = vmatpush3.msra.mxu0 %v2140_v24  ;;  %2344 = vmatprep.subr.mxu1 %v2208_v59  ;;  %v2663_v24 = vld [vmem:[#allocation3 + $0xfb0] sm:$0xff]  ;;  %v2174_v59 = vld [vmem:[#allocation3 + $0xc48] sm:$0xff] }
 0x189   : > { %4180 = vmatprep.subr.mxu0 %v2185_v33  ;;  %2345 = vmatpush2.msra.mxu1 %v2207_v34  ;;  %v2662_v33 = vld [vmem:[#allocation3 + $0xfa8] sm:$0xff]  ;;  %v2172_v34 = vld [vmem:[#allocation3 + $0xc38] sm:$0xff] }
 0x18a   : > { %4181 = vmatpush3.msra.mxu0 %v2137_v35  ;;  %2346 = vmatprep.subr.mxu1 %v2205_v39  ;;  %v2660_v35 = vld [vmem:[#allocation3 + $0xf98] sm:$0xff]  ;;  %v2729_v39 = vld [vmem:[#allocation3 + $0x11c0] sm:$0xf] }
 0x18b   : > { %4182 = vmatprep.subr.mxu0 %v2182_v62  ;;  %2347 = vmatpush2.msra.mxu1 %v2204_v40  ;;  %v2728_v62 = vld [vmem:[#allocation3 + $0x11b8] sm:$0xf]  ;;  %v2654_v40 = vld [vmem:[#allocation3 + $0xf68] sm:$0xff] }
 0x18c   : > { %4183 = vmatpush3.msra.mxu0 %v2134_v42  ;;  %2348 = vmatprep.subr.mxu1 %v2202_v43  ;;  %v2726_v42 = vld [vmem:[#allocation3 + $0x11a8] sm:$0xff]  ;;  %v2653_v43 = vld [vmem:[#allocation3 + $0xf60] sm:$0xff] }
 0x18d   : > { %2453 = vmatprep.mubr.f32.mxu0 %v6143_v0  ;;  %4184 = vmatprep.subr.mxu0 %v2179_v44  ;;  %v2725_v44 = vld [vmem:[#allocation3 + $0x11a0] sm:$0xff] }
 0x18e   : > { %2349 = vmatpush2.msra.mxu1 %v2201_v45  ;;  %3995 = vmatmul.mubr.msk.f32.gmra.mxu0 %vm892_vm8, %v5564_v20  ;;  %v2651_v45 = vld [vmem:[#allocation3 + $0xf50] sm:$0xff] }
 0x18f   : > { %2350 = vmatprep.subr.mxu1 %v2199_v5  ;;  %4185 = vmatpush3.msra.mxu0 %v2131_v47  ;;  %v4000_v5 = vcombine.low %v5510_v16, %v5288_v55  ;;  %v2648_v47 = vld [vmem:[#allocation3 + $0xf38] sm:$0xff]  ;;  %v2748_v16 = vrot.slane %v5272_v50, %v5251_v30 }
 0x190   : > { %2351 = vmatpush2.msra.mxu1 %v2198_v51  ;;  %4186 = vmatprep.subr.mxu0 %v2176_v9  ;;  %v2720_v51 = vld [vmem:[#allocation3 + $0x1178] sm:$0xff]  ;;  %v2647_v9 = vld [vmem:[#allocation3 + $0xf30] sm:$0xff] }
 0x191   : > { %2352 = vmatprep.subr.mxu1 %v2196_v12  ;;  %4187 = vmatpush3.msra.mxu0 %v2128_v57  ;;  %v2719_v12 = vld [vmem:[#allocation3 + $0x1170] sm:$0xff]  ;;  %v2645_v57 = vld [vmem:[#allocation3 + $0xf20] sm:$0xff]  ;;  %v2636_v50 = vld [vmem:[#allocation3 + $0xed8] sm:$0xff] }
 0x192   : > { %2353 = vmatpush2.msra.mxu1 %v2195_v53  ;;  %4188 = vmatprep.subr.mxu0 %v2173_v18  ;;  %v2717_v53 = vld [vmem:[#allocation3 + $0x1160] sm:$0xff]  ;;  %v2762_v18 = vrot.slane %v4000_v5, %v5251_v30 }
 0x193   : > { %2524 = vmatprep.mubr.f32.mxu0 %v5571_v52  ;;  %4189 = vmatpush3.msra.mxu0 %v2125_v41  ;;  %v2642_v41 = vld [vmem:[#allocation3 + $0xf08] sm:$0xff]  ;;  %v2685_v5 = vld [vmem:[#allocation3 + $0x1060] sm:$0xff] }
 0x194   : > { %2354 = vmatprep.subr.mxu1 %v2193_v2  ;;  %2525 = vmatmul.mubr.f32.vlgmr.msra.gmra.mxu0 %v5575_v58  ;;  %v2641_v2 = vld [vmem:[#allocation3 + $0xf00] sm:$0xff] }
 0x195   : > { %4417 = vmatprep.subr.msk.mxu0 %vm897_vm0, %v2236_v3  ;;  %2355 = vmatpush2.msra.mxu1 %v2192_v4  ;;  %v2639_v4 = vld [vmem:[#allocation3 + $0xef0] sm:$0xff] }
 0x196   : > { %4418 = vmatpush3.msk.msra.mxu0 %vm897_vm0, %v2236_v3  ;;  %2356 = vmatprep.subr.mxu1 %v2190_v32  ;;  %v2713_v3 = vld [vmem:[#allocation3 + $0x1140] sm:$0xff]  ;;  %v2638_v32 = vld [vmem:[#allocation3 + $0xee8] sm:$0xff] }
 0x197   : > { %4419 = vmatprep.subr.mxu0 %v2233_v10  ;;  %2357 = vmatpush2.msra.mxu1 %v2189_v11  ;;  %v2664_v11 = vld [vmem:[#allocation3 + $0xfb8] sm:$0xff] }
 0x198   : > { %4420 = vmatpush3.msra.mxu0 %v2233_v10  ;;  %2358 = vmatprep.subr.mxu1 %v2187_v13  ;;  %v5605_v10 = vcombine.low %v2748_v16, %v2762_v18  ;;  %v2635_v13 = vld [vmem:[#allocation3 + $0xed0] sm:$0xff] }
 0x199   : > { %4421 = vmatprep.subr.mxu0 %v2230_v14  ;;  %2359 = vmatpush2.msra.mxu1 %v2186_v29  ;;  %v2633_v29 = vld [vmem:[#allocation3 + $0xec0] sm:$0xff]  ;;  %v2699_v16 = vld [vmem:[#allocation3 + $0x10d0] sm:$0xff] }
 0x19a   : > { %4422 = vmatpush3.msra.mxu0 %v2230_v14  ;;  %2360 = vmatprep.subr.mxu1 %v2184_v23  ;;  %v2709_v14 = vld [vmem:[#allocation3 + $0x1120] sm:$0xff]  ;;  %v2632_v23 = vld [vmem:[#allocation3 + $0xeb8] sm:$0xff]  ;;  %v2631_v18 = vld [vmem:[#allocation3 + $0xeb0] sm:$0xff] }
 0x19b   : > { %2529 = vmatprep.mubr.f32.mxu0 %v5586_v36  ;;  %4423 = vmatprep.subr.mxu0 %v2227_v22 }
 0x19c   : > { %2361 = vmatpush2.msra.mxu1 %v2183_v25  ;;  %2530 = vmatmul.mubr.f32.gmra.mxu0 %v5579_v7  ;;  %v2630_v25 = vld [vmem:[#allocation3 + $0xea8] sm:$0xff] }
 0x19d   : > { %2362 = vmatprep.subr.mxu1 %v2181_v26  ;;  %4424 = vmatpush3.msra.mxu0 %v2227_v22  ;;  %v2706_v22 = vld [vmem:[#allocation3 + $0x1108] sm:$0xff] }
 0x19e   : > { %2363 = vmatpush2.msra.mxu1 %v2180_v19  ;;  %4425 = vmatprep.subr.mxu0 %v2224_v27  ;;  %v2658_v26 = vld [vmem:[#allocation3 + $0xf88] sm:$0xff]  ;;  %v2629_v19 = vld [vmem:[#allocation3 + $0xea0] sm:$0xff] }
 0x19f   : > { %2364 = vmatprep.subr.mxu1 %v2178_v61  ;;  %4426 = vmatpush3.msra.mxu0 %v2224_v27  ;;  %v2703_v27 = vld [vmem:[#allocation3 + $0x10f0] sm:$0xff] }
 0x1a0   : > { %2365 = vmatpush2.msra.mxu1 %v2177_v60  ;;  %4427 = vmatprep.subr.mxu0 %v2221_v15  ;;  %v2627_v61 = vld [vmem:[#allocation3 + $0xe90] sm:$0xff] }
 0x1a1   : > { %4429 = vmatprep.mubr.msk.f32.mxu0 %vm892_vm8, %v5537_v6  ;;  %4428 = vmatpush3.msra.mxu0 %v2221_v15  ;;  %v2656_v6 = vld [vmem:[#allocation3 + $0xf78] sm:$0xff]  ;;  %v2655_v60 = vld [vmem:[#allocation3 + $0xf70] sm:$0xff]  ;;  %v2626_v15 = vld [vmem:[#allocation3 + $0xe88] sm:$0xff] }
 0x1a2   : > { %2366 = vmatprep.subr.mxu1 %v2175_v46  ;;  %4430 = vmatmul.mubr.msk.f32.vlgmr.msra.gmra.mxu0 %vm892_vm8, %v5564_v20  ;;  %v2723_v20 = vld [vmem:[#allocation3 + $0x1190] sm:$0xff]  ;;  %v2700_v46 = vld [vmem:[#allocation3 + $0x10d8] sm:$0xff] }
 0x1a3   : > { %2800 = vmatprep.subr.mxu0 %v2663_v24  ;;  %2367 = vmatpush2.msra.mxu1 %v2174_v59  ;;  %v2624_v24 = vld [vmem:[#allocation3 + $0xe78] sm:$0xff] }
 0x1a4   : > { %2801 = vmatpush1.msra.mxu0 %v2662_v33  ;;  %2368 = vmatprep.subr.mxu1 %v2172_v34  ;;  %v2652_v59 = vld [vmem:[#allocation3 + $0xf58] sm:$0xff]  ;;  %v2623_v33 = vld [vmem:[#allocation3 + $0xe70] sm:$0xff]  ;;  %v2697_v34 = vld [vmem:[#allocation3 + $0x10c0] sm:$0xff] }
 0x1a5   : > { %2802 = vmatprep.subr.mxu0 %v2660_v35  ;;  %2369 = vmatpush2.msra.mxu1 %v2171_v37  ;;  %v2621_v35 = vld [vmem:[#allocation3 + $0xe60] sm:$0xff] }
 0x1a6   : > { %2370 = vmatprep.mubr.f32.mxu1 %v5571_v52  ;;  %2803 = vmatpush1.msra.mxu0 %v2659_v63  ;;  %v2644_v52 = vld [vmem:[#allocation3 + $0xf18] sm:$0xff]  ;;  %v2649_v37 = vld [vmem:[#allocation3 + $0xf40] sm:$0xff] }
 0x1a7   : > { %2371 = vmatmul.mubr.f32.vlgmr.msra.gmra.mxu1 %v5575_v58  ;;  %2804 = vmatprep.subr.mxu0 %v2657_v38  ;;  %v2714_v58 = vld [vmem:[#allocation3 + $0x1148] sm:$0xff]  ;;  %v2620_v63 = vld [vmem:[#allocation3 + $0xe58] sm:$0xff] }
 0x1a8   : > { %4003 = vmatprep.subr.msk.mxu1 %vm897_vm0, %v2729_v39  ;;  %2805 = vmatpush1.msra.mxu0 %v2656_v6  ;;  %v2694_v38 = vld [vmem:[#allocation3 + $0x10a8] sm:$0xff] }
 0x1a9   : > { %4004 = vmatpush1.msk.msra.mxu1 %vm897_vm0, %v2728_v62  ;;  %2806 = vmatprep.subr.mxu0 %v2654_v40  ;;  %v2618_v39 = vld [vmem:[#allocation3 + $0xe48] sm:$0xff]  ;;  %v2617_v62 = vld [vmem:[#allocation3 + $0xe40] sm:$0xff]  ;;  %v2691_v40 = vld [vmem:[#allocation3 + $0x1090] sm:$0xff] }
 0x1aa   : > { %2899 = vmatprep.subr.mxu1 %v2726_v42  ;;  %2376 = vmatprep.mubr.f32.mxu1 %v5586_v36  ;;  %v2661_v36 = vld [vmem:[#allocation3 + $0xfa0] sm:$0xff]  ;;  %v2646_v6 = vld [vmem:[#allocation3 + $0xf28] sm:$0xff]  ;;  %v2711_v42 = vld [vmem:[#allocation3 + $0x1130] sm:$0xff] }
 0x1ab   : > { %2807 = vmatpush1.msra.mxu0 %v2653_v43  ;;  %2900 = vmatpush1.msra.mxu1 %v2725_v44  ;;  %v2643_v43 = vld [vmem:[#allocation3 + $0xf10] sm:$0xff]  ;;  %v2710_v44 = vld [vmem:[#allocation3 + $0x1128] sm:$0xff] }
 0x1ac   : > { %2808 = vmatprep.subr.mxu0 %v2651_v45  ;;  %2377 = vmatmul.mubr.f32.gmra.mxu1 %v5579_v7  ;;  %v2712_v7 = vld [vmem:[#allocation3 + $0x1138] sm:$0xff] }
 0x1ad   : > { %2901 = vmatprep.subr.mxu1 %v2723_v20  ;;  %2809 = vmatpush1.msra.mxu0 %v2650_v21  ;;  %v2688_v45 = vld [vmem:[#allocation3 + $0x1078] sm:$0xff] }
 0x1ae   : > { %2902 = vmatpush1.msra.mxu1 %v2722_v8  ;;  %2810 = vmatprep.subr.mxu0 %v2648_v47  ;;  %v2708_v20 = vld [vmem:[#allocation3 + $0x1118] sm:$0xff]  ;;  %v2707_v8 = vld [vmem:[#allocation3 + $0x1110] sm:$0xff]  ;;  %v2705_v47 = vld [vmem:[#allocation3 + $0x1100] sm:$0xff] }
 0x1af   : > { %2903 = vmatprep.subr.mxu1 %v2720_v51  ;;  %2811 = vmatpush1.msra.mxu0 %v2647_v9  ;;  %v2640_v21 = vld [vmem:[#allocation3 + $0xef8] sm:$0xff]  ;;  %v2637_v51 = vld [vmem:[#allocation3 + $0xee0] sm:$0xff] }
 0x1b0   : > { %2904 = vmatpush1.msra.mxu1 %v2719_v12  ;;  %2812 = vmatprep.subr.mxu0 %v2645_v57  ;;  %v2704_v9 = vld [vmem:[#allocation3 + $0x10f8] sm:$0xff]  ;;  %v2682_v12 = vld [vmem:[#allocation3 + $0x1048] sm:$0xff] }
 0x1b1   : > { %2905 = vmatprep.subr.mxu1 %v2717_v53  ;;  %2813 = vmatpush1.msra.mxu0 %v2644_v52  ;;  %v2702_v57 = vld [vmem:[#allocation3 + $0x10e8] sm:$0xff]  ;;  %v2701_v52 = vld [vmem:[#allocation3 + $0x10e0] sm:$0xff] }
 0x1b2   : > { %2906 = vmatpush1.msra.mxu1 %v2716_v1  ;;  %2814 = vmatprep.subr.mxu0 %v2642_v41  ;;  %v2634_v53 = vld [vmem:[#allocation3 + $0xec8] sm:$0xff]  ;;  %v2679_v1 = vld [vmem:[#allocation3 + $0x1030] sm:$0xff] }
 0x1b3   : > { %2907 = vmatprep.subr.mxu1 %v2714_v58  ;;  %2815 = vmatpush1.msra.mxu0 %v2641_v2  ;;  %v2698_v41 = vld [vmem:[#allocation3 + $0x10c8] sm:$0xff]  ;;  %v3999_v58 = vcombine.low %v5507_v28, %v5285_v54  ;;  %v2676_v2 = vld [vmem:[#allocation3 + $0x1018] sm:$0xff]  ;;  %v2741_v54 = vrot.slane %v5269_v49, %v5251_v30  ;;  %v2667_v49 = vld [vmem:[#allocation3 + $0xfd0] sm:$0xff] }
 0x1b4   : > { %2908 = vmatpush1.msra.mxu1 %v2713_v3  ;;  %2816 = vmatprep.subr.mxu0 %v2639_v4  ;;  %v2696_v3 = vld [vmem:[#allocation3 + $0x10b8] sm:$0xff]  ;;  %v4002_v4 = vcombine.high %v5288_v55, %v5548_v48 }
 0x1b5   : > { %2941 = vmatprep.mubr.f32.mxu1 %v6143_v0  ;;  %4204 = vmatprep.subr.mxu1 %v2712_v7  ;;  %v2628_v7 = vld [vmem:[#allocation3 + $0xe98] sm:$0xff]  ;;  %v2755_v28 = vrot.slane %v3999_v58, %v5251_v30 }
 0x1b6   : > { %2817 = vmatpush1.msra.mxu0 %v2638_v32  ;;  %4005 = vmatmul.mubr.msk.f32.vlgmr.msra.gmra.mxu1 %vm892_vm8, %v5605_v10  ;;  %v2695_v32 = vld [vmem:[#allocation3 + $0x10b0] sm:$0xff]  ;;  %v2692_v55 = vld [vmem:[#allocation3 + $0x1098] sm:$0xff]  ;;  %v5618_v48 = vrot.slane %v4002_v4, %v5251_v30 }
 0x1b7   : > { %2818 = vmatprep.subr.mxu0 %v2636_v50  ;;  %4205 = vmatpush3.msra.mxu1 %v2664_v11  ;;  %v2673_v50 = vld [vmem:[#allocation3 + $0x1000] sm:$0xff] }
 0x1b8   : > { %2819 = vmatpush1.msra.mxu0 %v2635_v13  ;;  %4206 = vmatprep.subr.mxu1 %v2709_v14  ;;  %v2693_v11 = vld [vmem:[#allocation3 + $0x10a0] sm:$0xff]  ;;  %v2670_v14 = vld [vmem:[#allocation3 + $0xfe8] sm:$0xff] }
 0x1b9   : > { %2820 = vmatprep.subr.mxu0 %v2633_v29  ;;  %4207 = vmatpush3.msra.mxu1 %v2661_v36  ;;  %v2625_v13 = vld [vmem:[#allocation3 + $0xe80] sm:$0xff]  ;;  %v2690_v29 = vld [vmem:[#allocation3 + $0x1088] sm:$0xff] }
 0x1ba   : > { %2821 = vmatpush1.msra.mxu0 %v2632_v23  ;;  %4208 = vmatprep.subr.mxu1 %v2706_v22  ;;  %v2622_v36 = vld [vmem:[#allocation3 + $0xe68] sm:$0xff]  ;;  %v2689_v23 = vld [vmem:[#allocation3 + $0x1080] sm:$0xff]  ;;  %v2687_v22 = vld [vmem:[#allocation3 + $0x1070] sm:$0xff] }
 0x1bb   : > { %2822 = vmatprep.subr.mxu0 %v2630_v25  ;;  %4209 = vmatpush3.msra.mxu1 %v2658_v26  ;;  %v5621_v25 = vcombine.high %v2741_v54, %v2755_v28  ;;  %v4001_v26 = vcombine.low %v5373_v56, %v5544_v31  ;;  %v2727_v56 = vld [vmem:[#allocation3 + $0x11b0] sm:$0xff]  ;;  %v2681_v31 = vld [vmem:[#allocation3 + $0x1040] sm:$0xff] }
 0x1bc   : > { %2823 = vmatpush1.msra.mxu0 %v2629_v19  ;;  %4210 = vmatprep.subr.mxu1 %v2703_v27  ;;  %v2619_v19 = vld [vmem:[#allocation3 + $0xe50] sm:$0xff]  ;;  %v2763_v27 = vcombine.low %v2741_v54, %v2755_v28 }
 0x1bd   : > { %2824 = vmatprep.subr.mxu0 %v2627_v61  ;;  %4211 = vmatpush3.msra.mxu1 %v2655_v60  ;;  %v2730_v61 = vld [vmem:[#allocation3 + $0x11c8] sm:$0xf] }
 0x1be   : > { %2825 = vmatpush1.msra.mxu0 %v2626_v15  ;;  %4212 = vmatprep.subr.mxu1 %v2700_v46  ;;  %v2686_v60 = vld [vmem:[#allocation3 + $0x1068] sm:$0xff]  ;;  %v2684_v15 = vld [vmem:[#allocation3 + $0x1058] sm:$0xff]  ;;  %v2683_v46 = vld [vmem:[#allocation3 + $0x1050] sm:$0xff] }
 0x1bf   : > { %2826 = vmatprep.subr.mxu0 %v2624_v24  ;;  %4213 = vmatpush3.msra.mxu1 %v2652_v59  ;;  %v2774_v24 = vrot.slane %v4001_v26, %v5251_v30  ;;  %v2680_v59 = vld [vmem:[#allocation3 + $0x1038] sm:$0xff]  ;;  %v2721_v30 = vld [vmem:[#allocation3 + $0x1180] sm:$0xff] }
 0x1c0   : > { %2827 = vmatpush1.msra.mxu0 %v2623_v33  ;;  %4214 = vmatprep.subr.mxu1 %v2697_v34  ;;  %v2724_v33 = vld [vmem:[#allocation3 + $0x1198] sm:$0xff]  ;;  %v2678_v34 = vld [vmem:[#allocation3 + $0x1028] sm:$0xff] }
 0x1c1   : > { %2828 = vmatprep.subr.mxu0 %v2621_v35  ;;  %4215 = vmatpush3.msra.mxu1 %v2649_v37  ;;  %v2677_v35 = vld [vmem:[#allocation3 + $0x1020] sm:$0xff]  ;;  %v2782_v37 = vcombine.high %v2774_v24, %v2774_v24 }
 0x1c2   : > { %2829 = vmatpush1.msra.mxu0 %v2620_v63  ;;  %4216 = vmatprep.subr.mxu1 %v2694_v38  ;;  %v2675_v63 = vld [vmem:[#allocation3 + $0x1010] sm:$0xff]  ;;  %v2718_v38 = vld [vmem:[#allocation3 + $0x1168] sm:$0xff] }
 0x1c3   : > { %2830 = vmatprep.subr.mxu0 %v2618_v39  ;;  %4217 = vmatpush3.msra.mxu1 %v2646_v6  ;;  %v2674_v39 = vld [vmem:[#allocation3 + $0x1008] sm:$0xff]  ;;  %v2672_v6 = vld [vmem:[#allocation3 + $0xff8] sm:$0xff] }
 0x1c4   : > { %2831 = vmatpush1.msra.mxu0 %v2617_v62  ;;  %4218 = vmatprep.subr.mxu1 %v2691_v40  ;;  %v2715_v62 = vld [vmem:[#allocation3 + $0x1150] sm:$0xff] }
 0x1c5   : > { %2832 = vmatprep.subr.mxu0 %v2711_v42  ;;  %4219 = vmatpush3.msra.mxu1 %v2643_v43  ;;  %v2671_v40 = vld [vmem:[#allocation3 + $0xff0] sm:$0xff]  ;;  %v2669_v42 = vld [vmem:[#allocation3 + $0xfe0] sm:$0xff]  ;;  %v2668_v43 = vld [vmem:[#allocation3 + $0xfd8] sm:$0xff] }
 0x1c6   : > { %2833 = vmatpush2.msra.mxu0 %v2710_v44  ;;  %4220 = vmatprep.subr.mxu1 %v2688_v45  ;;  %v2666_v44 = vld [vmem:[#allocation3 + $0xfc8] sm:$0xff]  ;;  %v2665_v45 = vld [vmem:[#allocation3 + $0xfc0] sm:$0xff] }
 0x1c7   : > { %2834 = vmatprep.subr.mxu0 %v2708_v20  ;;  %4221 = vmatpush3.msra.mxu1 %v2640_v21  ;;  %v1050_v20 = vpop.f32.mrf.mxu1 }
 0x1c8   : > { %2835 = vmatpush2.msra.mxu0 %v2707_v8  ;;  %4222 = vmatprep.subr.mxu1 %v2685_v5 }
 0x1c9   : > { %2836 = vmatprep.subr.mxu0 %v2705_v47  ;;  %4223 = vmatpush3.msra.mxu1 %v2637_v51  ;;  %v5636_v21 = vpop.f32.mrf.mxu1 }
 0x1ca   : > { %2837 = vmatpush2.msra.mxu0 %v2704_v9  ;;  %4224 = vmatprep.subr.mxu1 %v2682_v12  ;;  %v973_v12 = vpop.f32.mrf.mxu0 }
 0x1cb   : > { %2838 = vmatprep.subr.mxu0 %v2702_v57  ;;  %4225 = vmatpush3.msra.mxu1 %v2634_v53  ;;  %v5638_v8 = vpop.f32.mrf.mxu1 }
 0x1cc   : > { %2839 = vmatpush2.msra.mxu0 %v2701_v52  ;;  %4226 = vmatprep.subr.mxu1 %v2679_v1  ;;  %v975_v53 = vpop.f32.mrf.mxu0 }
 0x1cd   : > { %2840 = vmatprep.subr.mxu0 %v2699_v16  ;;  %4227 = vmatpush3.msra.mxu1 %v2631_v18  ;;  %v5640_v5 = vpop.f32.mrf.mxu1 }
 0x1ce   : > { %2841 = vmatpush2.msra.mxu0 %v2698_v41  ;;  %4228 = vmatprep.subr.mxu1 %v2676_v2  ;;  %v979_v1 = vpop.f32.mrf.mxu0 }
 0x1cf   : > { %2842 = vmatprep.subr.mxu0 %v2696_v3  ;;  %4229 = vmatpush3.msra.mxu1 %v2628_v7 }
 0x1d0   : > { %2843 = vmatpush2.msra.mxu0 %v2695_v32  ;;  %4230 = vmatprep.subr.mxu1 %v2673_v50  ;;  %v981_v18 = vpop.f32.mrf.mxu0 }
 0x1d1   : > { %2844 = vmatprep.subr.mxu0 %v2693_v11  ;;  %4231 = vmatpush3.msra.mxu1 %v2625_v13 }
 0x1d2   : > { %2947 = vmatprep.mubr.f32.mxu1 %v6143_v0  ;;  %4232 = vmatprep.subr.mxu1 %v2670_v14  ;;  %v5642_v41 = vpop.f32.mrf.mxu0  ;;  %v1051_v0 = vadd.f32 %v1050_v20, %v973_v12 }
 0x1d3   : > { %2845 = vmatpush2.msra.mxu0 %v2692_v55  ;;  %4006 = vmatmul.mubr.msk.f32.gmra.mxu1 %vm892_vm8, %v5618_v48 }
 0x1d4   : > { %2846 = vmatprep.subr.mxu0 %v2690_v29  ;;  %4233 = vmatpush3.msra.mxu1 %v2622_v36  ;;  %v5644_v2 = vpop.f32.mrf.mxu0 }
 0x1d5   : > { %2847 = vmatpush2.msra.mxu0 %v2689_v23  ;;  %4234 = vmatprep.subr.mxu1 %v2667_v49 }
 0x1d6   : > { %2848 = vmatprep.subr.mxu0 %v2687_v22  ;;  %4235 = vmatpush3.msra.mxu1 %v2619_v19  ;;  %v5646_v4 = vpop.f32.mrf.mxu0 }
 0x1d7   : > { %3018 = vmatprep.mubr.f32.mxu1 %v5621_v25  ;;  %4432 = vmatprep.subr.msk.mxu1 %vm897_vm0, %v2730_v61 }
 0x1d8   : > { %2849 = vmatpush2.msra.mxu0 %v2686_v60  ;;  %3019 = vmatmul.mubr.f32.vlgmr.msra.gmra.mxu1 %v2763_v27  ;;  %v5648_v32 = vpop.f32.mrf.mxu0 }
 0x1d9   : > { %2850 = vmatprep.subr.mxu0 %v2684_v15  ;;  %4433 = vmatpush3.msk.msra.mxu1 %vm897_vm0, %v2730_v61 }
 0x1da   : > { %2851 = vmatpush2.msra.mxu0 %v2683_v46  ;;  %4434 = vmatprep.subr.mxu1 %v2727_v56  ;;  %v4098_v11 = vpop.f32.mrf.mxu0 }
 0x1db   : > { %2852 = vmatprep.subr.mxu0 %v2681_v31  ;;  %4435 = vmatpush3.msra.mxu1 %v2727_v56 }
 0x1dc   : > { %2853 = vmatpush2.msra.mxu0 %v2680_v59  ;;  %4436 = vmatprep.subr.mxu1 %v2724_v33  ;;  %v4099_v28 = vpop.f32.mrf.mxu0 }
 0x1dd   : > { %2854 = vmatprep.subr.mxu0 %v2678_v34  ;;  %4437 = vmatpush3.msra.mxu1 %v2724_v33 }
 0x1de   : > { %2855 = vmatpush2.msra.mxu0 %v2677_v35  ;;  %4438 = vmatprep.subr.mxu1 %v2721_v30  ;;  %v4101_v55 = vpop.f32.mrf.mxu0 }
 0x1df   : > { %3023 = vmatprep.mubr.f32.mxu1 %v2782_v37  ;;  %4439 = vmatpush3.msra.mxu1 %v2721_v30 }
 0x1e0   : > { %2856 = vmatprep.subr.mxu0 %v2675_v63  ;;  %3024 = vmatmul.mubr.f32.gmra.mxu1 %v2774_v24  ;;  %v4102_v29 = vpop.f32.mrf.mxu0 }
 0x1e1   : > { %4440 = vmatprep.subr.mxu1 %v2718_v38  ;;  %2857 = vmatpush2.msra.mxu0 %v2674_v39 }
 0x1e2   : > { %4441 = vmatpush3.msra.mxu1 %v2718_v38  ;;  %2858 = vmatprep.subr.mxu0 %v2672_v6  ;;  %v4401_v36 = vpop.f32.mrf.mxu0 }
 0x1e3   : > { %4442 = vmatprep.subr.mxu1 %v2715_v62  ;;  %2859 = vmatpush2.msra.mxu0 %v2671_v40 }
 0x1e4   : > { %4443 = vmatpush3.msra.mxu1 %v2715_v62  ;;  %4444 = vmatprep.mubr.msk.f32.mxu1 %vm892_vm8, %v5605_v10  ;;  %v4052_v10 = vpop.f32.mrf.mxu1  ;;  %v1575_v49 = vpop.f32.mrf.mxu0 }
 0x1e5   : > { %2860 = vmatprep.subr.mxu0 %v2669_v42  ;;  %4445 = vmatmul.mubr.msk.f32.vlgmr.msra.gmra.mxu1 %vm892_vm8, %v5618_v48 }
 0x1e6   : > { %2861 = vmatpush2.msra.mxu0 %v2668_v43  ;;  %2864 = vmatprep.mubr.f32.mxu0 %v5621_v25  ;;  %v4053_v47 = vpop.f32.mrf.mxu1 }
 0x1e7   : > { %2862 = vmatprep.subr.mxu0 %v2666_v44  ;;  %v4054_v44 = vadd.f32 %v4053_v47, %v4052_v10 }
 0x1e8   : > { %2863 = vmatpush2.msra.mxu0 %v2665_v45  ;;  %v4055_v51 = vpop.f32.mrf.mxu1  ;;  %v4103_v45 = vadd.f32 %v4102_v29, %v4101_v55 }
 0x1e9   : > { %2865 = vmatmul.mubr.f32.vlgmr.msra.gmra.mxu0 %v2763_v27 }
 0x1ea   : > { %2870 = vmatprep.mubr.f32.mxu0 %v2782_v37  ;;  %v4056_v9 = vpop.f32.mrf.mxu1 }
 0x1eb   : > { %v4057_v42 = vadd.f32 %v4056_v9, %v4055_v51 }
 0x1ec   : > { %v4386_v57 = vpop.f32.mrf.mxu1 }
 0x1ed   : > { %2871 = vmatmul.mubr.f32.gmra.mxu0 %v2774_v24 }
 0x1ee   : > { %v1202_v52 = vpop.f32.mrf.mxu1 }
 0x1f0   : > { %v1346_v16 = vpop.f32.mrf.mxu1 }
 0x1f2   : > { %v1348_v58 = vpop.f32.mrf.mxu1 }
 0x1f4   : > { %v1352_v3 = vpop.f32.mrf.mxu1 }
 0x1f6   : > { %v1354_v7 = vpop.f32.mrf.mxu1 }
 0x1f8   : > { %v5650_v50 = vpop.f32.mrf.mxu1 }
 0x1fa   : > { %v5652_v13 = vpop.f32.mrf.mxu1 }
 0x20d   : > { %v5654_v54 = vpop.f32.mrf.mxu1 }
 0x20f   : > { %v5656_v14 = vpop.f32.mrf.mxu1 }
 0x210   : > { %6175 = vst [vmem:[#allocation26_spill] sm:$0xff] %v5656_v14  ;;  %v1053_v14 = vadd.f32 %v5636_v21, %v975_v53  ;;  %v3122_v21 = vsub.s32 2, %v5237_v17 }
 0x212   : > { %v4144_v48 = vpop.f32.mrf.mxu1  ;;  %v1349_v51 = vadd.f32 %v1348_v58, %v1053_v14 }
 0x214   : > { %v4145_v23 = vpop.f32.mrf.mxu1 }
 0x215   : > { %v4146_v9 = vadd.f32 %v4145_v23, %v4144_v48 }
 0x21a   : > { %v4147_v22 = vpop.f32.mrf.mxu1 }
 0x21c   : > { %v4148_v26 = vpop.f32.mrf.mxu1 }
 0x21f   : > { %v4416_v27 = vpop.f32.mrf.mxu1 }
 0x221   : > { %v2063_v60 = vpop.f32.mrf.mxu1 }
 0x224   : > { %v1834_v25 = vpop.f32.mrf.mxu0 }
 0x225   : > { %v1912_v58 = vadd.f32 %v5650_v50, %v1834_v25 }
 0x226   : > { %v1836_v19 = vpop.f32.mrf.mxu0 }
 0x229   : > { %v5658_v61 = vpop.f32.mrf.mxu0 }
 0x22b   : > { %v5660_v15 = vpop.f32.mrf.mxu0 }
 0x22c   : > { %6176 = vst [vmem:[#allocation27_spill] sm:$0xff] %v5660_v15  ;;  %v1057_v15 = vadd.f32 %v5638_v8, %v979_v1 }
 0x22e   : > { %v1353_v47 = vadd.f32 %v1352_v3, %v1057_v15  ;;  %v1914_v3 = vadd.f32 %v5652_v13, %v1836_v19 }
 0x230   : > { %v1430_v14 = vadd.f32 %v5646_v4, %v1353_v47 }
 0x232   : > { %v2449_v24 = vpop.f32.mrf.mxu0 }
 0x234   : > { %v5664_v31 = vpop.f32.mrf.mxu0 }
 0x235   : > { %6178 = vst [vmem:[#allocation29_spill] sm:$0xff] %v5664_v31  ;;  %v1347_v31 = vadd.f32 %v1346_v16, %v1051_v0  ;;  %v3110_v16 = vld [vmem:[#allocation6] sm:$0x7] }
 0x237   : > { %v1424_v8 = vadd.f32 %v5642_v41, %v1347_v31 }
 0x239   : > { %v2072_v13 = vadd.f32 %v1912_v58, %v1424_v8 }
 0x23c   : > { %v6188_v4 = vld [vmem:[#allocation29_spill] sm:$0xff] }
 0x24e   : > { %v5666_v59 = vpop.f32.mrf.mxu0 }
 0x24f   : > { %6179 = vst [vmem:[#allocation30_spill] sm:$0xff] %v5666_v59  ;;  %v4149_v59 = vadd.f32 %v4148_v26, %v4147_v22  ;;  %v3114_v22 = vsub.s32 0, %v5237_v17 }
 0x250   : > { %v5670_v34 = vpop.f32.mrf.mxu0 }
 0x251   : > { %6181 = vst [vmem:[#allocation32_spill] sm:$0xff] %v5670_v34  ;;  %v4100_v34 = vadd.f32 %v4099_v28, %v4098_v11  ;;  %v2069_v12 = vadd.f32 %v4416_v27, %v4149_v59 }
 0x254   : > { %v4190_v30 = vpop.f32.mrf.mxu0 }
 0x256   : > { %v4191_v38 = vpop.f32.mrf.mxu0 }
 0x257   : > { %v4192_v1 = vadd.f32 %v4191_v38, %v4190_v30 }
 0x25c   : > { %v4193_v6 = vpop.f32.mrf.mxu0 }
 0x25e   : > { %v4194_v43 = vpop.f32.mrf.mxu0 }
 0x267   : > { %v2372_v46 = vpop.f32.mrf.mxu1 }
 0x268   : > { %v2450_v23 = vadd.f32 %v2449_v24, %v2372_v46  ;;  %v6189_v46 = vld [vmem:[#allocation27_spill] sm:$0xff]  ;;  %v6190_v24 = vld [vmem:[#allocation26_spill] sm:$0xff] }
 0x269   : > { %v5662_v56 = vpop.f32.mrf.mxu1  ;;  %v1920_v31 = vadd.f32 %v6190_v24, %v6189_v46 }
 0x26a   : > { %6177 = vst [vmem:[#allocation28_spill] sm:$0xff] %v5662_v56 }
 0x26c   : > { %v5668_v33 = vpop.f32.mrf.mxu1 }
 0x26d   : > { %6180 = vst [vmem:[#allocation31_spill] sm:$0xff] %v5668_v33  ;;  %v1208_v33 = vadd.f32 %v4386_v57, %v4057_v42  ;;  %v2064_v57 = vadd.f32 %v4146_v9, %v2063_v60 }
 0x26e   : > { %v5672_v35 = vpop.f32.mrf.mxu1 }
 0x26f   : > { %6182 = vst [vmem:[#allocation33_spill] sm:$0xff] %v5672_v35  ;;  %v1506_v56 = vadd.f32 %v4103_v45, %v1208_v33 }
 0x271   : > { %v1581_v28 = vadd.f32 %v4401_v36, %v1506_v56  ;;  %v6187_v27 = vld [vmem:[#allocation28_spill] sm:$0xff]  ;;  %v3118_v56 = vsub.s32 1, %v5237_v17 }
 0x272   : > { %v2452_v60 = vadd.f32 %v6188_v4, %v6187_v27 }
 0x273   : > { %v2077_v48 = vadd.f32 %v2069_v12, %v1581_v28  ;;  %v3119_v9 = vrot.slane %v3110_v16, %v3118_v56 }
 0x276   : > { %v5674_v37 = vpop.f32.mrf.mxu1  ;;  %v6195_v47 = vld [vmem:[#allocation33_spill] sm:$0xff] }
 0x277   : > { %6183 = vst [vmem:[#allocation34_spill] sm:$0xff] %v5674_v37  ;;  %v1203_v37 = vadd.f32 %v4054_v44, %v1202_v52 }
 0x278   : > { %v5676_v63 = vpop.f32.mrf.mxu1 }
 0x279   : > { %6184 = vst [vmem:[#allocation35_spill] sm:$0xff] %v5676_v63  ;;  %v4431_v63 = vpop.f32.mrf.mxu0  ;;  %v1501_v10 = vadd.f32 %v4100_v34, %v1203_v37 }
 0x27b   : > { %v2601_v52 = vpop.f32.mrf.mxu0  ;;  %v1576_v53 = vadd.f32 %v1575_v49, %v1501_v10  ;;  %v3123_v49 = vrot.slane %v3110_v16, %v3122_v21 }
 0x27c   : > { %v2602_v29 = vadd.f32 %v4192_v1, %v2601_v52 }
 0x27d   : > { %v2074_v36 = vadd.f32 %v2064_v57, %v1576_v53  ;;  %v3139_v53 = vld [vmem:[#allocation8] sm:$0x3f] }
 0x27f   : > { %v2612_v59 = vadd.f32 %v2602_v29, %v2074_v36 }
 0x280   : > { %v6194_v45 = vld [vmem:[#allocation35_spill] sm:$0xff] }
 0x293   : > { %v5678_v39 = vpop.f32.mrf.mxu1 }
 0x294   : > { %6185 = vst [vmem:[#allocation36_spill] sm:$0xff] %v5678_v39  ;;  %v1059_v39 = vadd.f32 %v5640_v5, %v981_v18  ;;  %v1426_v18 = vadd.f32 %v5644_v2, %v1349_v51  ;;  %v1918_v2 = vadd.f32 %v5654_v54, %v5658_v61  ;;  %v2610_v54 = vadd.f32 %v2450_v23, %v2072_v13  ;;  %v6191_v61 = vld [vmem:[#allocation31_spill] sm:$0xff] }
 0x295   : > { %v5680_v62 = vpop.f32.mrf.mxu1  ;;  %v3170_v23 = vrot.slane %v3139_v53, 2 }
 0x296   : > { %6186 = vst [vmem:[#allocation37_spill] sm:$0xff] %v5680_v62  ;;  %v4195_v62 = vadd.f32 %v4194_v43, %v4193_v6  ;;  %v1355_v20 = vadd.f32 %v1354_v7, %v1059_v39  ;;  %v2073_v19 = vadd.f32 %v1914_v3, %v1426_v18  ;;  %v3115_v39 = vrot.slane %v3110_v16, %v3114_v22 }
 0x297   : > { %v2075_v6 = vadd.f32 %v1918_v2, %v1430_v14 }
 0x298   : > { %v4236_v40 = vpop.f32.mrf.mxu1  ;;  %v2607_v5 = vadd.f32 %v4431_v63, %v4195_v62  ;;  %v1432_v55 = vadd.f32 %v5648_v32, %v1355_v20  ;;  %v3141_v32 = vld [vmem:[#allocation8 + $0x10] sm:$0x3f]  ;;  %v6193_v63 = vld [vmem:[#allocation34_spill] sm:$0xff]  ;;  %v2611_v17 = vadd.f32 %v2452_v60, %v2073_v19 }
 0x299   : > { %v6196_v20 = vld [vmem:[#allocation32_spill] sm:$0xff] }
 0x29a   : > { %v4237_v35 = vpop.f32.mrf.mxu1  ;;  %v2615_v26 = vadd.f32 %v2607_v5, %v2077_v48  ;;  %v2076_v10 = vadd.f32 %v1920_v31, %v1432_v55  ;;  %v2458_v12 = vadd.f32 %v6196_v20, %v6195_v47 }
 0x29b   : > { %v4238_v50 = vadd.f32 %v4237_v35, %v4236_v40  ;;  %v6192_v35 = vld [vmem:[#allocation30_spill] sm:$0xff]  ;;  %v3172_v40 = vrot.slane %v3141_v32, 2  ;;  %v6197_v1 = vld [vmem:[#allocation36_spill] sm:$0xff] }
 0x29c   : > { %v2456_v30 = vadd.f32 %v6192_v35, %v6191_v61  ;;  %v2614_v48 = vadd.f32 %v2458_v12, %v2076_v10 }
 0x29d   : > { %v6198_v14 = vld [vmem:[#allocation37_spill] sm:$0xff] }
 0x29e   : > { %v2613_v52 = vadd.f32 %v2456_v30, %v2075_v6 }
 0x2a0   : > { %v4239_v11 = vpop.f32.mrf.mxu1 }
 0x2a2   : > { %v4240_v0 = vpop.f32.mrf.mxu1 }
 0x2a3   : > { %v4241_v7 = vadd.f32 %v4240_v0, %v4239_v11 }
 0x2a5   : > { %v4446_v41 = vpop.f32.mrf.mxu1 }
 0x2a6   : > { %v3101_v25 = vadd.f32 %v4446_v41, %v4241_v7  ;;  %v3140_v41 = vld [vmem:[#allocation8 + $0x8] sm:$0x3f] }
 0x2a7   : > { %v3095_v15 = vpop.f32.mrf.mxu1  ;;  %v3171_v60 = vrot.slane %v3140_v41, 2 }
 0x2a8   : > { %v3109_v33 = vadd.f32 %v3101_v25, %v2615_v26  ;;  %v3096_v34 = vadd.f32 %v4238_v50, %v3095_v15 }
 0x2a9   : > { %v2866_v37 = vpop.f32.mrf.mxu0 }
 0x2aa   : > { %v2944_v38 = vadd.f32 %v6193_v63, %v2866_v37  ;;  %v3132_v62 = vadd.f32 %v3123_v49, %v3109_v33  ;;  %v3106_v42 = vadd.f32 %v3096_v34, %v2612_v59 }
 0x2ab   : > { %v2868_v43 = vpop.f32.mrf.mxu0 }
 0x2ac   : > { %v3104_v44 = vadd.f32 %v2944_v38, %v2610_v54  ;;  %v2946_v51 = vadd.f32 %v6194_v45, %v2868_v43  ;;  %v3138_v11 = vmax.f32 %v3132_v62, 0.0  ;;  %v3129_v28 = vadd.f32 %v3123_v49, %v3106_v42 }
 0x2ad   : > { %v2872_v57 = vpop.f32.mrf.mxu0 }
 0x2ae   : > { %v3127_v21 = vadd.f32 %v3115_v39, %v3104_v44  ;;  %v3105_v8 = vadd.f32 %v2946_v51, %v2611_v17  ;;  %v2950_v5 = vadd.f32 %v6197_v1, %v2872_v57  ;;  %v3181_v0 = vmul.f32 %v3172_v40, %v3138_v11 }
 0x2af   : > { %v3135_v18 = vmax.f32 %v3129_v28, 0.0  ;;  %v2874_v58 = vpop.f32.mrf.mxu0 }
 0x2b0   : > { %v3133_v3 = vmax.f32 %v3127_v21, 0.0  ;;  %v3128_v16 = vadd.f32 %v3119_v9, %v3105_v8  ;;  %v3107_v7 = vadd.f32 %v2950_v5, %v2613_v52  ;;  %v2952_v55 = vadd.f32 %v6198_v14, %v2874_v58 }
 0x2b1   : > { %v3144_v29 = vmul.f32 %v3141_v32, %v3135_v18  ;;  %v3178_v36 = vmul.f32 %v3172_v40, %v3135_v18  ;;  %v3202_v26 = vsel %vm897_vm0, %v3181_v0, -inf }
 0x2b2   : > { %v3142_v49 = vmul.f32 %v3139_v53, %v3133_v3  ;;  %v3134_v22 = vmax.f32 %v3128_v16, 0.0  ;;  %v3130_v2 = vadd.f32 %v3115_v39, %v3107_v7  ;;  %v3108_v13 = vadd.f32 %v2952_v55, %v2614_v48 }
 0x2b3   : > { %v3160_v50 = vsel %vm3145_vm9, %v3144_v29, -inf  ;;  %v3201_v25 = vsel %vm3182_vm10, %v3178_v36, -inf  ;;  %v3176_v32 = vmul.f32 %v3170_v23, %v3133_v3 }
 0x2b4   : > { %v3161_v19 = vrot.slane %v3160_v50, 4  ;;  %v3203_v27 = vmax.f32 %v3201_v25, %v3202_v26  ;;  %v3146_v4 = vsel %vm3145_vm9, %v3142_v49, -inf  ;;  %v3143_v56 = vmul.f32 %v3140_v41, %v3134_v22 }
 0x2b5   : > { %v3147_v15 = vrot.slane %v3146_v4, 4  ;;  %v3136_v46 = vmax.f32 %v3130_v2, 0.0  ;;  %v3131_v59 = vadd.f32 %v3119_v9, %v3108_v13  ;;  %v3183_v63 = vsel %vm3182_vm10, %v3176_v32, -inf }
 0x2b6   : > { %v3162_v24 = vmax.f32 %v3160_v50, %v3161_v19  ;;  %v3204_v31 = vrot.slane %v3203_v27, 4  ;;  %v3153_v34 = vsel %vm3145_vm9, %v3143_v56, -inf  ;;  %v3177_v38 = vmul.f32 %v3171_v60, %v3134_v22 }
 0x2b7   : > { %v3148_v33 = vmax.f32 %v3146_v4, %v3147_v15  ;;  %v3179_v37 = vmul.f32 %v3170_v23, %v3136_v46  ;;  %v3154_v35 = vrot.slane %v3153_v34, 4  ;;  %v3137_v30 = vmax.f32 %v3131_v59, 0.0 }
 0x2b8   : > { %v3163_v54 = vrot.slane %v3162_v24, 2  ;;  %v3205_v61 = vmax.f32 %v3203_v27, %v3204_v31  ;;  %v3192_v20 = vsel %vm3182_vm10, %v3177_v38, -inf }
 0x2b9   : > { %v3184_v39 = vsel %vm897_vm0, %v3179_v37, -inf  ;;  %v3149_v40 = vrot.slane %v3148_v33, 2  ;;  %v3155_v43 = vmax.f32 %v3153_v34, %v3154_v35  ;;  %v3180_v17 = vmul.f32 %v3171_v60, %v3137_v30 }
 0x2ba   : > { %v3164_v6 = vmax.f32 %v3162_v24, %v3163_v54  ;;  %v3206_v62 = vrot.slane %v3205_v61, 2  ;;  %v3185_v42 = vmax.f32 %v3183_v63, %v3184_v39 }
 0x2bb   : > { %v3193_v9 = vsel %vm897_vm0, %v3180_v17, -inf  ;;  %v3150_v47 = vmax.f32 %v3148_v33, %v3149_v40  ;;  %v3156_v11 = vrot.slane %v3155_v43, 2 }
 0x2bc   : > { %v3165_v44 = vrot.slane %v3164_v6, 1  ;;  %v3207_v45 = vmax.f32 %v3205_v61, %v3206_v62  ;;  %v3186_v51 = vrot.slane %v3185_v42, 4  ;;  %v3194_v28 = vmax.f32 %v3192_v20, %v3193_v9 }
 0x2bd   : > { %v3151_v1 = vrot.slane %v3150_v47, 1  ;;  %v3157_v0 = vmax.f32 %v3155_v43, %v3156_v11 }
 0x2be   : > { %v3208_v10 = vrot.slane %v3207_v45, 1  ;;  %v3187_v12 = vmax.f32 %v3185_v42, %v3186_v51  ;;  %v3166_v57 = vmax.f32 %v3164_v6, %v3165_v44  ;;  %v3195_v53 = vrot.slane %v3194_v28, 4 }
 0x2bf   : > { %v3152_v16 = vmax.f32 %v3150_v47, %v3151_v1  ;;  %v3158_v14 = vrot.slane %v3157_v0, 1 }
 0x2c0   : > { %v3209_v52 = vmax.f32 %v3207_v45, %v3208_v10  ;;  %v3188_v21 = vrot.slane %v3187_v12, 2  ;;  %v3196_v18 = vmax.f32 %v3194_v28, %v3195_v53 }
 0x2c1   : > { %v3159_v36 = vmax.f32 %v3157_v0, %v3158_v14 }
 0x2c2   : > { %v5718_v8 = vsel %vm694_vm1, %v3166_v57, %v3209_v52  ;;  %v3189_v5 = vmax.f32 %v3187_v12, %v3188_v21  ;;  %v3197_v3 = vrot.slane %v3196_v18, 2 }
 0x2c4   : > { %v3190_v58 = vrot.slane %v3189_v5, 1  ;;  %v3198_v55 = vmax.f32 %v3196_v18, %v3197_v3 }
 0x2c6   : > { %v3191_v7 = vmax.f32 %v3189_v5, %v3190_v58  ;;  %v3199_v29 = vrot.slane %v3198_v55, 1  ;;  %3216 = sbr.rel (%p6199_p7) target bundleno = 950 (0x3b6), region = 100 }
 0x2c8   : > { %v5721_v48 = vsel %vm694_vm1, %v3152_v16, %v3191_v7  ;;  %v3200_v23 = vmax.f32 %v3198_v55, %v3199_v29 }
 0x2ca   : > { %v5724_v41 = vsel %vm694_vm1, %v3159_v36, %v3200_v23 }
 0x2cb   : > { %v3248_v49 = vld [vmem:[%s6129_s4 + $0xf8] sm:$0xff]  ;;  %v3247_v2 = vld [vmem:[%s6129_s4 + $0xf0] sm:$0xff]  ;;  %3336 = vmatprep.mubr.f32.mxu0 %v5724_v41  ;;  %v5001_v50 = vmov 0.0   ;;  %v3246_v25 = vld [vmem:[%s6129_s4 + $0xe8] sm:$0xff]  ;;  %vm5002_vm11 = vmmov 0   ;;  %vm3412_vm12 = vcmask 517120  }
 0x2cc   : > { %v3232_v22 = vld [vmem:[%s6129_s4 + $0x78] sm:$0xff]  ;;  %4250 = vmatprep.subr.mxu0 %v3248_v49  ;;  %v3231_v26 = vld [vmem:[%s6129_s4 + $0x70] sm:$0xff]  ;;  %4447 = vmatprep.subr.mxu1 %v5001_v50  ;;  %v3230_v19 = vld [vmem:[%s6129_s4 + $0x68] sm:$0xff] }
 0x2cd   : > { %4251 = vmatpush3.msra.mxu0 %v3232_v22  ;;  %v3264_v13 = vld [vmem:[%s6129_s4 + $0x178] sm:$0xff]  ;;  %4479 = vmatprep.mubr.msk.f32.mxu1 %vm5002_vm11, %v5001_v50  ;;  %v3263_v27 = vld [vmem:[%s6129_s4 + $0x170] sm:$0xff]  ;;  %v3245_v4 = vld [vmem:[%s6129_s4 + $0xe0] sm:$0xff] }
 0x2ce   : > { %4252 = vmatprep.subr.mxu0 %v3247_v2  ;;  %4448 = vmatpush3.msra.mxu1 %v3264_v13  ;;  %v3262_v60 = vld [vmem:[%s6129_s4 + $0x168] sm:$0xff]  ;;  %v3229_v15 = vld [vmem:[%s6129_s4 + $0x60] sm:$0xff]  ;;  %v3244_v32 = vld [vmem:[%s6129_s4 + $0xd8] sm:$0xff] }
 0x2cf   : > { %4253 = vmatpush3.msra.mxu0 %v3231_v26  ;;  %4449 = vmatprep.subr.mxu1 %v5001_v50  ;;  %v3261_v56 = vld [vmem:[%s6129_s4 + $0x160] sm:$0xff]  ;;  %v3228_v46 = vld [vmem:[%s6129_s4 + $0x58] sm:$0xff]  ;;  %v3243_v24 = vld [vmem:[%s6129_s4 + $0xd0] sm:$0xff] }
 0x2d0   : > { %4254 = vmatprep.subr.mxu0 %v3246_v25  ;;  %4450 = vmatpush3.msra.mxu1 %v3263_v27  ;;  %v3260_v31 = vld [vmem:[%s6129_s4 + $0x158] sm:$0xff]  ;;  %v3227_v59 = vld [vmem:[%s6129_s4 + $0x50] sm:$0xff]  ;;  %v3242_v33 = vld [vmem:[%s6129_s4 + $0xc8] sm:$0xff] }
 0x2d1   : > { %4255 = vmatpush3.msra.mxu0 %v3230_v19  ;;  %4451 = vmatprep.subr.mxu1 %v5001_v50  ;;  %v3259_v34 = vld [vmem:[%s6129_s4 + $0x150] sm:$0xff]  ;;  %v3226_v37 = vld [vmem:[%s6129_s4 + $0x48] sm:$0xff]  ;;  %v3241_v54 = vld [vmem:[%s6129_s4 + $0xc0] sm:$0xff] }
 0x2d2   : > { %4256 = vmatprep.subr.mxu0 %v3245_v4  ;;  %4452 = vmatpush3.msra.mxu1 %v3262_v60  ;;  %v3258_v61 = vld [vmem:[%s6129_s4 + $0x148] sm:$0xff]  ;;  %v3225_v35 = vld [vmem:[%s6129_s4 + $0x40] sm:$0xff]  ;;  %v3240_v30 = vld [vmem:[%s6129_s4 + $0xb8] sm:$0xff] }
 0x2d3   : > { %4257 = vmatpush3.msra.mxu0 %v3229_v15  ;;  %4453 = vmatprep.subr.mxu1 %v5001_v50  ;;  %v3257_v63 = vld [vmem:[%s6129_s4 + $0x140] sm:$0xff]  ;;  %v3224_v38 = vld [vmem:[%s6129_s4 + $0x38] sm:$0xff]  ;;  %v3239_v39 = vld [vmem:[%s6129_s4 + $0xb0] sm:$0xff] }
 0x2d4   : > { %4258 = vmatprep.subr.mxu0 %v3244_v32  ;;  %4454 = vmatpush3.msra.mxu1 %v3261_v56  ;;  %v3256_v6 = vld [vmem:[%s6129_s4 + $0x138] sm:$0xff]  ;;  %v3223_v62 = vld [vmem:[%s6129_s4 + $0x30] sm:$0xff]  ;;  %v3238_v40 = vld [vmem:[%s6129_s4 + $0xa8] sm:$0xff] }
 0x2d5   : > { %4259 = vmatpush3.msra.mxu0 %v3228_v46  ;;  %4455 = vmatprep.subr.mxu1 %v5001_v50  ;;  %v3255_v42 = vld [vmem:[%s6129_s4 + $0x130] sm:$0xff]  ;;  %v3222_v43 = vld [vmem:[%s6129_s4 + $0x28] sm:$0xff]  ;;  %v3237_v17 = vld [vmem:[%s6129_s4 + $0xa0] sm:$0xff] }
 0x2d6   : > { %4260 = vmatprep.subr.mxu0 %v3243_v24  ;;  %4456 = vmatpush3.msra.mxu1 %v3260_v31  ;;  %v3254_v44 = vld [vmem:[%s6129_s4 + $0x128] sm:$0xff]  ;;  %v3221_v45 = vld [vmem:[%s6129_s4 + $0x20] sm:$0xff]  ;;  %v3236_v51 = vld [vmem:[%s6129_s4 + $0x98] sm:$0xff] }
 0x2d7   : > { %4261 = vmatpush3.msra.mxu0 %v3227_v59  ;;  %4457 = vmatprep.subr.mxu1 %v5001_v50  ;;  %v3253_v9 = vld [vmem:[%s6129_s4 + $0x120] sm:$0xff]  ;;  %v3220_v10 = vld [vmem:[%s6129_s4 + $0x18] sm:$0xff]  ;;  %v3235_v47 = vld [vmem:[%s6129_s4 + $0x90] sm:$0xff] }
 0x2d8   : > { %4262 = vmatprep.subr.mxu0 %v3242_v33  ;;  %4458 = vmatpush3.msra.mxu1 %v3259_v34  ;;  %v3252_v20 = vld [vmem:[%s6129_s4 + $0x118] sm:$0xff]  ;;  %v3219_v12 = vld [vmem:[%s6129_s4 + $0x10] sm:$0xff]  ;;  %v3234_v11 = vld [vmem:[%s6129_s4 + $0x88] sm:$0xff] }
 0x2d9   : > { %4263 = vmatpush3.msra.mxu0 %v3226_v37  ;;  %4459 = vmatprep.subr.mxu1 %v5001_v50  ;;  %v3251_v28 = vld [vmem:[%s6129_s4 + $0x110] sm:$0xff]  ;;  %v3218_v57 = vld [vmem:[%s6129_s4 + $0x8] sm:$0xff]  ;;  %v3233_v52 = vld [vmem:[%s6129_s4 + $0x80] sm:$0xff] }
 0x2da   : > { %4264 = vmatprep.subr.mxu0 %v3241_v54  ;;  %4460 = vmatpush3.msra.mxu1 %v3258_v61  ;;  %v3250_v21 = vld [vmem:[%s6129_s4 + $0x108] sm:$0xff]  ;;  %v3217_v53 = vld [vmem:[%s6129_s4] sm:$0xff] }
 0x2db   : > { %4265 = vmatpush3.msra.mxu0 %v3225_v35  ;;  %4461 = vmatprep.subr.mxu1 %v5001_v50  ;;  %v3249_v1 = vld [vmem:[%s6129_s4 + $0x100] sm:$0xff]  ;;  %v4011_v58 = vld [vmem:[#allocation9] ss:$0 sm:$0xff] }
 0x2dc   : > { %4266 = vmatprep.subr.mxu0 %v3240_v30  ;;  %4462 = vmatpush3.msra.mxu1 %v3257_v63 }
 0x2dd   : > { %4267 = vmatpush3.msra.mxu0 %v3224_v38  ;;  %4463 = vmatprep.subr.mxu1 %v5001_v50 }
 0x2de   : > { %4268 = vmatprep.subr.mxu0 %v3239_v39  ;;  %4464 = vmatpush3.msra.mxu1 %v3256_v6 }
 0x2df   : > { %4269 = vmatpush3.msra.mxu0 %v3223_v62  ;;  %4465 = vmatprep.subr.mxu1 %v5001_v50 }
 0x2e0   : > { %4270 = vmatprep.subr.mxu0 %v3238_v40  ;;  %4466 = vmatpush3.msra.mxu1 %v3255_v42 }
 0x2e1   : > { %4271 = vmatpush3.msra.mxu0 %v3222_v43  ;;  %4467 = vmatprep.subr.mxu1 %v5001_v50 }
 0x2e2   : > { %4272 = vmatprep.subr.mxu0 %v3237_v17  ;;  %4468 = vmatpush3.msra.mxu1 %v3254_v44 }
 0x2e3   : > { %4273 = vmatpush3.msra.mxu0 %v3221_v45  ;;  %4469 = vmatprep.subr.mxu1 %v5001_v50 }
 0x2e4   : > { %4274 = vmatprep.subr.mxu0 %v3236_v51  ;;  %4470 = vmatpush3.msra.mxu1 %v3253_v9 }
 0x2e5   : > { %4275 = vmatpush3.msra.mxu0 %v3220_v10  ;;  %4471 = vmatprep.subr.mxu1 %v5001_v50 }
 0x2e6   : > { %4276 = vmatprep.subr.mxu0 %v3235_v47  ;;  %4472 = vmatpush3.msra.mxu1 %v3252_v20 }
 0x2e7   : > { %4277 = vmatpush3.msra.mxu0 %v3219_v12  ;;  %4473 = vmatprep.subr.mxu1 %v5001_v50 }
 0x2e8   : > { %4278 = vmatprep.subr.mxu0 %v3234_v11  ;;  %4474 = vmatpush3.msra.mxu1 %v3251_v28 }
 0x2e9   : > { %4279 = vmatpush3.msra.mxu0 %v3218_v57  ;;  %4475 = vmatprep.subr.mxu1 %v5001_v50 }
 0x2ea   : > { %4280 = vmatprep.subr.mxu0 %v3233_v52  ;;  %4476 = vmatpush3.msra.mxu1 %v3250_v21 }
 0x2eb   : > { %4281 = vmatpush3.msra.mxu0 %v3217_v53  ;;  %4477 = vmatprep.subr.mxu1 %v5001_v50 }
 0x2ec   : > { %3337 = vmatmul.mubr.f32.vlgmr.msra.gmra.mxu0 %v5721_v48  ;;  %4478 = vmatpush3.msra.mxu1 %v3249_v1 }
 0x2ed   : > { %4480 = vmatmul.mubr.f32.vlgmr.msra.gmra.mxu1 %v5718_v8 }
 0x3ac   : > { %v4282_v5 = vpop.f32.mrf.mxu0 }
 0x3ad   : > { %v3408_v0 = vpop.f32.mrf.mxu1 }
 0x3ae   : > { %v4283_v18 = vpop.f32.mrf.mxu0 }
 0x3af   : > { %v4284_v3 = vadd.f32 %v4283_v18, %v4282_v5  ;;  %v4481_v16 = vpop.f32.mrf.mxu1 }
 0x3b1   : > { %v3339_v7 = vadd.f32 %v4284_v3, %v4011_v58 }
 0x3b3   : > { %v3409_v14 = vadd.f32 %v3408_v0, %v3339_v7 }
 0x3b5   : > { %3413 = vst.msk [vmem:[#allocation2] sm:$0x3] %vm3412_vm12, %v3409_v14 }
 0x3b6 PF: > { %v3445_v55 = vld [vmem:[%s6131_s6 + $0xf8] sm:$0xff]  ;;  %v3444_v36 = vld [vmem:[%s6131_s6 + $0xf0] sm:$0xff]  ;;  %v6200_v23 = vmov 0.0   ;;  %3533 = vmatprep.mubr.f32.mxu0 %v5724_v41  ;;  %vm5003_vm13 = vmmov 0   ;;  %v3443_v22 = vld [vmem:[%s6131_s6 + $0xe8] sm:$0xff]  ;;  %vm3618_vm14 = vcmask 523264  }
 0x3b7   : > { %v3429_v29 = vld [vmem:[%s6131_s6 + $0x78] sm:$0xff]  ;;  %4482 = vmatprep.subr.mxu1 %v6200_v23  ;;  %4302 = vmatprep.subr.mxu0 %v3445_v55  ;;  %v3428_v49 = vld [vmem:[%s6131_s6 + $0x70] sm:$0xff]  ;;  %v3427_v41 = vld [vmem:[%s6131_s6 + $0x68] sm:$0xff]  ;;  %vm3694_vm15 = vcmask 517120   ;;  %s4017_s13 = sshll.u32 %s5086_s21, 5  ;;  %s3799_s24 = sshll.u32 %s486_s26, 4  ;;  %s3800_s24 = int_to_ptr.vmem [resolvable:$true] %s3799_s24 }
 0x3b8   : > { %4514 = vmatprep.mubr.msk.f32.mxu1 %vm5003_vm13, %v6200_v23  ;;  %4303 = vmatpush3.msra.mxu0 %v3429_v29  ;;  %v3461_v2 = vld [vmem:[%s6131_s6 + $0x178] sm:$0xff]  ;;  %v3460_v26 = vld [vmem:[%s6131_s6 + $0x170] sm:$0xff]  ;;  %v3442_v50 = vld [vmem:[%s6131_s6 + $0xe0] sm:$0xff]  ;;  %s6086_s30 = scalar_lea.hbm %s6136_s11, %s4017_s13  ;;  %s3786_s2 = scalar_lea.sflag [#allocation5], %s484_s29 }
 0x3b9   : > { %4304 = vmatprep.subr.mxu0 %v3444_v36  ;;  %4483 = vmatpush3.msra.mxu1 %v3461_v2  ;;  %v3459_v25 = vld [vmem:[%s6131_s6 + $0x168] sm:$0xff]  ;;  %v3426_v13 = vld [vmem:[%s6131_s6 + $0x60] sm:$0xff]  ;;  %v3441_v19 = vld [vmem:[%s6131_s6 + $0xd8] sm:$0xff]  ;;  %s4905_s19 = scalar_lea.vmem %s3800_s24, 32  ;;  %p6201_p6 = scmp.ne.s32.totalorder %s6149_s27, 0 }
 0x3ba   : > { %4305 = vmatpush3.msra.mxu0 %v3428_v49  ;;  %4484 = vmatprep.subr.mxu1 %v6200_v23  ;;  %v3458_v27 = vld [vmem:[%s6131_s6 + $0x160] sm:$0xff]  ;;  %v3425_v4 = vld [vmem:[%s6131_s6 + $0x58] sm:$0xff]  ;;  %v3440_v60 = vld [vmem:[%s6131_s6 + $0xd0] sm:$0xff]  ;;  %p4906_p5 = scmp.ne.s32.totalorder %s3800_s24, %s4905_s19  ;;  %s5004_s21 = smov [#allocation17]  }
 0x3bb   : > { %4306 = vmatprep.subr.mxu0 %v3443_v22  ;;  %4485 = vmatpush3.msra.mxu1 %v3460_v26  ;;  %v3457_v15 = vld [vmem:[%s6131_s6 + $0x158] sm:$0xff]  ;;  %v3424_v32 = vld [vmem:[%s6131_s6 + $0x50] sm:$0xff]  ;;  %v3439_v56 = vld [vmem:[%s6131_s6 + $0xc8] sm:$0xff]  ;;  %s4909_s25 = sshll.u32 %s5004_s21, 4  ;;  %s4910_s25 = int_to_ptr.vmem [resolvable:$false] %s4909_s25 }
 0x3bc   : > { %4307 = vmatpush3.msra.mxu0 %v3427_v41  ;;  %4486 = vmatprep.subr.mxu1 %v6200_v23  ;;  %v3456_v46 = vld [vmem:[%s6131_s6 + $0x150] sm:$0xff]  ;;  %v3423_v24 = vld [vmem:[%s6131_s6 + $0x48] sm:$0xff]  ;;  %v3438_v31 = vld [vmem:[%s6131_s6 + $0xc0] sm:$0xff]  ;;  %p4907_p11 = pnand %p4906_p5, %p6201_p6  ;;  %s4911_s5 = scalar_lea.vmem %s4910_s25, 64 }
 0x3bd   : > { %4308 = vmatprep.subr.mxu0 %v3442_v50  ;;  %4487 = vmatpush3.msra.mxu1 %v3459_v25  ;;  %v3455_v59 = vld [vmem:[%s6131_s6 + $0x148] sm:$0xff]  ;;  %v3422_v33 = vld [vmem:[%s6131_s6 + $0x40] sm:$0xff]  ;;  %v3437_v34 = vld [vmem:[%s6131_s6 + $0xb8] sm:$0xff]  ;;  %p4912_p8 = scmp.lt.s32.totalorder %s3800_s24, %s4910_s25  ;;  %p4913_p12 = scmp.lt.s32.totalorder %s4911_s5, %s4905_s19 }
 0x3be   : > { %4309 = vmatpush3.msra.mxu0 %v3426_v13  ;;  %4488 = vmatprep.subr.mxu1 %v6200_v23  ;;  %v3454_v37 = vld [vmem:[%s6131_s6 + $0x140] sm:$0xff]  ;;  %v3421_v54 = vld [vmem:[%s6131_s6 + $0x38] sm:$0xff]  ;;  %v3436_v61 = vld [vmem:[%s6131_s6 + $0xb0] sm:$0xff]  ;;  %p4908_p0 = pneg %p4907_p11 }
 0x3bf   : > { %4310 = vmatprep.subr.mxu0 %v3441_v19  ;;  %4489 = vmatpush3.msra.mxu1 %v3458_v27  ;;  %v3453_v35 = vld [vmem:[%s6131_s6 + $0x138] sm:$0xff]  ;;  %v3420_v30 = vld [vmem:[%s6131_s6 + $0x30] sm:$0xff]  ;;  %v3435_v63 = vld [vmem:[%s6131_s6 + $0xa8] sm:$0xff]  ;;  %p4914_p1 = por %p4913_p12, %p4912_p8 }
 0x3c0   : > { %4311 = vmatpush3.msra.mxu0 %v3425_v4  ;;  %4490 = vmatprep.subr.mxu1 %v6200_v23  ;;  %v3452_v38 = vld [vmem:[%s6131_s6 + $0x130] sm:$0xff]  ;;  %v3419_v39 = vld [vmem:[%s6131_s6 + $0x28] sm:$0xff]  ;;  %v3434_v6 = vld [vmem:[%s6131_s6 + $0xa0] sm:$0xff] }
 0x3c1   : > { %4312 = vmatprep.subr.mxu0 %v3440_v60  ;;  %4491 = vmatpush3.msra.mxu1 %v3457_v15  ;;  %v3451_v62 = vld [vmem:[%s6131_s6 + $0x128] sm:$0xff]  ;;  %v3418_v40 = vld [vmem:[%s6131_s6 + $0x20] sm:$0xff]  ;;  %v3433_v42 = vld [vmem:[%s6131_s6 + $0x98] sm:$0xff]  ;;  %p4915_p13 = pnand %p4914_p1, %p4908_p0 }
 0x3c2   : > { %4313 = vmatpush3.msra.mxu0 %v3424_v32  ;;  %4492 = vmatprep.subr.mxu1 %v6200_v23  ;;  %v3450_v43 = vld [vmem:[%s6131_s6 + $0x120] sm:$0xff]  ;;  %v3417_v17 = vld [vmem:[%s6131_s6 + $0x18] sm:$0xff]  ;;  %v3432_v44 = vld [vmem:[%s6131_s6 + $0x90] sm:$0xff] }
 0x3c3   : > { %4314 = vmatprep.subr.mxu0 %v3439_v56  ;;  %4493 = vmatpush3.msra.mxu1 %v3456_v46  ;;  %v3449_v45 = vld [vmem:[%s6131_s6 + $0x118] sm:$0xff]  ;;  %v3416_v51 = vld [vmem:[%s6131_s6 + $0x10] sm:$0xff]  ;;  %v3431_v9 = vld [vmem:[%s6131_s6 + $0x88] sm:$0xff] }
 0x3c4   : > { %4315 = vmatpush3.msra.mxu0 %v3423_v24  ;;  %4494 = vmatprep.subr.mxu1 %v6200_v23  ;;  %v3448_v10 = vld [vmem:[%s6131_s6 + $0x110] sm:$0xff]  ;;  %v3415_v47 = vld [vmem:[%s6131_s6 + $0x8] sm:$0xff]  ;;  %v3430_v20 = vld [vmem:[%s6131_s6 + $0x80] sm:$0xff] }
 0x3c5   : > { %4316 = vmatprep.subr.mxu0 %v3438_v31  ;;  %4495 = vmatpush3.msra.mxu1 %v3455_v59  ;;  %v3447_v12 = vld [vmem:[%s6131_s6 + $0x108] sm:$0xff]  ;;  %v3414_v11 = vld [vmem:[%s6131_s6] sm:$0xff]  ;;  %v3614_v53 = vld [vmem:[#allocation12 + $0x20] sm:$0xff] }
 0x3c6   : > { %4317 = vmatpush3.msra.mxu0 %v3422_v33  ;;  %4496 = vmatprep.subr.mxu1 %v6200_v23  ;;  %v3617_v28 = vld [vmem:[#allocation12 + $0x38] sm:$0xff]  ;;  %v3446_v57 = vld [vmem:[%s6131_s6 + $0x100] sm:$0xff]  ;;  %v3610_v5 = vld [vmem:[#allocation12] sm:$0xff] }
 0x3c7   : > { %4318 = vmatprep.subr.mxu0 %v3437_v34  ;;  %4497 = vmatpush3.msra.mxu1 %v3454_v37  ;;  %v3616_v52 = vld [vmem:[#allocation12 + $0x30] sm:$0xff]  ;;  %v3615_v21 = vld [vmem:[#allocation12 + $0x28] sm:$0xff]  ;;  %v3703_v18 = vld [vmem:[#allocation14 + $0x38] sm:$0xff] }
 0x3c8   : > { %4319 = vmatpush3.msra.mxu0 %v3421_v54  ;;  %4498 = vmatprep.subr.mxu1 %v6200_v23  ;;  %v3611_v1 = vld [vmem:[#allocation12 + $0x8] sm:$0xff]  ;;  %v3702_v58 = vld [vmem:[#allocation14 + $0x30] sm:$0xff]  ;;  %v3700_v16 = vld [vmem:[#allocation14 + $0x20] sm:$0xff] }
 0x3c9   : > { %4320 = vmatprep.subr.mxu0 %v3436_v61  ;;  %4499 = vmatpush3.msra.mxu1 %v3453_v35  ;;  %v3609_v0 = vld [vmem:[#allocation2] sm:$0x3]  ;;  %v3699_v7 = vld [vmem:[#allocation14 + $0x18] sm:$0xff]  ;;  %v3698_v14 = vld [vmem:[#allocation14 + $0x10] sm:$0xff] }
 0x3ca   : > { %4321 = vmatpush3.msra.mxu0 %v3420_v30  ;;  %4500 = vmatprep.subr.mxu1 %v6200_v23  ;;  %v3701_v3 = vld [vmem:[#allocation14 + $0x28] sm:$0xff]  ;;  %v3696_v29 = vld [vmem:[#allocation14] sm:$0xff]  ;;  %v4012_v26 = vld [vmem:[#allocation11] ss:$0 sm:$0xff] }
 0x3cb   : > { %4322 = vmatprep.subr.mxu0 %v3435_v63  ;;  %4501 = vmatpush3.msra.mxu1 %v3452_v38  ;;  %v3697_v55 = vld [vmem:[#allocation14 + $0x8] sm:$0xff]  ;;  %v4014_v4 = vld [vmem:[#allocation15] ss:$0 sm:$0xff] }
 0x3cc   : > { %4323 = vmatpush3.msra.mxu0 %v3419_v39  ;;  %4502 = vmatprep.subr.mxu1 %v6200_v23 }
 0x3cd   : > { %4324 = vmatprep.subr.mxu0 %v3434_v6  ;;  %4503 = vmatpush3.msra.mxu1 %v3451_v62 }
 0x3ce   : > { %4325 = vmatpush3.msra.mxu0 %v3418_v40  ;;  %4504 = vmatprep.subr.mxu1 %v6200_v23 }
 0x3cf   : > { %4326 = vmatprep.subr.mxu0 %v3433_v42  ;;  %4505 = vmatpush3.msra.mxu1 %v3450_v43 }
 0x3d0   : > { %4327 = vmatpush3.msra.mxu0 %v3417_v17  ;;  %4506 = vmatprep.subr.mxu1 %v6200_v23 }
 0x3d1   : > { %4328 = vmatprep.subr.mxu0 %v3432_v44  ;;  %4507 = vmatpush3.msra.mxu1 %v3449_v45 }
 0x3d2   : > { %4329 = vmatpush3.msra.mxu0 %v3416_v51  ;;  %4508 = vmatprep.subr.mxu1 %v6200_v23 }
 0x3d3   : > { %4330 = vmatprep.subr.mxu0 %v3431_v9  ;;  %4509 = vmatpush3.msra.mxu1 %v3448_v10 }
 0x3d4   : > { %4331 = vmatpush3.msra.mxu0 %v3415_v47  ;;  %4510 = vmatprep.subr.mxu1 %v6200_v23 }
 0x3d5   : > { %4332 = vmatprep.subr.mxu0 %v3430_v20  ;;  %4511 = vmatpush3.msra.mxu1 %v3447_v12 }
 0x3d6   : > { %4333 = vmatpush3.msra.mxu0 %v3414_v11  ;;  %4512 = vmatprep.subr.mxu1 %v6200_v23 }
 0x3d7   : > { %3534 = vmatmul.mubr.f32.vlgmr.msra.gmra.mxu0 %v5721_v48  ;;  %4517 = vmatprep.subr.mxu0 %v6200_v23  ;;  %v3613_v48 = vld [vmem:[#allocation12 + $0x18] sm:$0xff] }
 0x3d8   : > { %4518 = vmatpush3.msra.mxu0 %v3617_v28  ;;  %4513 = vmatpush3.msra.mxu1 %v3446_v57 }
 0x3d9   : > { %4519 = vmatprep.subr.mxu0 %v6200_v23  ;;  %4515 = vmatmul.mubr.f32.vlgmr.msra.gmra.mxu1 %v5718_v8  ;;  %v3612_v8 = vld [vmem:[#allocation12 + $0x10] sm:$0xff] }
 0x3da   : > { %4520 = vmatpush3.msra.mxu0 %v3616_v52  ;;  %4533 = vmatprep.mubr.msk.f32.mxu0 %vm5003_vm13, %v6200_v23 }
 0x3db   : > { %4521 = vmatprep.subr.mxu0 %v6200_v23  ;;  %4536 = vmatprep.subr.mxu1 %v6200_v23 }
 0x3dc   : > { %4522 = vmatpush3.msra.mxu0 %v3615_v21  ;;  %4552 = vmatprep.mubr.msk.f32.mxu1 %vm5003_vm13, %v6200_v23 }
 0x3dd   : > { %4523 = vmatprep.subr.mxu0 %v6200_v23  ;;  %4537 = vmatpush3.msra.mxu1 %v3703_v18 }
 0x3de   : > { %4524 = vmatpush3.msra.mxu0 %v3614_v53  ;;  %4538 = vmatprep.subr.mxu1 %v6200_v23 }
 0x3df   : > { %4525 = vmatprep.subr.mxu0 %v6200_v23  ;;  %4539 = vmatpush3.msra.mxu1 %v3702_v58 }
 0x3e0   : > { %4526 = vmatpush3.msra.mxu0 %v3613_v48  ;;  %4540 = vmatprep.subr.mxu1 %v6200_v23 }
 0x3e1   : > { %4527 = vmatprep.subr.mxu0 %v6200_v23  ;;  %4541 = vmatpush3.msra.mxu1 %v3701_v3 }
 0x3e2   : > { %4528 = vmatpush3.msra.mxu0 %v3612_v8  ;;  %4542 = vmatprep.subr.mxu1 %v6200_v23 }
 0x3e3   : > { %4529 = vmatprep.subr.mxu0 %v6200_v23  ;;  %4543 = vmatpush3.msra.mxu1 %v3700_v16 }
 0x3e4   : > { %4530 = vmatpush3.msra.mxu0 %v3611_v1  ;;  %4544 = vmatprep.subr.mxu1 %v6200_v23 }
 0x3e5   : > { %4531 = vmatprep.subr.mxu0 %v6200_v23  ;;  %4545 = vmatpush3.msra.mxu1 %v3699_v7 }
 0x3e6   : > { %4532 = vmatpush3.msra.mxu0 %v3610_v5  ;;  %4546 = vmatprep.subr.mxu1 %v6200_v23 }
 0x3e7   : > { %4534 = vmatmul.mubr.msk.f32.vlgmr.msra.gmra.mxu0 %vm3618_vm14, %v3609_v0  ;;  %4547 = vmatpush3.msra.mxu1 %v3698_v14 }
 0x3e8   : > { %4548 = vmatprep.subr.mxu1 %v6200_v23 }
 0x3e9   : > { %4549 = vmatpush3.msra.mxu1 %v3697_v55 }
 0x3ea   : > { %4550 = vmatprep.subr.mxu1 %v6200_v23 }
 0x3eb   : > { %4551 = vmatpush3.msra.mxu1 %v3696_v29 }
 0x497   : > { %v4334_v36 = vpop.f32.mrf.mxu0 }
 0x499   : > { %v3605_v49 = vpop.f32.mrf.mxu1  ;;  %v4335_v22 = vpop.f32.mrf.mxu0 }
 0x49a   : > { %v4336_v41 = vadd.f32 %v4335_v22, %v4334_v36 }
 0x49b   : > { %v4516_v2 = vpop.f32.mrf.mxu1 }
 0x49c   : > { %v3536_v50 = vadd.f32 %v4336_v41, %v4012_v26 }
 0x49e   : > { %v3606_v25 = vadd.f32 %v3605_v49, %v3536_v50 }
 0x4a7   : > { %v3688_v13 = vpop.f32.mrf.mxu0 }
 0x4a8   : > { %v3692_v19 = vadd.f32 %v3688_v13, %v3606_v25 }
 0x4a9   : > { %v4535_v27 = vpop.f32.mrf.mxu0 }
 0x4aa   : > { %4695 = vtanh.f32 %v3692_v19 }
 0x4b7   : > { %v4696_v23 = vpop.eup %4695 }
 0x4b8   : > { %3695 = vst.msk [vmem:[#allocation2] sm:$0x3] %vm3694_vm15, %v4696_v23  ;;  %4553 = vmatmul.mubr.msk.f32.vlgmr.msra.gmra.mxu1 %vm3618_vm14, %v4696_v23 }
 0x578   : > { %v3780_v60 = vpop.f32.mrf.mxu1 }
 0x579   : > { %v3781_v15 = vadd.f32 %v4014_v4, %v3780_v60 }
 0x57a   : > { %v4554_v32 = vpop.f32.mrf.mxu1 }
 0x57b   : > { %3784 = vst [vmem:[%s486_s26] sm:$0x3] %v3781_v15 }
 0x57c   : > { %4918 = shalt.err (!%p4915_p13)
}
 0x57d   : > { %s4919_s15 = scalar_lea.hbm %s6086_s30, 32  ;;  %s4923_s12 = scalar_lea.hbm %s6136_s11, 96 }
 0x57e   : > { %p4920_p2 = scmp.ne.s32.totalorder %s6086_s30, %s4919_s15  ;;  %p4924_p10 = scmp.lt.s32.totalorder %s6086_s30, %s6136_s11 }
 0x57f   : > { %p4925_p4 = scmp.lt.s32.totalorder %s4923_s12, %s4919_s15 }
 0x580   : > { %p4921_p3 = pnand %p4920_p2, %p6201_p6 }
 0x581   : > { %p4926_p7 = por %p4925_p4, %p4924_p10 }
 0x582   : > { %p4922_p9 = pneg %p4921_p3 }
 0x584   : > { %p4927_p5 = pnand %p4926_p7, %p4922_p9 }
 0x586   : > { %4930 = shalt.err (!%p4927_p5)
}
 0x587   : > { %4588 = dma.vmem_to_hbm [thread:$0]  (%p6201_p6), %s3800_s24, 32, %s6086_s30, %s3786_s2  }
 0x588 PF: > { %p4635_p11 = scmp.ge.s32.totalorder %s4985_s20, 2  ;;  %s3811_s22 = sand.u32 1, %s4973_s17  }
 0x589   : > { %p6202_p0 = scmp.ne.s32.totalorder %s6150_s28, 0  ;;  %s3812_s16 = scalar_lea.sflag [#allocation5], %s3811_s22 }
 0x58b   : > { %p4616_p8 = pnand %p4635_p11, %p6202_p0 }
 0x58d   : > { %p4617_p12 = pneg %p4616_p8 }
 0x58f   : > { %4968 = dma.done.wait (%p4617_p12), %s3812_s16, 32  }
 0x590   : > { %4970 = vsyncadd (%p4617_p12), %s3812_s16, 4294967264  ;;  %s6203_s19 = sld [smem:[#allocation24_spill]]  ;;  %p26_p1 = scmp.ge.s32.totalorder %s5090_s23, 5  }
 0x591   : > { %s6204_s21 = sld [smem:[#allocation25_spill]]  ;;  %s6205_s17 = smov %s4977_s18 }
 0x592   : > { %s6208_s20 = smov %s5090_s23 }
 0x593   :  { %28 = sbr.rel (!%p26_p1) target bundleno = 11 (0xb), region = 140 }
 0x596   : > { %s6206_s18 = smov %s6203_s19 }
 0x597   : > { %s6207_s19 = smov %s6204_s21 }
 0x598   :  { %3817 = vsyncpa [#allocation4], 1 }
 0x599   :  { %3819 = vsyncpa [#allocation4 + $0x1], 1 }
 0x59a   :  { %3820 = vsyncpa [#allocation7], 1 }
 0x59b   :  { %3821 = vsyncpa [#allocation10], 1 }
 0x59c   :  { %3822 = vsyncpa [#allocation13], 1 }
 0x59d   :  { %3823 = vsyncpa [#allocation16], 1 }
 0x59e   :  { %3824 = vsyncpa [#allocation5], 1 }
 0x59f   :  { %3826 = vsyncpa [#allocation5 + $0x1], 1 }

</bundles_post_ra>
